<compile_context>
chip_gen: v7x
topology: tpu7x:2x2x1
jax: 0.10.0
libtpu: 0.0.40
codegen_flags: <defaults>
</compile_context>

<pallas_src>
import functools

import jax
import jax.numpy as jnp
from jax.experimental import pallas as pl
from jax.experimental.pallas import tpu as pltpu

BN_EPS = 1e-5
_TM_MAX = 2048          # max rows per M tile (VMEM-bounded on v5e/v6e/v7x)
_TM_SPLIT = 256         # if M >= this, use an even number of M tiles (v7x 2 TCs)
_VMEM_LIMIT = 32 * 1024 * 1024


def _round_up(x, m):
    return (x + m - 1) // m * m


# ----------------------------------------------------------------------------
# Pallas kernels
# ----------------------------------------------------------------------------
def _fused_matmul_kernel(apply_relu, has_residual, *refs):
    """out = [relu]( x @ w + bias [+ residual] ); single K tile, no scratch."""
    if has_residual:
        x_ref, w_ref, b_ref, r_ref, o_ref = refs
    else:
        x_ref, w_ref, b_ref, o_ref = refs
        r_ref = None
    out = jnp.dot(x_ref[...], w_ref[...], preferred_element_type=jnp.float32)
    out = out + b_ref[...]
    if has_residual:
        out = out + r_ref[...].astype(jnp.float32)
    if apply_relu:
        out = jnp.maximum(out, 0.0)
    o_ref[...] = out.astype(o_ref.dtype)


def _pool_fc_kernel(x_ref, w_ref, b_ref, o_ref):
    """Global average pool over the spatial axis fused with the final Linear."""
    pooled = jnp.mean(x_ref[...].astype(jnp.float32), axis=1)       # (TB, C)
    o_ref[...] = jnp.dot(pooled.astype(jnp.bfloat16), w_ref[...],
                         preferred_element_type=jnp.float32) + b_ref[...]


# ----------------------------------------------------------------------------
# Wrappers around pallas_call
# ----------------------------------------------------------------------------
def fused_matmul(x, w, bias, residual=None, relu=True, out_dtype=jnp.bfloat16):
    """x: (M, K) bf16; w: (K, Np) bf16 (BN-folded, Np multiple of 128);
    bias: (1, Np) f32; residual: (M, Np) bf16 or None.  Returns (M, Np)."""
    M, K = x.shape
    Kw, Np = w.shape
    assert Kw == K and Np % 128 == 0

    # --- M tiling only; the whole K fits one tile -> no accumulator scratch --
    grid_m = pl.cdiv(M, _TM_MAX)
    if M >= _TM_SPLIT:
        grid_m = max(grid_m, 2)
        if grid_m % 2:
            grid_m += 1                      # even tile count: v7x has 2 TCs
    if grid_m > 1:
        tm = _round_up(pl.cdiv(M, grid_m), 16)
        grid_m = pl.cdiv(M, tm)              # partial last tile: OOB rows masked
    else:
        tm = M

    in_specs = [
        pl.BlockSpec((tm, K), lambda i: (i, 0)),
        pl.BlockSpec((K, Np), lambda i: (0, 0)),
        pl.BlockSpec((1, Np), lambda i: (0, 0)),
    ]
    inputs = [x.astype(jnp.bfloat16), w, bias]
    res_bytes = 0
    if residual is not None:
        assert residual.shape == (M, Np)
        in_specs.append(pl.BlockSpec((tm, Np), lambda i: (i, 0)))
        inputs.append(residual.astype(jnp.bfloat16))
        res_bytes = M * Np * 2

    cost = pl.CostEstimate(
        flops=2 * M * K * Np,
        transcendentals=0,
        bytes_accessed=M * K * 2 + K * Np * 2 + Np * 4 + M * Np * 2 + res_bytes)

    return pl.pallas_call(
        functools.partial(_fused_matmul_kernel, relu, residual is not None),
        out_shape=jax.ShapeDtypeStruct((M, Np), out_dtype),
        grid=(grid_m,),
        in_specs=in_specs,
        out_specs=pl.BlockSpec((tm, Np), lambda i: (i, 0)),
        compiler_params=pltpu.CompilerParams(
            dimension_semantics=("parallel",),
            vmem_limit_bytes=_VMEM_LIMIT),
        cost_estimate=cost,
    )(*inputs)


def pool_fc(x, fcp, fcm):
    """x: (N, H, W, C=128, already channel-padded) -> logits (N, n_cls)."""
    N, H, W, C = x.shape
    K, NclsP = fcp["wm"].shape
    assert K == C
    xm = x.reshape(N, H * W, C)

    tb = min(N, 256)
    grid_n = pl.cdiv(N, tb)
    if grid_n > 1:
        tb = _round_up(tb, 8)
        grid_n = pl.cdiv(N, tb)

    out = pl.pallas_call(
        _pool_fc_kernel,
        out_shape=jax.ShapeDtypeStruct((N, NclsP), jnp.float32),
        grid=(grid_n,),
        in_specs=[pl.BlockSpec((tb, H * W, C), lambda i: (i, 0, 0)),
                  pl.BlockSpec((K, NclsP), lambda i: (0, 0)),
                  pl.BlockSpec((1, NclsP), lambda i: (0, 0))],
        out_specs=pl.BlockSpec((tb, NclsP), lambda i: (i, 0)),
        compiler_params=pltpu.CompilerParams(
            dimension_semantics=("parallel",),
            vmem_limit_bytes=_VMEM_LIMIT),
    )(xm, fcp["wm"], fcp["bias"])
    return out[:, :fcm["n_cls"]]


# ----------------------------------------------------------------------------
# Conv (bf16 im2col, single materialization) + folded-BN + residual + ReLU
# ----------------------------------------------------------------------------
def conv2d_bn(x, cp, cm, stride, pad, residual=None, relu=True):
    """x: NHWC bf16 (channels may be zero-padded beyond cin).  Returns NHWC
    with channels padded to 128 (pad lanes are exactly zero)."""
    N, H, W, C = x.shape
    kh, kw, cin = cm["kh"], cm["kw"], cm["cin"]
    Kp = cp["wm"].shape[0]
    assert C >= cin

    xs = x if C == cin else x[..., :cin]     # fused into the windowing by XLA
    if pad:
        xs = jnp.pad(xs, ((0, 0), (pad, pad), (pad, pad), (0, 0)))
    Hp, Wp = H + 2 * pad, W + 2 * pad
    Ho = (Hp - kh) // stride + 1
    Wo = (Wp - kw) // stride + 1

    if kh == 1 and kw == 1:
        cols = xs[:, 0:stride * (Ho - 1) + 1:stride,
                  0:stride * (Wo - 1) + 1:stride, :]
    else:
        parts = [xs[:, i:i + stride * (Ho - 1) + 1:stride,
                    j:j + stride * (Wo - 1) + 1:stride, :]
                 for i in range(kh) for j in range(kw)]
        cols = jnp.concatenate(parts, axis=-1)       # (N, Ho, Wo, kh*kw*cin)

    K = kh * kw * cin
    xm = cols.reshape(N * Ho * Wo, K)
    if Kp > K:                                       # only the 3-ch stem (3->8)
        xm = jnp.pad(xm, ((0, 0), (0, Kp - K)))

    res = None
    if residual is not None:
        res = residual.reshape(N * Ho * Wo, residual.shape[-1])

    out = fused_matmul(xm, cp["wm"], cp["bias"], residual=res, relu=relu)
    return out.reshape(N, Ho, Wo, out.shape[-1])


# ----------------------------------------------------------------------------
# Parameters: arrays in `params`, static structure in `meta` (never traced)
# ----------------------------------------------------------------------------
def _kaiming_conv(key, kh, kw, cin, cout):
    fan_out = cout * kh * kw
    std = (2.0 / fan_out) ** 0.5
    return jax.random.normal(key, (kh, kw, cin, cout), jnp.float32) * std


def _bn_params(c):
    gamma = jnp.ones((c,), jnp.float32)
    beta = jnp.zeros((c,), jnp.float32)
    r_mean = jnp.zeros((c,), jnp.float32)
    r_var = jnp.ones((c,), jnp.float32)
    scale = gamma / jnp.sqrt(r_var + BN_EPS)        # eval-mode BN folded
    bias = beta - r_mean * scale
    return scale, bias


def prep_conv(w, bn_scale, bn_bias):
    """Fold BN into weights; pad K to a multiple of 8 and N to 128; cast bf16."""
    kh, kw, cin, cout = w.shape
    K = kh * kw * cin
    Kp = _round_up(K, 8)
    Np = _round_up(cout, 128)
    wm = (w * bn_scale).reshape(K, cout)
    wm = jnp.pad(wm, ((0, Kp - K), (0, Np - cout))).astype(jnp.bfloat16)
    bias = jnp.pad(bn_bias, (0, Np - cout)).reshape(1, Np).astype(jnp.float32)
    return ({"wm": wm, "bias": bias},
            {"kh": kh, "kw": kw, "cin": cin, "cout": cout})


def prep_fc(w, b):
    cin, n_cls = w.shape
    Kp, Np = _round_up(cin, 128), _round_up(n_cls, 128)
    wm = jnp.pad(w, ((0, Kp - cin), (0, Np - n_cls))).astype(jnp.bfloat16)
    bias = jnp.pad(b, (0, Np - n_cls)).reshape(1, Np).astype(jnp.float32)
    return ({"wm": wm, "bias": bias}, {"n_cls": n_cls})


def init_model(key, layers=(1, 1, 1), num_classes=10):
    keys = iter(jax.random.split(key, 64))
    params, meta = {}, {}
    # stem: Conv2d(3, 16, kernel_size=1, stride=1, padding=1, bias=False) + BN
    params["stem"], meta["stem"] = prep_conv(
        _kaiming_conv(next(keys), 1, 1, 3, 16), *_bn_params(16))

    inplanes = 16
    for li, (planes, nblocks, stride0) in enumerate(
            zip((16, 32, 64), layers, (1, 2, 2)), start=1):
        p_list, m_list = [], []
        for bidx in range(nblocks):
            stride = stride0 if bidx == 0 else 1
            bp, bm = {}, {"stride": stride}
            bp["conv1"], bm["conv1"] = prep_conv(
                _kaiming_conv(next(keys), 3, 3, inplanes, planes),
                *_bn_params(planes))
            bp["conv2"], bm["conv2"] = prep_conv(
                _kaiming_conv(next(keys), 3, 3, planes, planes),
                *_bn_params(planes))
            if stride != 1 or inplanes != planes:
                bp["down"], bm["down"] = prep_conv(
                    _kaiming_conv(next(keys), 1, 1, inplanes, planes),
                    *_bn_params(planes))
            inplanes = planes
            p_list.append(bp)
            m_list.append(bm)
        params[f"layer{li}"] = p_list
        meta[f"layer{li}"] = m_list

    # fc: the module's init loop applies kaiming_normal(fan_out) to Linear too
    std = (2.0 / num_classes) ** 0.5
    fc_w = jax.random.normal(next(keys), (64, num_classes), jnp.float32) * std
    fc_b = jax.random.uniform(next(keys), (num_classes,), jnp.float32,
                              -1.0 / 8.0, 1.0 / 8.0)
    params["fc"], meta["fc"] = prep_fc(fc_w, fc_b)
    return params, meta


# ----------------------------------------------------------------------------
# Forward pass
# ----------------------------------------------------------------------------
def basic_block(x, bp, bm):
    stride = bm["stride"]
    out = conv2d_bn(x, bp["conv1"], bm["conv1"], stride=stride, pad=1, relu=True)
    if "down" in bp:
        identity = conv2d_bn(x, bp["down"], bm["down"],
                             stride=stride, pad=0, relu=False)
    else:
        identity = x                          # already channel-padded to 128
    out = conv2d_bn(out, bp["conv2"], bm["conv2"], stride=1, pad=1,
                    residual=identity, relu=True)
    return out


def resnet_forward(meta, params, x_nchw):
    # NCHW (PyTorch) -> NHWC; activations flow in bf16, accumulation in f32.
    x = jnp.transpose(x_nchw, (0, 2, 3, 1)).astype(jnp.bfloat16)
    # stem: kernel_size=1 with padding=1 grows spatial dims by 2 (as in torch)
    x = conv2d_bn(x, params["stem"], meta["stem"], stride=1, pad=1, relu=True)
    for lname in ("layer1", "layer2", "layer3"):
        for bp, bm in zip(params[lname], meta[lname]):
            x = basic_block(x, bp, bm)
    return pool_fc(x, params["fc"], meta["fc"])       # (N, num_classes), f32


if __name__ == "__main__":
    key = jax.random.PRNGKey(0)
    pkey, xkey = jax.random.split(key)
    params, meta = init_model(pkey, layers=(1, 1, 1), num_classes=10)
    x = jax.random.normal(xkey, (2, 3, 16, 16), jnp.float32)   # NCHW like torch
    fwd = jax.jit(functools.partial(resnet_forward, meta))     # meta is static
    logits = fwd(params, x)
    jax.block_until_ready(logits)
    assert logits.shape == (2, 10), logits.shape
    assert bool(jnp.all(jnp.isfinite(logits)))
    print("KERNEL_OK")
</pallas_src>

<mosaic_0001>
module attributes {stable_mosaic.version = 11 : i64} {
  func.func @_fused_matmul_kernel(%arg0: i32, %arg1: memref<336x8xbf16, #tpu.memory_space<vmem>>, %arg2: memref<8x128xbf16, #tpu.memory_space<vmem>>, %arg3: memref<1x128xf32, #tpu.memory_space<vmem>>, %arg4: memref<336x128xbf16, #tpu.memory_space<vmem>>) attributes {dimension_semantics = [#tpu.dimension_semantics<parallel>], iteration_bounds = array<i64: 2>, scalar_prefetch = 0 : i64, scratch_operands = 0 : i64, tpu.core_type = #tpu.core_type<tc>, window_params = [{transform_indices = @transform_0, window_bounds = array<i64: 336, 8>}, {pipeline_mode = #tpu.pipeline_mode<synchronous>, transform_indices = @transform_1, window_bounds = array<i64: 8, 128>}, {pipeline_mode = #tpu.pipeline_mode<synchronous>, transform_indices = @transform_2, window_bounds = array<i64: 1, 128>}, {transform_indices = @transform_3, window_bounds = array<i64: 336, 128>}]} {
    %c0 = arith.constant 0 : index
    %c0_0 = arith.constant 0 : index
    %0 = vector.load %arg1[%c0, %c0_0] : memref<336x8xbf16, #tpu.memory_space<vmem>>, vector<336x8xbf16>
    %c0_1 = arith.constant 0 : index
    %c0_2 = arith.constant 0 : index
    %1 = vector.load %arg2[%c0_1, %c0_2] : memref<8x128xbf16, #tpu.memory_space<vmem>>, vector<8x128xbf16>
    %cst = arith.constant dense<0.000000e+00> : vector<336x128xf32>
    %2 = tpu.matmul %0, %1, %cst {dimension_numbers = #tpu.dot_dimension_numbers<[1], [0], [0], [1], [0, 0, 1, 1], [], []>} : vector<336x8xbf16>, vector<8x128xbf16>, vector<336x128xf32> -> vector<336x128xf32>
    %c0_3 = arith.constant 0 : index
    %c0_4 = arith.constant 0 : index
    %3 = vector.load %arg3[%c0_3, %c0_4] : memref<1x128xf32, #tpu.memory_space<vmem>>, vector<1x128xf32>
    %4 = vector.broadcast %3 : vector<1x128xf32> to vector<336x128xf32>
    %5 = arith.addf %2, %4 : vector<336x128xf32>
    %cst_5 = arith.constant 0.000000e+00 : f32
    %6 = vector.broadcast %cst_5 : f32 to vector<336x128xf32>
    %7 = arith.maximumf %5, %6 : vector<336x128xf32>
    %8 = arith.truncf %7 : vector<336x128xf32> to vector<336x128xbf16>
    %c0_6 = arith.constant 0 : index
    %c0_7 = arith.constant 0 : index
    %9 = vector.load %arg4[%c0_6, %c0_7] : memref<336x128xbf16, #tpu.memory_space<vmem>>, vector<336x128xbf16>
    tpu.vector_store %arg4[%c0_6, %c0_7], %8 {strides = array<i32>} : memref<336x128xbf16, #tpu.memory_space<vmem>>, vector<336x128xbf16>,
    return
  }
  func.func @transform_0(%arg0: i32) -> (i32, i32) {
    %c0_i32 = arith.constant 0 : i32
    %c0_i32_0 = arith.constant 0 : i32
    return %arg0, %c0_i32 : i32, i32
  }
  func.func @transform_1(%arg0: i32) -> (i32, i32) {
    %c0_i32 = arith.constant 0 : i32
    %c0_i32_0 = arith.constant 0 : i32
    %c0_i32_1 = arith.constant 0 : i32
    return %c0_i32, %c0_i32_0 : i32, i32
  }
  func.func @transform_2(%arg0: i32) -> (i32, i32) {
    %c0_i32 = arith.constant 0 : i32
    %c0_i32_0 = arith.constant 0 : i32
    %c0_i32_1 = arith.constant 0 : i32
    return %c0_i32, %c0_i32_0 : i32, i32
  }
  func.func @transform_3(%arg0: i32) -> (i32, i32) {
    %c0_i32 = arith.constant 0 : i32
    %c0_i32_0 = arith.constant 0 : i32
    return %arg0, %c0_i32 : i32, i32
  }
}

module attributes {stable_mosaic.version = 11 : i64} {
  func.func @_fused_matmul_kernel(%arg0: i32, %arg1: memref<336x144xbf16, #tpu.memory_space<vmem>>, %arg2: memref<144x128xbf16, #tpu.memory_space<vmem>>, %arg3: memref<1x128xf32, #tpu.memory_space<vmem>>, %arg4: memref<336x128xbf16, #tpu.memory_space<vmem>>) attributes {dimension_semantics = [#tpu.dimension_semantics<parallel>], iteration_bounds = array<i64: 2>, scalar_prefetch = 0 : i64, scratch_operands = 0 : i64, tpu.core_type = #tpu.core_type<tc>, window_params = [{transform_indices = @transform_0, window_bounds = array<i64: 336, 144>}, {pipeline_mode = #tpu.pipeline_mode<synchronous>, transform_indices = @transform_1, window_bounds = array<i64: 144, 128>}, {pipeline_mode = #tpu.pipeline_mode<synchronous>, transform_indices = @transform_2, window_bounds = array<i64: 1, 128>}, {transform_indices = @transform_3, window_bounds = array<i64: 336, 128>}]} {
    %c0 = arith.constant 0 : index
    %c0_0 = arith.constant 0 : index
    %0 = vector.load %arg1[%c0, %c0_0] : memref<336x144xbf16, #tpu.memory_space<vmem>>, vector<336x144xbf16>
    %c0_1 = arith.constant 0 : index
    %c0_2 = arith.constant 0 : index
    %1 = vector.load %arg2[%c0_1, %c0_2] : memref<144x128xbf16, #tpu.memory_space<vmem>>, vector<144x128xbf16>
    %cst = arith.constant dense<0.000000e+00> : vector<336x128xf32>
    %2 = tpu.matmul %0, %1, %cst {dimension_numbers = #tpu.dot_dimension_numbers<[1], [0], [0], [1], [0, 0, 1, 1], [], []>} : vector<336x144xbf16>, vector<144x128xbf16>, vector<336x128xf32> -> vector<336x128xf32>
    %c0_3 = arith.constant 0 : index
    %c0_4 = arith.constant 0 : index
    %3 = vector.load %arg3[%c0_3, %c0_4] : memref<1x128xf32, #tpu.memory_space<vmem>>, vector<1x128xf32>
    %4 = vector.broadcast %3 : vector<1x128xf32> to vector<336x128xf32>
    %5 = arith.addf %2, %4 : vector<336x128xf32>
    %cst_5 = arith.constant 0.000000e+00 : f32
    %6 = vector.broadcast %cst_5 : f32 to vector<336x128xf32>
    %7 = arith.maximumf %5, %6 : vector<336x128xf32>
    %8 = arith.truncf %7 : vector<336x128xf32> to vector<336x128xbf16>
    %c0_6 = arith.constant 0 : index
    %c0_7 = arith.constant 0 : index
    %9 = vector.load %arg4[%c0_6, %c0_7] : memref<336x128xbf16, #tpu.memory_space<vmem>>, vector<336x128xbf16>
    tpu.vector_store %arg4[%c0_6, %c0_7], %8 {strides = array<i32>} : memref<336x128xbf16, #tpu.memory_space<vmem>>, vector<336x128xbf16>,
    return
  }
  func.func @transform_0(%arg0: i32) -> (i32, i32) {
    %c0_i32 = arith.constant 0 : i32
    %c0_i32_0 = arith.constant 0 : i32
    return %arg0, %c0_i32 : i32, i32
  }
  func.func @transform_1(%arg0: i32) -> (i32, i32) {
    %c0_i32 = arith.constant 0 : i32
    %c0_i32_0 = arith.constant 0 : i32
    %c0_i32_1 = arith.constant 0 : i32
    return %c0_i32, %c0_i32_0 : i32, i32
  }
  func.func @transform_2(%arg0: i32) -> (i32, i32) {
    %c0_i32 = arith.constant 0 : i32
    %c0_i32_0 = arith.constant 0 : i32
    %c0_i32_1 = arith.constant 0 : i32
    return %c0_i32, %c0_i32_0 : i32, i32
  }
  func.func @transform_3(%arg0: i32) -> (i32, i32) {
    %c0_i32 = arith.constant 0 : i32
    %c0_i32_0 = arith.constant 0 : i32
    return %arg0, %c0_i32 : i32, i32
  }
}

module attributes {stable_mosaic.version = 11 : i64} {
  func.func @_fused_matmul_kernel(%arg0: i32, %arg1: memref<336x144xbf16, #tpu.memory_space<vmem>>, %arg2: memref<144x128xbf16, #tpu.memory_space<vmem>>, %arg3: memref<1x128xf32, #tpu.memory_space<vmem>>, %arg4: memref<336x128xbf16, #tpu.memory_space<vmem>>, %arg5: memref<336x128xbf16, #tpu.memory_space<vmem>>) attributes {dimension_semantics = [#tpu.dimension_semantics<parallel>], iteration_bounds = array<i64: 2>, scalar_prefetch = 0 : i64, scratch_operands = 0 : i64, tpu.core_type = #tpu.core_type<tc>, window_params = [{transform_indices = @transform_0, window_bounds = array<i64: 336, 144>}, {pipeline_mode = #tpu.pipeline_mode<synchronous>, transform_indices = @transform_1, window_bounds = array<i64: 144, 128>}, {pipeline_mode = #tpu.pipeline_mode<synchronous>, transform_indices = @transform_2, window_bounds = array<i64: 1, 128>}, {transform_indices = @transform_3, window_bounds = array<i64: 336, 128>}, {transform_indices = @transform_4, window_bounds = array<i64: 336, 128>}]} {
    %c0 = arith.constant 0 : index
    %c0_0 = arith.constant 0 : index
    %0 = vector.load %arg1[%c0, %c0_0] : memref<336x144xbf16, #tpu.memory_space<vmem>>, vector<336x144xbf16>
    %c0_1 = arith.constant 0 : index
    %c0_2 = arith.constant 0 : index
    %1 = vector.load %arg2[%c0_1, %c0_2] : memref<144x128xbf16, #tpu.memory_space<vmem>>, vector<144x128xbf16>
    %cst = arith.constant dense<0.000000e+00> : vector<336x128xf32>
    %2 = tpu.matmul %0, %1, %cst {dimension_numbers = #tpu.dot_dimension_numbers<[1], [0], [0], [1], [0, 0, 1, 1], [], []>} : vector<336x144xbf16>, vector<144x128xbf16>, vector<336x128xf32> -> vector<336x128xf32>
    %c0_3 = arith.constant 0 : index
    %c0_4 = arith.constant 0 : index
    %3 = vector.load %arg3[%c0_3, %c0_4] : memref<1x128xf32, #tpu.memory_space<vmem>>, vector<1x128xf32>
    %4 = vector.broadcast %3 : vector<1x128xf32> to vector<336x128xf32>
    %5 = arith.addf %2, %4 : vector<336x128xf32>
    %c0_5 = arith.constant 0 : index
    %c0_6 = arith.constant 0 : index
    %6 = vector.load %arg4[%c0_5, %c0_6] : memref<336x128xbf16, #tpu.memory_space<vmem>>, vector<336x128xbf16>
    %7 = arith.extf %6 : vector<336x128xbf16> to vector<336x128xf32>
    %8 = arith.addf %5, %7 : vector<336x128xf32>
    %cst_7 = arith.constant 0.000000e+00 : f32
    %9 = vector.broadcast %cst_7 : f32 to vector<336x128xf32>
    %10 = arith.maximumf %8, %9 : vector<336x128xf32>
    %11 = arith.truncf %10 : vector<336x128xf32> to vector<336x128xbf16>
    %c0_8 = arith.constant 0 : index
    %c0_9 = arith.constant 0 : index
    %12 = vector.load %arg5[%c0_8, %c0_9] : memref<336x128xbf16, #tpu.memory_space<vmem>>, vector<336x128xbf16>
    tpu.vector_store %arg5[%c0_8, %c0_9], %11 {strides = array<i32>} : memref<336x128xbf16, #tpu.memory_space<vmem>>, vector<336x128xbf16>,
    return
  }
  func.func @transform_0(%arg0: i32) -> (i32, i32) {
    %c0_i32 = arith.constant 0 : i32
    %c0_i32_0 = arith.constant 0 : i32
    return %arg0, %c0_i32 : i32, i32
  }
  func.func @transform_1(%arg0: i32) -> (i32, i32) {
    %c0_i32 = arith.constant 0 : i32
    %c0_i32_0 = arith.constant 0 : i32
    %c0_i32_1 = arith.constant 0 : i32
    return %c0_i32, %c0_i32_0 : i32, i32
  }
  func.func @transform_2(%arg0: i32) -> (i32, i32) {
    %c0_i32 = arith.constant 0 : i32
    %c0_i32_0 = arith.constant 0 : i32
    %c0_i32_1 = arith.constant 0 : i32
    return %c0_i32, %c0_i32_0 : i32, i32
  }
  func.func @transform_3(%arg0: i32) -> (i32, i32) {
    %c0_i32 = arith.constant 0 : i32
    %c0_i32_0 = arith.constant 0 : i32
    return %arg0, %c0_i32 : i32, i32
  }
  func.func @transform_4(%arg0: i32) -> (i32, i32) {
    %c0_i32 = arith.constant 0 : i32
    %c0_i32_0 = arith.constant 0 : i32
    return %arg0, %c0_i32 : i32, i32
  }
}

module attributes {stable_mosaic.version = 11 : i64} {
  func.func @_fused_matmul_kernel(%arg0: i32, %arg1: memref<162x16xbf16, #tpu.memory_space<vmem>>, %arg2: memref<16x128xbf16, #tpu.memory_space<vmem>>, %arg3: memref<1x128xf32, #tpu.memory_space<vmem>>, %arg4: memref<162x128xbf16, #tpu.memory_space<vmem>>) attributes {dimension_semantics = [#tpu.dimension_semantics<parallel>], iteration_bounds = array<i64: 1>, scalar_prefetch = 0 : i64, scratch_operands = 0 : i64, tpu.core_type = #tpu.core_type<tc>, window_params = [{transform_indices = @transform_0, window_bounds = array<i64: 162, 16>}, {pipeline_mode = #tpu.pipeline_mode<synchronous>, transform_indices = @transform_1, window_bounds = array<i64: 16, 128>}, {pipeline_mode = #tpu.pipeline_mode<synchronous>, transform_indices = @transform_2, window_bounds = array<i64: 1, 128>}, {transform_indices = @transform_3, window_bounds = array<i64: 162, 128>}]} {
    %c0 = arith.constant 0 : index
    %c0_0 = arith.constant 0 : index
    %0 = vector.load %arg1[%c0, %c0_0] : memref<162x16xbf16, #tpu.memory_space<vmem>>, vector<162x16xbf16>
    %c0_1 = arith.constant 0 : index
    %c0_2 = arith.constant 0 : index
    %1 = vector.load %arg2[%c0_1, %c0_2] : memref<16x128xbf16, #tpu.memory_space<vmem>>, vector<16x128xbf16>
    %cst = arith.constant dense<0.000000e+00> : vector<162x128xf32>
    %2 = tpu.matmul %0, %1, %cst {dimension_numbers = #tpu.dot_dimension_numbers<[1], [0], [0], [1], [0, 0, 1, 1], [], []>} : vector<162x16xbf16>, vector<16x128xbf16>, vector<162x128xf32> -> vector<162x128xf32>
    %c0_3 = arith.constant 0 : index
    %c0_4 = arith.constant 0 : index
    %3 = vector.load %arg3[%c0_3, %c0_4] : memref<1x128xf32, #tpu.memory_space<vmem>>, vector<1x128xf32>
    %4 = vector.broadcast %3 : vector<1x128xf32> to vector<162x128xf32>
    %5 = arith.addf %2, %4 : vector<162x128xf32>
    %6 = arith.truncf %5 : vector<162x128xf32> to vector<162x128xbf16>
    %c0_5 = arith.constant 0 : index
    %c0_6 = arith.constant 0 : index
    %7 = vector.load %arg4[%c0_5, %c0_6] : memref<162x128xbf16, #tpu.memory_space<vmem>>, vector<162x128xbf16>
    tpu.vector_store %arg4[%c0_5, %c0_6], %6 {strides = array<i32>} : memref<162x128xbf16, #tpu.memory_space<vmem>>, vector<162x128xbf16>,
    return
  }
  func.func @transform_0(%arg0: i32) -> (i32, i32) {
    %c0_i32 = arith.constant 0 : i32
    %c0_i32_0 = arith.constant 0 : i32
    return %arg0, %c0_i32 : i32, i32
  }
  func.func @transform_1(%arg0: i32) -> (i32, i32) {
    %c0_i32 = arith.constant 0 : i32
    %c0_i32_0 = arith.constant 0 : i32
    %c0_i32_1 = arith.constant 0 : i32
    return %c0_i32, %c0_i32_0 : i32, i32
  }
  func.func @transform_2(%arg0: i32) -> (i32, i32) {
    %c0_i32 = arith.constant 0 : i32
    %c0_i32_0 = arith.constant 0 : i32
    %c0_i32_1 = arith.constant 0 : i32
    return %c0_i32, %c0_i32_0 : i32, i32
  }
  func.func @transform_3(%arg0: i32) -> (i32, i32) {
    %c0_i32 = arith.constant 0 : i32
    %c0_i32_0 = arith.constant 0 : i32
    return %arg0, %c0_i32 : i32, i32
  }
}

module attributes {stable_mosaic.version = 11 : i64} {
  func.func @_fused_matmul_kernel(%arg0: i32, %arg1: memref<162x144xbf16, #tpu.memory_space<vmem>>, %arg2: memref<144x128xbf16, #tpu.memory_space<vmem>>, %arg3: memref<1x128xf32, #tpu.memory_space<vmem>>, %arg4: memref<162x128xbf16, #tpu.memory_space<vmem>>) attributes {dimension_semantics = [#tpu.dimension_semantics<parallel>], iteration_bounds = array<i64: 1>, scalar_prefetch = 0 : i64, scratch_operands = 0 : i64, tpu.core_type = #tpu.core_type<tc>, window_params = [{transform_indices = @transform_0, window_bounds = array<i64: 162, 144>}, {pipeline_mode = #tpu.pipeline_mode<synchronous>, transform_indices = @transform_1, window_bounds = array<i64: 144, 128>}, {pipeline_mode = #tpu.pipeline_mode<synchronous>, transform_indices = @transform_2, window_bounds = array<i64: 1, 128>}, {transform_indices = @transform_3, window_bounds = array<i64: 162, 128>}]} {
    %c0 = arith.constant 0 : index
    %c0_0 = arith.constant 0 : index
    %0 = vector.load %arg1[%c0, %c0_0] : memref<162x144xbf16, #tpu.memory_space<vmem>>, vector<162x144xbf16>
    %c0_1 = arith.constant 0 : index
    %c0_2 = arith.constant 0 : index
    %1 = vector.load %arg2[%c0_1, %c0_2] : memref<144x128xbf16, #tpu.memory_space<vmem>>, vector<144x128xbf16>
    %cst = arith.constant dense<0.000000e+00> : vector<162x128xf32>
    %2 = tpu.matmul %0, %1, %cst {dimension_numbers = #tpu.dot_dimension_numbers<[1], [0], [0], [1], [0, 0, 1, 1], [], []>} : vector<162x144xbf16>, vector<144x128xbf16>, vector<162x128xf32> -> vector<162x128xf32>
    %c0_3 = arith.constant 0 : index
    %c0_4 = arith.constant 0 : index
    %3 = vector.load %arg3[%c0_3, %c0_4] : memref<1x128xf32, #tpu.memory_space<vmem>>, vector<1x128xf32>
    %4 = vector.broadcast %3 : vector<1x128xf32> to vector<162x128xf32>
    %5 = arith.addf %2, %4 : vector<162x128xf32>
    %cst_5 = arith.constant 0.000000e+00 : f32
    %6 = vector.broadcast %cst_5 : f32 to vector<162x128xf32>
    %7 = arith.maximumf %5, %6 : vector<162x128xf32>
    %8 = arith.truncf %7 : vector<162x128xf32> to vector<162x128xbf16>
    %c0_6 = arith.constant 0 : index
    %c0_7 = arith.constant 0 : index
    %9 = vector.load %arg4[%c0_6, %c0_7] : memref<162x128xbf16, #tpu.memory_space<vmem>>, vector<162x128xbf16>
    tpu.vector_store %arg4[%c0_6, %c0_7], %8 {strides = array<i32>} : memref<162x128xbf16, #tpu.memory_space<vmem>>, vector<162x128xbf16>,
    return
  }
  func.func @transform_0(%arg0: i32) -> (i32, i32) {
    %c0_i32 = arith.constant 0 : i32
    %c0_i32_0 = arith.constant 0 : i32
    return %arg0, %c0_i32 : i32, i32
  }
  func.func @transform_1(%arg0: i32) -> (i32, i32) {
    %c0_i32 = arith.constant 0 : i32
    %c0_i32_0 = arith.constant 0 : i32
    %c0_i32_1 = arith.constant 0 : i32
    return %c0_i32, %c0_i32_0 : i32, i32
  }
  func.func @transform_2(%arg0: i32) -> (i32, i32) {
    %c0_i32 = arith.constant 0 : i32
    %c0_i32_0 = arith.constant 0 : i32
    %c0_i32_1 = arith.constant 0 : i32
    return %c0_i32, %c0_i32_0 : i32, i32
  }
  func.func @transform_3(%arg0: i32) -> (i32, i32) {
    %c0_i32 = arith.constant 0 : i32
    %c0_i32_0 = arith.constant 0 : i32
    return %arg0, %c0_i32 : i32, i32
  }
}

module attributes {stable_mosaic.version = 11 : i64} {
  func.func @_fused_matmul_kernel(%arg0: i32, %arg1: memref<162x288xbf16, #tpu.memory_space<vmem>>, %arg2: memref<288x128xbf16, #tpu.memory_space<vmem>>, %arg3: memref<1x128xf32, #tpu.memory_space<vmem>>, %arg4: memref<162x128xbf16, #tpu.memory_space<vmem>>, %arg5: memref<162x128xbf16, #tpu.memory_space<vmem>>) attributes {dimension_semantics = [#tpu.dimension_semantics<parallel>], iteration_bounds = array<i64: 1>, scalar_prefetch = 0 : i64, scratch_operands = 0 : i64, tpu.core_type = #tpu.core_type<tc>, window_params = [{transform_indices = @transform_0, window_bounds = array<i64: 162, 288>}, {pipeline_mode = #tpu.pipeline_mode<synchronous>, transform_indices = @transform_1, window_bounds = array<i64: 288, 128>}, {pipeline_mode = #tpu.pipeline_mode<synchronous>, transform_indices = @transform_2, window_bounds = array<i64: 1, 128>}, {transform_indices = @transform_3, window_bounds = array<i64: 162, 128>}, {transform_indices = @transform_4, window_bounds = array<i64: 162, 128>}]} {
    %c0 = arith.constant 0 : index
    %c0_0 = arith.constant 0 : index
    %0 = vector.load %arg1[%c0, %c0_0] : memref<162x288xbf16, #tpu.memory_space<vmem>>, vector<162x288xbf16>
    %c0_1 = arith.constant 0 : index
    %c0_2 = arith.constant 0 : index
    %1 = vector.load %arg2[%c0_1, %c0_2] : memref<288x128xbf16, #tpu.memory_space<vmem>>, vector<288x128xbf16>
    %cst = arith.constant dense<0.000000e+00> : vector<162x128xf32>
    %2 = tpu.matmul %0, %1, %cst {dimension_numbers = #tpu.dot_dimension_numbers<[1], [0], [0], [1], [0, 0, 1, 1], [], []>} : vector<162x288xbf16>, vector<288x128xbf16>, vector<162x128xf32> -> vector<162x128xf32>
    %c0_3 = arith.constant 0 : index
    %c0_4 = arith.constant 0 : index
    %3 = vector.load %arg3[%c0_3, %c0_4] : memref<1x128xf32, #tpu.memory_space<vmem>>, vector<1x128xf32>
    %4 = vector.broadcast %3 : vector<1x128xf32> to vector<162x128xf32>
    %5 = arith.addf %2, %4 : vector<162x128xf32>
    %c0_5 = arith.constant 0 : index
    %c0_6 = arith.constant 0 : index
    %6 = vector.load %arg4[%c0_5, %c0_6] : memref<162x128xbf16, #tpu.memory_space<vmem>>, vector<162x128xbf16>
    %7 = arith.extf %6 : vector<162x128xbf16> to vector<162x128xf32>
    %8 = arith.addf %5, %7 : vector<162x128xf32>
    %cst_7 = arith.constant 0.000000e+00 : f32
    %9 = vector.broadcast %cst_7 : f32 to vector<162x128xf32>
    %10 = arith.maximumf %8, %9 : vector<162x128xf32>
    %11 = arith.truncf %10 : vector<162x128xf32> to vector<162x128xbf16>
    %c0_8 = arith.constant 0 : index
    %c0_9 = arith.constant 0 : index
    %12 = vector.load %arg5[%c0_8, %c0_9] : memref<162x128xbf16, #tpu.memory_space<vmem>>, vector<162x128xbf16>
    tpu.vector_store %arg5[%c0_8, %c0_9], %11 {strides = array<i32>} : memref<162x128xbf16, #tpu.memory_space<vmem>>, vector<162x128xbf16>,
    return
  }
  func.func @transform_0(%arg0: i32) -> (i32, i32) {
    %c0_i32 = arith.constant 0 : i32
    %c0_i32_0 = arith.constant 0 : i32
    return %arg0, %c0_i32 : i32, i32
  }
  func.func @transform_1(%arg0: i32) -> (i32, i32) {
    %c0_i32 = arith.constant 0 : i32
    %c0_i32_0 = arith.constant 0 : i32
    %c0_i32_1 = arith.constant 0 : i32
    return %c0_i32, %c0_i32_0 : i32, i32
  }
  func.func @transform_2(%arg0: i32) -> (i32, i32) {
    %c0_i32 = arith.constant 0 : i32
    %c0_i32_0 = arith.constant 0 : i32
    %c0_i32_1 = arith.constant 0 : i32
    return %c0_i32, %c0_i32_0 : i32, i32
  }
  func.func @transform_3(%arg0: i32) -> (i32, i32) {
    %c0_i32 = arith.constant 0 : i32
    %c0_i32_0 = arith.constant 0 : i32
    return %arg0, %c0_i32 : i32, i32
  }
  func.func @transform_4(%arg0: i32) -> (i32, i32) {
    %c0_i32 = arith.constant 0 : i32
    %c0_i32_0 = arith.constant 0 : i32
    return %arg0, %c0_i32 : i32, i32
  }
}

module attributes {stable_mosaic.version = 11 : i64} {
  func.func @_fused_matmul_kernel(%arg0: i32, %arg1: memref<50x32xbf16, #tpu.memory_space<vmem>>, %arg2: memref<32x128xbf16, #tpu.memory_space<vmem>>, %arg3: memref<1x128xf32, #tpu.memory_space<vmem>>, %arg4: memref<50x128xbf16, #tpu.memory_space<vmem>>) attributes {dimension_semantics = [#tpu.dimension_semantics<parallel>], iteration_bounds = array<i64: 1>, scalar_prefetch = 0 : i64, scratch_operands = 0 : i64, tpu.core_type = #tpu.core_type<tc>, window_params = [{transform_indices = @transform_0, window_bounds = array<i64: 50, 32>}, {pipeline_mode = #tpu.pipeline_mode<synchronous>, transform_indices = @transform_1, window_bounds = array<i64: 32, 128>}, {pipeline_mode = #tpu.pipeline_mode<synchronous>, transform_indices = @transform_2, window_bounds = array<i64: 1, 128>}, {transform_indices = @transform_3, window_bounds = array<i64: 50, 128>}]} {
    %c0 = arith.constant 0 : index
    %c0_0 = arith.constant 0 : index
    %0 = vector.load %arg1[%c0, %c0_0] : memref<50x32xbf16, #tpu.memory_space<vmem>>, vector<50x32xbf16>
    %c0_1 = arith.constant 0 : index
    %c0_2 = arith.constant 0 : index
    %1 = vector.load %arg2[%c0_1, %c0_2] : memref<32x128xbf16, #tpu.memory_space<vmem>>, vector<32x128xbf16>
    %cst = arith.constant dense<0.000000e+00> : vector<50x128xf32>
    %2 = tpu.matmul %0, %1, %cst {dimension_numbers = #tpu.dot_dimension_numbers<[1], [0], [0], [1], [0, 0, 1, 1], [], []>} : vector<50x32xbf16>, vector<32x128xbf16>, vector<50x128xf32> -> vector<50x128xf32>
    %c0_3 = arith.constant 0 : index
    %c0_4 = arith.constant 0 : index
    %3 = vector.load %arg3[%c0_3, %c0_4] : memref<1x128xf32, #tpu.memory_space<vmem>>, vector<1x128xf32>
    %4 = vector.broadcast %3 : vector<1x128xf32> to vector<50x128xf32>
    %5 = arith.addf %2, %4 : vector<50x128xf32>
    %6 = arith.truncf %5 : vector<50x128xf32> to vector<50x128xbf16>
    %c0_5 = arith.constant 0 : index
    %c0_6 = arith.constant 0 : index
    %7 = vector.load %arg4[%c0_5, %c0_6] : memref<50x128xbf16, #tpu.memory_space<vmem>>, vector<50x128xbf16>
    tpu.vector_store %arg4[%c0_5, %c0_6], %6 {strides = array<i32>} : memref<50x128xbf16, #tpu.memory_space<vmem>>, vector<50x128xbf16>,
    return
  }
  func.func @transform_0(%arg0: i32) -> (i32, i32) {
    %c0_i32 = arith.constant 0 : i32
    %c0_i32_0 = arith.constant 0 : i32
    return %arg0, %c0_i32 : i32, i32
  }
  func.func @transform_1(%arg0: i32) -> (i32, i32) {
    %c0_i32 = arith.constant 0 : i32
    %c0_i32_0 = arith.constant 0 : i32
    %c0_i32_1 = arith.constant 0 : i32
    return %c0_i32, %c0_i32_0 : i32, i32
  }
  func.func @transform_2(%arg0: i32) -> (i32, i32) {
    %c0_i32 = arith.constant 0 : i32
    %c0_i32_0 = arith.constant 0 : i32
    %c0_i32_1 = arith.constant 0 : i32
    return %c0_i32, %c0_i32_0 : i32, i32
  }
  func.func @transform_3(%arg0: i32) -> (i32, i32) {
    %c0_i32 = arith.constant 0 : i32
    %c0_i32_0 = arith.constant 0 : i32
    return %arg0, %c0_i32 : i32, i32
  }
}

module attributes {stable_mosaic.version = 11 : i64} {
  func.func @_fused_matmul_kernel(%arg0: i32, %arg1: memref<50x288xbf16, #tpu.memory_space<vmem>>, %arg2: memref<288x128xbf16, #tpu.memory_space<vmem>>, %arg3: memref<1x128xf32, #tpu.memory_space<vmem>>, %arg4: memref<50x128xbf16, #tpu.memory_space<vmem>>) attributes {dimension_semantics = [#tpu.dimension_semantics<parallel>], iteration_bounds = array<i64: 1>, scalar_prefetch = 0 : i64, scratch_operands = 0 : i64, tpu.core_type = #tpu.core_type<tc>, window_params = [{transform_indices = @transform_0, window_bounds = array<i64: 50, 288>}, {pipeline_mode = #tpu.pipeline_mode<synchronous>, transform_indices = @transform_1, window_bounds = array<i64: 288, 128>}, {pipeline_mode = #tpu.pipeline_mode<synchronous>, transform_indices = @transform_2, window_bounds = array<i64: 1, 128>}, {transform_indices = @transform_3, window_bounds = array<i64: 50, 128>}]} {
    %c0 = arith.constant 0 : index
    %c0_0 = arith.constant 0 : index
    %0 = vector.load %arg1[%c0, %c0_0] : memref<50x288xbf16, #tpu.memory_space<vmem>>, vector<50x288xbf16>
    %c0_1 = arith.constant 0 : index
    %c0_2 = arith.constant 0 : index
    %1 = vector.load %arg2[%c0_1, %c0_2] : memref<288x128xbf16, #tpu.memory_space<vmem>>, vector<288x128xbf16>
    %cst = arith.constant dense<0.000000e+00> : vector<50x128xf32>
    %2 = tpu.matmul %0, %1, %cst {dimension_numbers = #tpu.dot_dimension_numbers<[1], [0], [0], [1], [0, 0, 1, 1], [], []>} : vector<50x288xbf16>, vector<288x128xbf16>, vector<50x128xf32> -> vector<50x128xf32>
    %c0_3 = arith.constant 0 : index
    %c0_4 = arith.constant 0 : index
    %3 = vector.load %arg3[%c0_3, %c0_4] : memref<1x128xf32, #tpu.memory_space<vmem>>, vector<1x128xf32>
    %4 = vector.broadcast %3 : vector<1x128xf32> to vector<50x128xf32>
    %5 = arith.addf %2, %4 : vector<50x128xf32>
    %cst_5 = arith.constant 0.000000e+00 : f32
    %6 = vector.broadcast %cst_5 : f32 to vector<50x128xf32>
    %7 = arith.maximumf %5, %6 : vector<50x128xf32>
    %8 = arith.truncf %7 : vector<50x128xf32> to vector<50x128xbf16>
    %c0_6 = arith.constant 0 : index
    %c0_7 = arith.constant 0 : index
    %9 = vector.load %arg4[%c0_6, %c0_7] : memref<50x128xbf16, #tpu.memory_space<vmem>>, vector<50x128xbf16>
    tpu.vector_store %arg4[%c0_6, %c0_7], %8 {strides = array<i32>} : memref<50x128xbf16, #tpu.memory_space<vmem>>, vector<50x128xbf16>,
    return
  }
  func.func @transform_0(%arg0: i32) -> (i32, i32) {
    %c0_i32 = arith.constant 0 : i32
    %c0_i32_0 = arith.constant 0 : i32
    return %arg0, %c0_i32 : i32, i32
  }
  func.func @transform_1(%arg0: i32) -> (i32, i32) {
    %c0_i32 = arith.constant 0 : i32
    %c0_i32_0 = arith.constant 0 : i32
    %c0_i32_1 = arith.constant 0 : i32
    return %c0_i32, %c0_i32_0 : i32, i32
  }
  func.func @transform_2(%arg0: i32) -> (i32, i32) {
    %c0_i32 = arith.constant 0 : i32
    %c0_i32_0 = arith.constant 0 : i32
    %c0_i32_1 = arith.constant 0 : i32
    return %c0_i32, %c0_i32_0 : i32, i32
  }
  func.func @transform_3(%arg0: i32) -> (i32, i32) {
    %c0_i32 = arith.constant 0 : i32
    %c0_i32_0 = arith.constant 0 : i32
    return %arg0, %c0_i32 : i32, i32
  }
}

module attributes {stable_mosaic.version = 11 : i64} {
  func.func @_fused_matmul_kernel(%arg0: i32, %arg1: memref<50x576xbf16, #tpu.memory_space<vmem>>, %arg2: memref<576x128xbf16, #tpu.memory_space<vmem>>, %arg3: memref<1x128xf32, #tpu.memory_space<vmem>>, %arg4: memref<50x128xbf16, #tpu.memory_space<vmem>>, %arg5: memref<50x128xbf16, #tpu.memory_space<vmem>>) attributes {dimension_semantics = [#tpu.dimension_semantics<parallel>], iteration_bounds = array<i64: 1>, scalar_prefetch = 0 : i64, scratch_operands = 0 : i64, tpu.core_type = #tpu.core_type<tc>, window_params = [{transform_indices = @transform_0, window_bounds = array<i64: 50, 576>}, {pipeline_mode = #tpu.pipeline_mode<synchronous>, transform_indices = @transform_1, window_bounds = array<i64: 576, 128>}, {pipeline_mode = #tpu.pipeline_mode<synchronous>, transform_indices = @transform_2, window_bounds = array<i64: 1, 128>}, {transform_indices = @transform_3, window_bounds = array<i64: 50, 128>}, {transform_indices = @transform_4, window_bounds = array<i64: 50, 128>}]} {
    %c0 = arith.constant 0 : index
    %c0_0 = arith.constant 0 : index
    %0 = vector.load %arg1[%c0, %c0_0] : memref<50x576xbf16, #tpu.memory_space<vmem>>, vector<50x576xbf16>
    %c0_1 = arith.constant 0 : index
    %c0_2 = arith.constant 0 : index
    %1 = vector.load %arg2[%c0_1, %c0_2] : memref<576x128xbf16, #tpu.memory_space<vmem>>, vector<576x128xbf16>
    %cst = arith.constant dense<0.000000e+00> : vector<50x128xf32>
    %2 = tpu.matmul %0, %1, %cst {dimension_numbers = #tpu.dot_dimension_numbers<[1], [0], [0], [1], [0, 0, 1, 1], [], []>} : vector<50x576xbf16>, vector<576x128xbf16>, vector<50x128xf32> -> vector<50x128xf32>
    %c0_3 = arith.constant 0 : index
    %c0_4 = arith.constant 0 : index
    %3 = vector.load %arg3[%c0_3, %c0_4] : memref<1x128xf32, #tpu.memory_space<vmem>>, vector<1x128xf32>
    %4 = vector.broadcast %3 : vector<1x128xf32> to vector<50x128xf32>
    %5 = arith.addf %2, %4 : vector<50x128xf32>
    %c0_5 = arith.constant 0 : index
    %c0_6 = arith.constant 0 : index
    %6 = vector.load %arg4[%c0_5, %c0_6] : memref<50x128xbf16, #tpu.memory_space<vmem>>, vector<50x128xbf16>
    %7 = arith.extf %6 : vector<50x128xbf16> to vector<50x128xf32>
    %8 = arith.addf %5, %7 : vector<50x128xf32>
    %cst_7 = arith.constant 0.000000e+00 : f32
    %9 = vector.broadcast %cst_7 : f32 to vector<50x128xf32>
    %10 = arith.maximumf %8, %9 : vector<50x128xf32>
    %11 = arith.truncf %10 : vector<50x128xf32> to vector<50x128xbf16>
    %c0_8 = arith.constant 0 : index
    %c0_9 = arith.constant 0 : index
    %12 = vector.load %arg5[%c0_8, %c0_9] : memref<50x128xbf16, #tpu.memory_space<vmem>>, vector<50x128xbf16>
    tpu.vector_store %arg5[%c0_8, %c0_9], %11 {strides = array<i32>} : memref<50x128xbf16, #tpu.memory_space<vmem>>, vector<50x128xbf16>,
    return
  }
  func.func @transform_0(%arg0: i32) -> (i32, i32) {
    %c0_i32 = arith.constant 0 : i32
    %c0_i32_0 = arith.constant 0 : i32
    return %arg0, %c0_i32 : i32, i32
  }
  func.func @transform_1(%arg0: i32) -> (i32, i32) {
    %c0_i32 = arith.constant 0 : i32
    %c0_i32_0 = arith.constant 0 : i32
    %c0_i32_1 = arith.constant 0 : i32
    return %c0_i32, %c0_i32_0 : i32, i32
  }
  func.func @transform_2(%arg0: i32) -> (i32, i32) {
    %c0_i32 = arith.constant 0 : i32
    %c0_i32_0 = arith.constant 0 : i32
    %c0_i32_1 = arith.constant 0 : i32
    return %c0_i32, %c0_i32_0 : i32, i32
  }
  func.func @transform_3(%arg0: i32) -> (i32, i32) {
    %c0_i32 = arith.constant 0 : i32
    %c0_i32_0 = arith.constant 0 : i32
    return %arg0, %c0_i32 : i32, i32
  }
  func.func @transform_4(%arg0: i32) -> (i32, i32) {
    %c0_i32 = arith.constant 0 : i32
    %c0_i32_0 = arith.constant 0 : i32
    return %arg0, %c0_i32 : i32, i32
  }
}

module attributes {stable_mosaic.version = 11 : i64} {
  func.func @_pool_fc_kernel(%arg0: i32, %arg1: memref<2x25x128xbf16, #tpu.memory_space<vmem>>, %arg2: memref<128x128xbf16, #tpu.memory_space<vmem>>, %arg3: memref<1x128xf32, #tpu.memory_space<vmem>>, %arg4: memref<2x128xf32, #tpu.memory_space<vmem>>) attributes {dimension_semantics = [#tpu.dimension_semantics<parallel>], iteration_bounds = array<i64: 1>, scalar_prefetch = 0 : i64, scratch_operands = 0 : i64, tpu.core_type = #tpu.core_type<tc>, window_params = [{transform_indices = @transform_0, window_bounds = array<i64: 2, 25, 128>}, {pipeline_mode = #tpu.pipeline_mode<synchronous>, transform_indices = @transform_1, window_bounds = array<i64: 128, 128>}, {pipeline_mode = #tpu.pipeline_mode<synchronous>, transform_indices = @transform_2, window_bounds = array<i64: 1, 128>}, {transform_indices = @transform_3, window_bounds = array<i64: 2, 128>}]} {
    %c0 = arith.constant 0 : index
    %c0_0 = arith.constant 0 : index
    %c0_1 = arith.constant 0 : index
    %0 = vector.load %arg1[%c0, %c0_0, %c0_1] : memref<2x25x128xbf16, #tpu.memory_space<vmem>>, vector<2x25x128xbf16>
    %1 = arith.extf %0 : vector<2x25x128xbf16> to vector<2x25x128xf32>
    %cst = arith.constant dense<0.000000e+00> : vector<2x128xf32>
    %2 = vector.multi_reduction <add>, %1, %cst [1] : vector<2x25x128xf32> to vector<2x128xf32>
    %cst_2 = arith.constant 2.500000e+01 : f32
    %3 = vector.broadcast %cst_2 : f32 to vector<2x128xf32>
    %4 = arith.divf %2, %3 : vector<2x128xf32>
    %5 = arith.truncf %4 : vector<2x128xf32> to vector<2x128xbf16>
    %c0_3 = arith.constant 0 : index
    %c0_4 = arith.constant 0 : index
    %6 = vector.load %arg2[%c0_3, %c0_4] : memref<128x128xbf16, #tpu.memory_space<vmem>>, vector<128x128xbf16>
    %cst_5 = arith.constant dense<0.000000e+00> : vector<2x128xf32>
    %7 = tpu.matmul %5, %6, %cst_5 {dimension_numbers = #tpu.dot_dimension_numbers<[1], [0], [0], [1], [0, 0, 1, 1], [], []>} : vector<2x128xbf16>, vector<128x128xbf16>, vector<2x128xf32> -> vector<2x128xf32>
    %c0_6 = arith.constant 0 : index
    %c0_7 = arith.constant 0 : index
    %8 = vector.load %arg3[%c0_6, %c0_7] : memref<1x128xf32, #tpu.memory_space<vmem>>, vector<1x128xf32>
    %9 = vector.broadcast %8 : vector<1x128xf32> to vector<2x128xf32>
    %10 = arith.addf %7, %9 : vector<2x128xf32>
    %c0_8 = arith.constant 0 : index
    %c0_9 = arith.constant 0 : index
    %11 = vector.load %arg4[%c0_8, %c0_9] : memref<2x128xf32, #tpu.memory_space<vmem>>, vector<2x128xf32>
    tpu.vector_store %arg4[%c0_8, %c0_9], %10 {strides = array<i32>} : memref<2x128xf32, #tpu.memory_space<vmem>>, vector<2x128xf32>,
    return
  }
  func.func @transform_0(%arg0: i32) -> (i32, i32, i32) {
    %c0_i32 = arith.constant 0 : i32
    %c0_i32_0 = arith.constant 0 : i32
    %c0_i32_1 = arith.constant 0 : i32
    return %arg0, %c0_i32, %c0_i32_0 : i32, i32, i32
  }
  func.func @transform_1(%arg0: i32) -> (i32, i32) {
    %c0_i32 = arith.constant 0 : i32
    %c0_i32_0 = arith.constant 0 : i32
    %c0_i32_1 = arith.constant 0 : i32
    return %c0_i32, %c0_i32_0 : i32, i32
  }
  func.func @transform_2(%arg0: i32) -> (i32, i32) {
    %c0_i32 = arith.constant 0 : i32
    %c0_i32_0 = arith.constant 0 : i32
    %c0_i32_1 = arith.constant 0 : i32
    return %c0_i32, %c0_i32_0 : i32, i32
  }
  func.func @transform_3(%arg0: i32) -> (i32, i32) {
    %c0_i32 = arith.constant 0 : i32
    %c0_i32_0 = arith.constant 0 : i32
    return %arg0, %c0_i32 : i32, i32
  }
}

</mosaic_0001>

<bundles_post_ra>
// kernel: resnet_forward.10
= control target key start
LH: loop header
LB: loop body
LE: loop exit
PB: predicated region body
PF: predicated region fallthrough
CT: control target
= control target key end

     0   :  { %s1856_s12 = smov 0   ;;  %s1858_s13 = smov 0   ;;  %s2205_s0 = inlined_call_operand.vmem [shape: bf16[648,8], index: 0, kind: input, shape index: {}]   ;;  %s2206_s1 = inlined_call_operand.vmem [shape: bf16[8,128], index: 1, kind: input, shape index: {}]   ;;  %s2207_s2 = inlined_call_operand.vmem [shape: f32[1,128], index: 2, kind: input, shape index: {}]   ;;  %s2208_s3 = inlined_call_operand.vmem [shape: bf16[648,128], index: 3, kind: output, shape index: {}]  }
   0x1   :  { %s1860_s14 = smov 0  }
   0x2 LB: > { %s1869_s15 = sadd.s32 4294967295, %s1800_s14   ;;  %s1871_s16 = sadd.s32 1, %s1800_s14   ;;  %s1800_s14 = sphi %s1860_s14, %s2215_s14   ;;  %s1796_s13 = sphi %s1858_s13, %s2214_s13   ;;  %s1792_s12 = sphi %s1856_s12, %s2213_s12  }
   0x3   : > { %s85_s17 = ssub.s32 %s1800_s14, %s1871_s16  ;;  %s88_s18 = sadd.s32 1, %s1796_s13 }
   0x4   : > { %p86_p0 = scmp.eq.s32.totalorder %s85_s17, 0  ;;  %p98_p1 = scmp.ne.s32.totalorder %s1796_s13, %s1792_s12 }
   0x5   : > { %p99_p2 = scmp.eq.s32.totalorder %s1869_s15, 1  ;;  %p1252_p3 = scmp.ge.s32.totalorder %s1800_s14, 1 }
   0x6   : > { %s1879_s19 = scalar_select %p86_p0, %s1796_s13, %s88_s18  }
   0x7   : > { %p1881_p4 = por %p99_p2, %p98_p1  ;;  %p146_p5 = scmp.lt.s32.totalorder %s1800_s14, 3 }
   0x9   : > { %p147_p6 = pnand %p1252_p3, %p146_p5 }
   0xa   : > { %v235_v0 = vld [vmem:[%s2206_s1] sm:$0xf] (!%p147_p6)  ;;  %vm412_vm0 = vcmask (!%p147_p6), 1043456   ;;  %s1889_s23 = smul.u32 (!%p147_p6), 42, %s1869_s15  ;;  %v1834_v1 = vmov (!%p147_p6), 0.0   ;;  %vm1835_vm1 = vmmov (!%p147_p6), 0  }
   0xb   : > { %150 = sbr.rel (%p147_p6) target bundleno = 413 (0x19d), region = 32  ;;  %1541 = vmatprep.subr.bf16.mxu0 (!%p147_p6), %v1834_v1  ;;  %v414_v2 = vsel (!%p147_p6), %vm412_vm0, %v235_v0, 0  ;;  %1543 = vmatprep.mubr.msk.bf16.mxu0 (!%p147_p6), %vm1835_vm1, %v1834_v1  ;;  %vm348_vm2 = vcmask (!%p147_p6), 64512   ;;  %v1987_v24 = vld [vmem:[%s2207_s2] ss:$0 sm:$0xff] (!%p147_p6)  ;;  %s170_s4 = sand.u32 (!%p147_p6), 1, %s1792_s12  }
   0xc   : > { %1542 = vmatpush3.bf16.msra.mxu0 (!%p147_p6), %v414_v2  ;;  %p178_p7 = scmp.lt.s32.totalorder (!%p147_p6), %s1889_s23, 80  ;;  %1627 = vmatprep.subr.bf16.mxu1 (!%p147_p6), %v1834_v1  ;;  %s1629_s5 = smul.u32 (!%p147_p6), 168, %s170_s4 }
   0xd   : > { %1628 = vmatpush3.bf16.msra.mxu1 (!%p147_p6), %v414_v2  ;;  %1587 = vmatprep.mubr.msk.bf16.mxu1 (!%p147_p6), %vm1835_vm1, %v1834_v1 }
   0xe   : > { %s1994_s6 = scalar_lea.vmem (!%p147_p6), [#allocation2], %s1629_s5  }
  0x12   : > { %s179_s24 = scalar_select %p178_p7, %s1889_s23, 80 }
  0x13   : > { %s877_s7 = ssub.s32 (%p1881_p4), 81, %s1889_s23  ;;  %s1393_s8 = smul.u32 (%p1881_p4), 168, %s1869_s15 }
  0x14   : > { %s1253_s25 = sshll.u32 %s179_s24, 2  ;;  %p878_p8 = scmp.lt.s32.totalorder (%p1881_p4), %s877_s7, 42 }
  0x15   : > { %s1902_s28 = scalar_lea.vmem %s2205_s0, %s1253_s25  ;;  %s2062_s11 = scalar_lea.vmem (%p1881_p4), %s2208_s3, %s1393_s8  }
  0x16   : > { %v1721_v3 = vld [vmem:[%s1902_s28] sm:$0xff]   ;;  %v1722_v4 = vld [vmem:[%s1902_s28 + $0x58] sm:$0xff]   ;;  %v1723_v5 = vld [vmem:[%s1902_s28 + $0x8] sm:$0xff]  }
  0x17   : > { %1544 = vmatmul.mubr.msk.bf16.vlgmr.msra.gmra.mrb[0].mxu0 %vm348_vm2, %v1721_v3  ;;  %1588 = vmatmul.mubr.msk.bf16.vlgmr.msra.gmra.mrb[0].mxu1 %vm348_vm2, %v1722_v4  ;;  %v1724_v6 = vld [vmem:[%s1902_s28 + $0x60] sm:$0xff]   ;;  %v1725_v7 = vld [vmem:[%s1902_s28 + $0x10] sm:$0xff]   ;;  %v1726_v8 = vld [vmem:[%s1902_s28 + $0x68] sm:$0xff]  }
  0x18   : > { %1547 = vmatprep.mubr.msk.bf16.mxu0 %vm1835_vm1, %v1834_v1  ;;  %1591 = vmatprep.mubr.msk.bf16.mxu1 %vm1835_vm1, %v1834_v1  ;;  %v1727_v9 = vld [vmem:[%s1902_s28 + $0x18] sm:$0xff]   ;;  %v1728_v10 = vld [vmem:[%s1902_s28 + $0x70] sm:$0xff]   ;;  %v1729_v11 = vld [vmem:[%s1902_s28 + $0x20] sm:$0xff]  }
  0x19   : > { %v1730_v12 = vld [vmem:[%s1902_s28 + $0x78] sm:$0xff]   ;;  %v1731_v13 = vld [vmem:[%s1902_s28 + $0x28] sm:$0xff]   ;;  %v1732_v14 = vld [vmem:[%s1902_s28 + $0x80] sm:$0xff]  }
  0x1a   : > { %v1733_v15 = vld [vmem:[%s1902_s28 + $0x30] sm:$0xff]   ;;  %v1734_v16 = vld [vmem:[%s1902_s28 + $0x88] sm:$0xff]   ;;  %v1735_v17 = vld [vmem:[%s1902_s28 + $0x38] sm:$0xff]  }
  0x1b   : > { %v1736_v18 = vld [vmem:[%s1902_s28 + $0x90] sm:$0xff]   ;;  %v1737_v19 = vld [vmem:[%s1902_s28 + $0x40] sm:$0xff]   ;;  %v1738_v20 = vld [vmem:[%s1902_s28 + $0x98] sm:$0xff]  }
  0x1c   : > { %v1739_v21 = vld [vmem:[%s1902_s28 + $0x48] sm:$0xff]   ;;  %v1740_v22 = vld [vmem:[%s1902_s28 + $0xa0] sm:$0xff]   ;;  %v1741_v23 = vld [vmem:[%s1902_s28 + $0x50] sm:$0xff]  }
  0x1f   : > { %1548 = vmatmul.mubr.msk.bf16.gmra.mrb[4].mxu0 %vm348_vm2, %v1723_v5  ;;  %1592 = vmatmul.mubr.msk.bf16.gmra.mrb[4].mxu1 %vm348_vm2, %v1724_v6 }
  0x20   : > { %1551 = vmatprep.mubr.msk.bf16.mxu0 %vm1835_vm1, %v1834_v1  ;;  %1595 = vmatprep.mubr.msk.bf16.mxu1 %vm1835_vm1, %v1834_v1 }
  0x27   : > { %1552 = vmatmul.mubr.msk.bf16.gmra.mrb[8].mxu0 %vm348_vm2, %v1725_v7  ;;  %1596 = vmatmul.mubr.msk.bf16.gmra.mrb[8].mxu1 %vm348_vm2, %v1726_v8 }
  0x28   : > { %1555 = vmatprep.mubr.msk.bf16.mxu0 %vm1835_vm1, %v1834_v1  ;;  %1599 = vmatprep.mubr.msk.bf16.mxu1 %vm1835_vm1, %v1834_v1 }
  0x2f   : > { %1556 = vmatmul.mubr.msk.bf16.gmra.mrb[12].mxu0 %vm348_vm2, %v1727_v9  ;;  %1600 = vmatmul.mubr.msk.bf16.gmra.mrb[12].mxu1 %vm348_vm2, %v1728_v10 }
  0x30   : > { %1559 = vmatprep.mubr.msk.bf16.mxu0 %vm1835_vm1, %v1834_v1  ;;  %1603 = vmatprep.mubr.msk.bf16.mxu1 %vm1835_vm1, %v1834_v1 }
  0x37   : > { %1560 = vmatmul.mubr.msk.bf16.gmra.mrb[16].mxu0 %vm348_vm2, %v1729_v11  ;;  %1604 = vmatmul.mubr.msk.bf16.gmra.mrb[16].mxu1 %vm348_vm2, %v1730_v12 }
  0x38   : > { %1563 = vmatprep.mubr.msk.bf16.mxu0 %vm1835_vm1, %v1834_v1  ;;  %1607 = vmatprep.mubr.msk.bf16.mxu1 %vm1835_vm1, %v1834_v1 }
  0x3f   : > { %1564 = vmatmul.mubr.msk.bf16.gmra.mrb[20].mxu0 %vm348_vm2, %v1731_v13  ;;  %1608 = vmatmul.mubr.msk.bf16.gmra.mrb[20].mxu1 %vm348_vm2, %v1732_v14 }
  0x40   : > { %1567 = vmatprep.mubr.msk.bf16.mxu0 %vm1835_vm1, %v1834_v1  ;;  %1611 = vmatprep.mubr.msk.bf16.mxu1 %vm1835_vm1, %v1834_v1 }
  0x47   : > { %1568 = vmatmul.mubr.msk.bf16.gmra.mrb[24].mxu0 %vm348_vm2, %v1733_v15  ;;  %1612 = vmatmul.mubr.msk.bf16.gmra.mrb[24].mxu1 %vm348_vm2, %v1734_v16 }
  0x48   : > { %1571 = vmatprep.mubr.msk.bf16.mxu0 %vm1835_vm1, %v1834_v1  ;;  %1615 = vmatprep.mubr.msk.bf16.mxu1 %vm1835_vm1, %v1834_v1 }
  0x4f   : > { %1572 = vmatmul.mubr.msk.bf16.gmra.mrb[28].mxu0 %vm348_vm2, %v1735_v17  ;;  %1616 = vmatmul.mubr.msk.bf16.gmra.mrb[28].mxu1 %vm348_vm2, %v1736_v18 }
  0x50   : > { %1575 = vmatprep.mubr.msk.bf16.mxu0 %vm1835_vm1, %v1834_v1  ;;  %1619 = vmatprep.mubr.msk.bf16.mxu1 %vm1835_vm1, %v1834_v1 }
  0x57   : > { %1576 = vmatmul.mubr.msk.bf16.gmra.mrb[32].mxu0 %vm348_vm2, %v1737_v19  ;;  %1620 = vmatmul.mubr.msk.bf16.gmra.mrb[32].mxu1 %vm348_vm2, %v1738_v20 }
  0x58   : > { %1579 = vmatprep.mubr.msk.bf16.mxu0 %vm1835_vm1, %v1834_v1  ;;  %1623 = vmatprep.mubr.msk.bf16.mxu1 %vm1835_vm1, %v1834_v1 }
  0x5f   : > { %1580 = vmatmul.mubr.msk.bf16.gmra.mrb[36].mxu0 %vm348_vm2, %v1739_v21  ;;  %1624 = vmatmul.mubr.msk.bf16.gmra.mrb[36].mxu1 %vm348_vm2, %v1740_v22 }
  0x60   : > { %1583 = vmatprep.mubr.msk.bf16.mxu0 %vm1835_vm1, %v1834_v1 }
  0x67   : > { %1584 = vmatmul.mubr.msk.bf16.gmra.mrb[40].mxu0 %vm348_vm2, %v1741_v23 }
  0xea   : > { %v450_v25 = vpop.f32.mrb[0].mxu0  ;;  %v538_v28 = vpop.f32.mrb[0].mxu1 }
  0xeb   : > { %v451_v26 = vadd.f32 %v1987_v24, %v450_v25  ;;  %v1545_v27 = vpop.f32.mrb[1].mxu0  ;;  %v539_v30 = vadd.f32 %v1987_v24, %v538_v28  ;;  %v1589_v31 = vpop.f32.mrb[1].mxu1 }
  0xec   : > { %v453_v29 = vpop.f32.mrb[2].mxu0  ;;  %v541_v34 = vpop.f32.mrb[2].mxu1 }
  0xed   : > { %v454_v32 = vadd.f32 %v1987_v24, %v453_v29  ;;  %v1546_v33 = vpop.f32.mrb[3].mxu0  ;;  %v639_v35 = vmax.f32 %v539_v30, 0.0  ;;  %v542_v36 = vadd.f32 %v1987_v24, %v541_v34  ;;  %v1590_v37 = vpop.f32.mrb[3].mxu1  ;;  %v617_v38 = vmax.f32 %v451_v26, 0.0 }
  0xef   : > { %v618_v39 = vmax.f32 %v454_v32, 0.0  ;;  %v640_v40 = vmax.f32 %v542_v36, 0.0 }
  0xf1   : > { %v1397_v41 = vpack.c.bf16 %v618_v39, %v617_v38  ;;  %v1452_v42 = vpack.c.bf16 %v640_v40, %v639_v35 }
  0xf2   : > { %v458_v43 = vpop.f32.mrb[4].mxu0  ;;  %v546_v46 = vpop.f32.mrb[4].mxu1 }
  0xf3   : > { %1398 = vst [vmem:[%s1994_s6] sm:$0xff] %v1397_v41   ;;  %v459_v44 = vadd.f32 %v1987_v24, %v458_v43  ;;  %v1549_v45 = vpop.f32.mrb[5].mxu0  ;;  %1509 = vst [vmem:[%s1994_s6 + $0x58] sm:$0xff] %v1452_v42   ;;  %v547_v48 = vadd.f32 %v1987_v24, %v546_v46  ;;  %v1593_v49 = vpop.f32.mrb[5].mxu1 }
  0xf4   : > { %v461_v47 = vpop.f32.mrb[6].mxu0  ;;  %v549_v52 = vpop.f32.mrb[6].mxu1 }
  0xf5   : > { %v462_v50 = vadd.f32 %v1987_v24, %v461_v47  ;;  %v1550_v51 = vpop.f32.mrb[7].mxu0  ;;  %v641_v53 = vmax.f32 %v547_v48, 0.0  ;;  %v550_v54 = vadd.f32 %v1987_v24, %v549_v52  ;;  %v1594_v55 = vpop.f32.mrb[7].mxu1  ;;  %v619_v56 = vmax.f32 %v459_v44, 0.0 }
  0xf7   : > { %v620_v57 = vmax.f32 %v462_v50, 0.0  ;;  %v642_v58 = vmax.f32 %v550_v54, 0.0 }
  0xf9   : > { %v1402_v59 = vpack.c.bf16 %v620_v57, %v619_v56  ;;  %v1457_v60 = vpack.c.bf16 %v642_v58, %v641_v53 }
  0xfa   : > { %v466_v61 = vpop.f32.mrb[8].mxu0  ;;  %v554_v0 = vpop.f32.mrb[8].mxu1 }
  0xfb   : > { %1499 = vst [vmem:[%s1994_s6 + $0x8] sm:$0xff] %v1402_v59   ;;  %v467_v62 = vadd.f32 %v1987_v24, %v466_v61  ;;  %v1553_v63 = vpop.f32.mrb[9].mxu0  ;;  %1510 = vst [vmem:[%s1994_s6 + $0x60] sm:$0xff] %v1457_v60   ;;  %v555_v2 = vadd.f32 %v1987_v24, %v554_v0  ;;  %v1597_v3 = vpop.f32.mrb[9].mxu1 }
  0xfc   : > { %v469_v1 = vpop.f32.mrb[10].mxu0  ;;  %v557_v6 = vpop.f32.mrb[10].mxu1 }
  0xfd   : > { %v470_v4 = vadd.f32 %v1987_v24, %v469_v1  ;;  %v1554_v5 = vpop.f32.mrb[11].mxu0  ;;  %v643_v7 = vmax.f32 %v555_v2, 0.0  ;;  %v558_v8 = vadd.f32 %v1987_v24, %v557_v6  ;;  %v1598_v9 = vpop.f32.mrb[11].mxu1  ;;  %v621_v10 = vmax.f32 %v467_v62, 0.0 }
  0xff   : > { %v622_v11 = vmax.f32 %v470_v4, 0.0  ;;  %v644_v12 = vmax.f32 %v558_v8, 0.0 }
 0x101   : > { %v1407_v13 = vpack.c.bf16 %v622_v11, %v621_v10  ;;  %v1462_v14 = vpack.c.bf16 %v644_v12, %v643_v7 }
 0x102   : > { %v474_v15 = vpop.f32.mrb[12].mxu0  ;;  %v562_v18 = vpop.f32.mrb[12].mxu1 }
 0x103   : > { %1500 = vst [vmem:[%s1994_s6 + $0x10] sm:$0xff] %v1407_v13   ;;  %v475_v16 = vadd.f32 %v1987_v24, %v474_v15  ;;  %v1557_v17 = vpop.f32.mrb[13].mxu0  ;;  %1511 = vst [vmem:[%s1994_s6 + $0x68] sm:$0xff] %v1462_v14   ;;  %v563_v20 = vadd.f32 %v1987_v24, %v562_v18  ;;  %v1601_v21 = vpop.f32.mrb[13].mxu1 }
 0x104   : > { %v477_v19 = vpop.f32.mrb[14].mxu0  ;;  %v565_v25 = vpop.f32.mrb[14].mxu1 }
 0x105   : > { %v478_v22 = vadd.f32 %v1987_v24, %v477_v19  ;;  %v1558_v23 = vpop.f32.mrb[15].mxu0  ;;  %v645_v26 = vmax.f32 %v563_v20, 0.0  ;;  %v566_v27 = vadd.f32 %v1987_v24, %v565_v25  ;;  %v1602_v28 = vpop.f32.mrb[15].mxu1  ;;  %v623_v29 = vmax.f32 %v475_v16, 0.0 }
 0x107   : > { %v624_v30 = vmax.f32 %v478_v22, 0.0  ;;  %v646_v31 = vmax.f32 %v566_v27, 0.0 }
 0x109   : > { %v1412_v32 = vpack.c.bf16 %v624_v30, %v623_v29  ;;  %v1467_v33 = vpack.c.bf16 %v646_v31, %v645_v26 }
 0x10a   : > { %v482_v34 = vpop.f32.mrb[16].mxu0  ;;  %v570_v37 = vpop.f32.mrb[16].mxu1 }
 0x10b   : > { %1501 = vst [vmem:[%s1994_s6 + $0x18] sm:$0xff] %v1412_v32   ;;  %v483_v35 = vadd.f32 %v1987_v24, %v482_v34  ;;  %v1561_v36 = vpop.f32.mrb[17].mxu0  ;;  %1512 = vst [vmem:[%s1994_s6 + $0x70] sm:$0xff] %v1467_v33   ;;  %v571_v39 = vadd.f32 %v1987_v24, %v570_v37  ;;  %v1605_v40 = vpop.f32.mrb[17].mxu1 }
 0x10c   : > { %v485_v38 = vpop.f32.mrb[18].mxu0  ;;  %v573_v43 = vpop.f32.mrb[18].mxu1 }
 0x10d   : > { %v486_v41 = vadd.f32 %v1987_v24, %v485_v38  ;;  %v1562_v42 = vpop.f32.mrb[19].mxu0  ;;  %v647_v44 = vmax.f32 %v571_v39, 0.0  ;;  %v574_v45 = vadd.f32 %v1987_v24, %v573_v43  ;;  %v1606_v46 = vpop.f32.mrb[19].mxu1  ;;  %v625_v47 = vmax.f32 %v483_v35, 0.0 }
 0x10f   : > { %v626_v48 = vmax.f32 %v486_v41, 0.0  ;;  %v648_v49 = vmax.f32 %v574_v45, 0.0 }
 0x111   : > { %v1417_v50 = vpack.c.bf16 %v626_v48, %v625_v47  ;;  %v1472_v51 = vpack.c.bf16 %v648_v49, %v647_v44 }
 0x112   : > { %v490_v52 = vpop.f32.mrb[20].mxu0  ;;  %v578_v55 = vpop.f32.mrb[20].mxu1 }
 0x113   : > { %1502 = vst [vmem:[%s1994_s6 + $0x20] sm:$0xff] %v1417_v50   ;;  %v491_v53 = vadd.f32 %v1987_v24, %v490_v52  ;;  %v1565_v54 = vpop.f32.mrb[21].mxu0  ;;  %1513 = vst [vmem:[%s1994_s6 + $0x78] sm:$0xff] %v1472_v51   ;;  %v579_v57 = vadd.f32 %v1987_v24, %v578_v55  ;;  %v1609_v58 = vpop.f32.mrb[21].mxu1 }
 0x114   : > { %v493_v56 = vpop.f32.mrb[22].mxu0  ;;  %v581_v61 = vpop.f32.mrb[22].mxu1 }
 0x115   : > { %v494_v59 = vadd.f32 %v1987_v24, %v493_v56  ;;  %v1566_v60 = vpop.f32.mrb[23].mxu0  ;;  %v649_v62 = vmax.f32 %v579_v57, 0.0  ;;  %v582_v63 = vadd.f32 %v1987_v24, %v581_v61  ;;  %v1610_v0 = vpop.f32.mrb[23].mxu1  ;;  %v627_v1 = vmax.f32 %v491_v53, 0.0 }
 0x117   : > { %v628_v2 = vmax.f32 %v494_v59, 0.0  ;;  %v650_v3 = vmax.f32 %v582_v63, 0.0 }
 0x119   : > { %v1422_v4 = vpack.c.bf16 %v628_v2, %v627_v1  ;;  %v1477_v5 = vpack.c.bf16 %v650_v3, %v649_v62 }
 0x11a   : > { %v498_v6 = vpop.f32.mrb[24].mxu0  ;;  %v586_v9 = vpop.f32.mrb[24].mxu1 }
 0x11b   : > { %1503 = vst [vmem:[%s1994_s6 + $0x28] sm:$0xff] %v1422_v4   ;;  %v499_v7 = vadd.f32 %v1987_v24, %v498_v6  ;;  %v1569_v8 = vpop.f32.mrb[25].mxu0  ;;  %1514 = vst [vmem:[%s1994_s6 + $0x80] sm:$0xff] %v1477_v5   ;;  %v587_v11 = vadd.f32 %v1987_v24, %v586_v9  ;;  %v1613_v12 = vpop.f32.mrb[25].mxu1 }
 0x11c   : > { %v501_v10 = vpop.f32.mrb[26].mxu0  ;;  %v589_v15 = vpop.f32.mrb[26].mxu1 }
 0x11d   : > { %v502_v13 = vadd.f32 %v1987_v24, %v501_v10  ;;  %v1570_v14 = vpop.f32.mrb[27].mxu0  ;;  %v651_v16 = vmax.f32 %v587_v11, 0.0  ;;  %v590_v17 = vadd.f32 %v1987_v24, %v589_v15  ;;  %v1614_v18 = vpop.f32.mrb[27].mxu1  ;;  %v629_v19 = vmax.f32 %v499_v7, 0.0 }
 0x11f   : > { %v630_v20 = vmax.f32 %v502_v13, 0.0  ;;  %v652_v21 = vmax.f32 %v590_v17, 0.0 }
 0x121   : > { %v1427_v22 = vpack.c.bf16 %v630_v20, %v629_v19  ;;  %v1482_v23 = vpack.c.bf16 %v652_v21, %v651_v16 }
 0x122   : > { %v506_v25 = vpop.f32.mrb[28].mxu0  ;;  %v594_v28 = vpop.f32.mrb[28].mxu1 }
 0x123   : > { %1504 = vst [vmem:[%s1994_s6 + $0x30] sm:$0xff] %v1427_v22   ;;  %v507_v26 = vadd.f32 %v1987_v24, %v506_v25  ;;  %v1573_v27 = vpop.f32.mrb[29].mxu0  ;;  %1515 = vst [vmem:[%s1994_s6 + $0x88] sm:$0xff] %v1482_v23   ;;  %v595_v30 = vadd.f32 %v1987_v24, %v594_v28  ;;  %v1617_v31 = vpop.f32.mrb[29].mxu1 }
 0x124   : > { %v509_v29 = vpop.f32.mrb[30].mxu0  ;;  %v597_v34 = vpop.f32.mrb[30].mxu1 }
 0x125   : > { %v510_v32 = vadd.f32 %v1987_v24, %v509_v29  ;;  %v1574_v33 = vpop.f32.mrb[31].mxu0  ;;  %v653_v35 = vmax.f32 %v595_v30, 0.0  ;;  %v598_v36 = vadd.f32 %v1987_v24, %v597_v34  ;;  %v1618_v37 = vpop.f32.mrb[31].mxu1  ;;  %v631_v38 = vmax.f32 %v507_v26, 0.0 }
 0x127   : > { %v632_v39 = vmax.f32 %v510_v32, 0.0  ;;  %v654_v40 = vmax.f32 %v598_v36, 0.0 }
 0x129   : > { %v1432_v41 = vpack.c.bf16 %v632_v39, %v631_v38  ;;  %v1487_v42 = vpack.c.bf16 %v654_v40, %v653_v35 }
 0x12a   : > { %v514_v43 = vpop.f32.mrb[32].mxu0  ;;  %v602_v46 = vpop.f32.mrb[32].mxu1 }
 0x12b   : > { %1505 = vst [vmem:[%s1994_s6 + $0x38] sm:$0xff] %v1432_v41   ;;  %v515_v44 = vadd.f32 %v1987_v24, %v514_v43  ;;  %v1577_v45 = vpop.f32.mrb[33].mxu0  ;;  %1516 = vst [vmem:[%s1994_s6 + $0x90] sm:$0xff] %v1487_v42   ;;  %v603_v48 = vadd.f32 %v1987_v24, %v602_v46  ;;  %v1621_v49 = vpop.f32.mrb[33].mxu1 }
 0x12c   : > { %v517_v47 = vpop.f32.mrb[34].mxu0  ;;  %v605_v52 = vpop.f32.mrb[34].mxu1 }
 0x12d   : > { %v518_v50 = vadd.f32 %v1987_v24, %v517_v47  ;;  %v1578_v51 = vpop.f32.mrb[35].mxu0  ;;  %v655_v53 = vmax.f32 %v603_v48, 0.0  ;;  %v606_v54 = vadd.f32 %v1987_v24, %v605_v52  ;;  %v1622_v55 = vpop.f32.mrb[35].mxu1  ;;  %v633_v56 = vmax.f32 %v515_v44, 0.0 }
 0x12f   : > { %v634_v57 = vmax.f32 %v518_v50, 0.0  ;;  %v656_v58 = vmax.f32 %v606_v54, 0.0 }
 0x131   : > { %v1437_v59 = vpack.c.bf16 %v634_v57, %v633_v56  ;;  %v1492_v60 = vpack.c.bf16 %v656_v58, %v655_v53 }
 0x132   : > { %v522_v61 = vpop.f32.mrb[36].mxu0  ;;  %v610_v0 = vpop.f32.mrb[36].mxu1 }
 0x133   : > { %1506 = vst [vmem:[%s1994_s6 + $0x40] sm:$0xff] %v1437_v59   ;;  %v523_v62 = vadd.f32 %v1987_v24, %v522_v61  ;;  %v1581_v63 = vpop.f32.mrb[37].mxu0  ;;  %1517 = vst [vmem:[%s1994_s6 + $0x98] sm:$0xff] %v1492_v60   ;;  %v611_v2 = vadd.f32 %v1987_v24, %v610_v0  ;;  %v1625_v3 = vpop.f32.mrb[37].mxu1 }
 0x134   : > { %v525_v1 = vpop.f32.mrb[38].mxu0  ;;  %v613_v6 = vpop.f32.mrb[38].mxu1 }
 0x135   : > { %v526_v4 = vadd.f32 %v1987_v24, %v525_v1  ;;  %v1582_v5 = vpop.f32.mrb[39].mxu0  ;;  %v657_v7 = vmax.f32 %v611_v2, 0.0  ;;  %v614_v8 = vadd.f32 %v1987_v24, %v613_v6  ;;  %v1626_v9 = vpop.f32.mrb[39].mxu1  ;;  %v635_v10 = vmax.f32 %v523_v62, 0.0 }
 0x137   : > { %v636_v11 = vmax.f32 %v526_v4, 0.0  ;;  %v658_v12 = vmax.f32 %v614_v8, 0.0 }
 0x139   : > { %v1442_v13 = vpack.c.bf16 %v636_v11, %v635_v10  ;;  %v1497_v14 = vpack.c.bf16 %v658_v12, %v657_v7 }
 0x13a   : > { %v530_v15 = vpop.f32.mrb[40].mxu0 }
 0x13b   : > { %1507 = vst [vmem:[%s1994_s6 + $0x48] sm:$0xff] %v1442_v13   ;;  %v531_v16 = vadd.f32 %v1987_v24, %v530_v15  ;;  %v1585_v17 = vpop.f32.mrb[41].mxu0  ;;  %1518 = vst [vmem:[%s1994_s6 + $0xa0] sm:$0xff] %v1497_v14  }
 0x13c   : > { %v533_v18 = vpop.f32.mrb[42].mxu0 }
 0x13d   : > { %v534_v19 = vadd.f32 %v1987_v24, %v533_v18  ;;  %v1586_v20 = vpop.f32.mrb[43].mxu0  ;;  %v637_v21 = vmax.f32 %v531_v16, 0.0  ;;  %875 = sbr.rel (!%p1881_p4) target bundleno = 413 (0x19d), region = 36 }
 0x13f   : > { %v638_v22 = vmax.f32 %v534_v19, 0.0 }
 0x141   : > { %v1447_v23 = vpack.c.bf16 %v638_v22, %v637_v21 }
 0x143   : > { %1508 = vst [vmem:[%s1994_s6 + $0x50] sm:$0xff] %v1447_v23  }
 0x144   : > { %s2217_s7 = smov (!%p878_p8, %s877_s7), 42 }
 0x145   : > { %s1339_s12 = sshll.u32 %s2217_s7, 6 }
 0x146   : > { %p1342_p9 = scmp.eq.s32.totalorder %s1339_s12, 0 }
 0x147   : > { %1742 = sdivrem.u32 (!%p1342_p9), %s2217_s7, 42 }
 0x148   : > { %886 = sbr.rel (%p1342_p9) target bundleno = 413 (0x19d), region = 40 }
 0x150   : > { %s2068_s14 = spop.drf %1742 }
 0x151   : > { %p1343_p10 = scmp.le.s32.totalorder %s2068_s14, 0 }
 0x152   : > { %s2210_s15 = smov (!%p1343_p10), %s2062_s11  ;;  %s2211_s17 = smov (!%p1343_p10), %s1994_s6 }
 0x153   : > { %1205 = sbr.rel (%p1343_p10) target bundleno = 384 (0x180), region = 112  ;;  %s2077_s18 = smov (!%p1343_p10), 0  }
 0x154   : > { %s2079_s20 = smov (!%p1343_p10), 0  }
 0x15a LB: >> { %v903_v24 = vld [vmem:[%s1808_s17] sm:$0xf]  ;;  %v905_v25 = vld [vmem:[%s1808_s17 + $0x4] sm:$0xf]  ;;  %v907_v26 = vld [vmem:[%s1808_s17 + $0x8] sm:$0xf]  ;;  %s1816_s20 = sphi %s2079_s20, %s897_s20   ;;  %s1812_s18 = sphi %s2077_s18, %s2212_s18   ;;  %s1808_s17 = sphi %s2211_s17, %s992_s17   ;;  %s1804_s15 = sphi %s2210_s15, %s993_s15  }
 0x15b   : >> { %904 = vst [vmem:[%s1804_s15] sm:$0xf] %v903_v24  ;;  %906 = vst [vmem:[%s1804_s15 + $0x4] sm:$0xf] %v905_v25  ;;  %v909_v27 = vld [vmem:[%s1808_s17 + $0xc] sm:$0xf]  ;;  %s987_s21 = sadd.s32 1, %s1812_s18 }
 0x15c   : >> { %908 = vst [vmem:[%s1804_s15 + $0x8] sm:$0xf] %v907_v26  ;;  %v911_v28 = vld [vmem:[%s1808_s17 + $0x10] sm:$0xf]  ;;  %v913_v29 = vld [vmem:[%s1808_s17 + $0x14] sm:$0xf]  ;;  %p988_p11 = scmp.ge.s32.totalorder %s987_s21, %s2068_s14 }
 0x15d   : >> { %910 = vst [vmem:[%s1804_s15 + $0xc] sm:$0xf] %v909_v27  ;;  %912 = vst [vmem:[%s1804_s15 + $0x10] sm:$0xf] %v911_v28  ;;  %v915_v30 = vld [vmem:[%s1808_s17 + $0x18] sm:$0xf] }
 0x15e   : >> { %914 = vst [vmem:[%s1804_s15 + $0x14] sm:$0xf] %v913_v29  ;;  %v917_v31 = vld [vmem:[%s1808_s17 + $0x1c] sm:$0xf]  ;;  %v919_v32 = vld [vmem:[%s1808_s17 + $0x20] sm:$0xf] }
 0x15f   : >> { %916 = vst [vmem:[%s1804_s15 + $0x18] sm:$0xf] %v915_v30  ;;  %918 = vst [vmem:[%s1804_s15 + $0x1c] sm:$0xf] %v917_v31  ;;  %v921_v33 = vld [vmem:[%s1808_s17 + $0x24] sm:$0xf] }
 0x160   : >> { %920 = vst [vmem:[%s1804_s15 + $0x20] sm:$0xf] %v919_v32  ;;  %v923_v34 = vld [vmem:[%s1808_s17 + $0x28] sm:$0xf]  ;;  %v925_v35 = vld [vmem:[%s1808_s17 + $0x2c] sm:$0xf] }
 0x161   : >> { %922 = vst [vmem:[%s1804_s15 + $0x24] sm:$0xf] %v921_v33  ;;  %924 = vst [vmem:[%s1804_s15 + $0x28] sm:$0xf] %v923_v34  ;;  %v927_v36 = vld [vmem:[%s1808_s17 + $0x30] sm:$0xf] }
 0x162   : >> { %926 = vst [vmem:[%s1804_s15 + $0x2c] sm:$0xf] %v925_v35  ;;  %v929_v37 = vld [vmem:[%s1808_s17 + $0x34] sm:$0xf]  ;;  %v931_v38 = vld [vmem:[%s1808_s17 + $0x38] sm:$0xf] }
 0x163   : >> { %928 = vst [vmem:[%s1804_s15 + $0x30] sm:$0xf] %v927_v36  ;;  %930 = vst [vmem:[%s1804_s15 + $0x34] sm:$0xf] %v929_v37  ;;  %v933_v39 = vld [vmem:[%s1808_s17 + $0x3c] sm:$0xf] }
 0x164   : >> { %932 = vst [vmem:[%s1804_s15 + $0x38] sm:$0xf] %v931_v38  ;;  %v935_v40 = vld [vmem:[%s1808_s17 + $0x40] sm:$0xf]  ;;  %v937_v41 = vld [vmem:[%s1808_s17 + $0x44] sm:$0xf] }
 0x165   : >> { %934 = vst [vmem:[%s1804_s15 + $0x3c] sm:$0xf] %v933_v39  ;;  %936 = vst [vmem:[%s1804_s15 + $0x40] sm:$0xf] %v935_v40  ;;  %v939_v42 = vld [vmem:[%s1808_s17 + $0x48] sm:$0xf] }
 0x166   : >> { %938 = vst [vmem:[%s1804_s15 + $0x44] sm:$0xf] %v937_v41  ;;  %v941_v43 = vld [vmem:[%s1808_s17 + $0x4c] sm:$0xf]  ;;  %v943_v44 = vld [vmem:[%s1808_s17 + $0x50] sm:$0xf] }
 0x167   : >> { %940 = vst [vmem:[%s1804_s15 + $0x48] sm:$0xf] %v939_v42  ;;  %942 = vst [vmem:[%s1804_s15 + $0x4c] sm:$0xf] %v941_v43  ;;  %v945_v45 = vld [vmem:[%s1808_s17 + $0x54] sm:$0xf] }
 0x168   : >> { %944 = vst [vmem:[%s1804_s15 + $0x50] sm:$0xf] %v943_v44  ;;  %v947_v46 = vld [vmem:[%s1808_s17 + $0x58] sm:$0xf]  ;;  %v949_v47 = vld [vmem:[%s1808_s17 + $0x5c] sm:$0xf] }
 0x169   : >> { %946 = vst [vmem:[%s1804_s15 + $0x54] sm:$0xf] %v945_v45  ;;  %948 = vst [vmem:[%s1804_s15 + $0x58] sm:$0xf] %v947_v46  ;;  %v951_v48 = vld [vmem:[%s1808_s17 + $0x60] sm:$0xf] }
 0x16a   : >> { %950 = vst [vmem:[%s1804_s15 + $0x5c] sm:$0xf] %v949_v47  ;;  %v953_v49 = vld [vmem:[%s1808_s17 + $0x64] sm:$0xf]  ;;  %v955_v50 = vld [vmem:[%s1808_s17 + $0x68] sm:$0xf] }
 0x16b   : >> { %952 = vst [vmem:[%s1804_s15 + $0x60] sm:$0xf] %v951_v48  ;;  %954 = vst [vmem:[%s1804_s15 + $0x64] sm:$0xf] %v953_v49  ;;  %v957_v51 = vld [vmem:[%s1808_s17 + $0x6c] sm:$0xf] }
 0x16c   : >> { %956 = vst [vmem:[%s1804_s15 + $0x68] sm:$0xf] %v955_v50  ;;  %v959_v52 = vld [vmem:[%s1808_s17 + $0x70] sm:$0xf]  ;;  %v961_v53 = vld [vmem:[%s1808_s17 + $0x74] sm:$0xf] }
 0x16d   : >> { %958 = vst [vmem:[%s1804_s15 + $0x6c] sm:$0xf] %v957_v51  ;;  %960 = vst [vmem:[%s1804_s15 + $0x70] sm:$0xf] %v959_v52  ;;  %v963_v54 = vld [vmem:[%s1808_s17 + $0x78] sm:$0xf] }
 0x16e   : >> { %962 = vst [vmem:[%s1804_s15 + $0x74] sm:$0xf] %v961_v53  ;;  %v965_v55 = vld [vmem:[%s1808_s17 + $0x7c] sm:$0xf]  ;;  %v967_v56 = vld [vmem:[%s1808_s17 + $0x80] sm:$0xf] }
 0x16f   : >> { %964 = vst [vmem:[%s1804_s15 + $0x78] sm:$0xf] %v963_v54  ;;  %966 = vst [vmem:[%s1804_s15 + $0x7c] sm:$0xf] %v965_v55  ;;  %v969_v57 = vld [vmem:[%s1808_s17 + $0x84] sm:$0xf] }
 0x170   : >> { %968 = vst [vmem:[%s1804_s15 + $0x80] sm:$0xf] %v967_v56  ;;  %v971_v58 = vld [vmem:[%s1808_s17 + $0x88] sm:$0xf]  ;;  %v973_v59 = vld [vmem:[%s1808_s17 + $0x8c] sm:$0xf] }
 0x171   : >> { %970 = vst [vmem:[%s1804_s15 + $0x84] sm:$0xf] %v969_v57  ;;  %972 = vst [vmem:[%s1804_s15 + $0x88] sm:$0xf] %v971_v58  ;;  %v975_v60 = vld [vmem:[%s1808_s17 + $0x90] sm:$0xf] }
 0x172   : >> { %974 = vst [vmem:[%s1804_s15 + $0x8c] sm:$0xf] %v973_v59  ;;  %v977_v61 = vld [vmem:[%s1808_s17 + $0x94] sm:$0xf]  ;;  %v979_v62 = vld [vmem:[%s1808_s17 + $0x98] sm:$0xf] }
 0x173   : >> { %976 = vst [vmem:[%s1804_s15 + $0x90] sm:$0xf] %v975_v60  ;;  %978 = vst [vmem:[%s1804_s15 + $0x94] sm:$0xf] %v977_v61  ;;  %v981_v63 = vld [vmem:[%s1808_s17 + $0x9c] sm:$0xf] }
 0x174   : >> { %980 = vst [vmem:[%s1804_s15 + $0x98] sm:$0xf] %v979_v62  ;;  %v983_v0 = vld [vmem:[%s1808_s17 + $0xa0] sm:$0xf]  ;;  %v985_v1 = vld [vmem:[%s1808_s17 + $0xa4] sm:$0xf] }
 0x175   : >> { %982 = vst [vmem:[%s1804_s15 + $0x9c] sm:$0xf] %v981_v63  ;;  %984 = vst [vmem:[%s1804_s15 + $0xa0] sm:$0xf] %v983_v0  ;;  %s2219_s21 = smov (%p988_p11, %s987_s21), 0  ;;  %s897_s20 = sadd.s32 1, %s1816_s20  }
 0x176   : >> { %986 = vst [vmem:[%s1804_s15 + $0xa4] sm:$0xf] %v985_v1  ;;  %s990_s22 = smul.u32 168, %s2219_s21  ;;  %p896_p12 = scmp.ge.s32.totalorder %s897_s20, %s2068_s14 }
 0x177   : >> { %s2212_s18 = smov %s2219_s21 }
 0x178   : >> { %s992_s17 = scalar_lea.vmem %s1994_s6, %s990_s22 [#allocation2]   ;;  %s993_s15 = scalar_lea.vmem %s2062_s11, %s990_s22  }
 0x179   : > { %899 = sbr.rel (!%p896_p12) target bundleno = 346 (0x15a), region = 118 }
 0x180 PF: > { %1744 = sdivrem.u32 %s2217_s7, 42 }
 0x181   : > { %s1344_s23 = smul.u32 168, %s2068_s14 }
 0x183   : > { %s998_s24 = scalar_lea.vmem %s1994_s6, %s1344_s23 [#allocation2]   ;;  %s1000_s25 = scalar_lea.vmem %s2062_s11, %s1344_s23  }
 0x189   : > { %s1745_s26 = spop.drf %1744 }
 0x18a   : > { %p1346_p13 = scmp.le.s32.totalorder %s1745_s26, 0 }
 0x18b   : > { %s1818_s27 = smov (!%p1346_p13), %s1000_s25   ;;  %s1822_s28 = smov (!%p1346_p13), %s998_s24  }
 0x18c   : > { %1219 = sbr.rel (%p1346_p13) target bundleno = 413 (0x19d), region = 123  ;;  %s1826_s29 = smov (!%p1346_p13), 0  }
 0x18d   : > { %s1830_s30 = smov (!%p1346_p13), 0  }
 0x193 LB: >> { %v1010_v2 = vld [vmem:[%s1824_s28] sm:$0xf]  ;;  %s1012_s4 = sadd.s32 1, %s1828_s29  ;;  %s1004_s30 = sadd.s32 1, %s1832_s30   ;;  %s1832_s30 = sphi %s1830_s30, %s1004_s30   ;;  %s1828_s29 = sphi %s1826_s29, %s1827_s29   ;;  %s1824_s28 = sphi %s1822_s28, %s1017_s28   ;;  %s1820_s27 = sphi %s1818_s27, %s1018_s27  }
 0x194   : >> { %1011 = vst [vmem:[%s1820_s27] sm:$0xf] %v1010_v2  ;;  %p1013_p0 = scmp.ge.s32.totalorder %s1012_s4, %s1745_s26  ;;  %p1003_p1 = scmp.ge.s32.totalorder %s1004_s30, %s1745_s26 }
 0x196   : >> { %s2221_s4 = smov (%p1013_p0, %s1012_s4), 0  ;;  %1006 = sbr.rel (!%p1003_p1) target bundleno = 403 (0x193), region = 129 }
 0x197   : >> { %s1347_s5 = sshll.u32 %s2221_s4, 2  ;;  %s1827_s29 = smov %s2221_s4  }
 0x198   : >> { %s1017_s28 = scalar_lea.vmem %s998_s24, %s1347_s5 [#allocation2]   ;;  %s1018_s27 = scalar_lea.vmem %s1000_s25, %s1347_s5  }
 0x19d PF: > { %p10_p2 = scmp.ge.s32.totalorder %s1871_s16, 4   ;;  %s2213_s12 = smov %s1796_s13 }
 0x19e   : > { %s2214_s13 = smov %s1879_s19  ;;  %s2215_s14 = smov %s1871_s16 }
 0x19f   :  { %12 = sbr.rel (!%p10_p2) target bundleno = 2 (0x2), region = 140 }

// kernel: resnet_forward.11
= control target key start
LH: loop header
LB: loop body
LE: loop exit
PB: predicated region body
PF: predicated region fallthrough
CT: control target
= control target key end

     0   :  { %s2004_s12 = smov 0   ;;  %s2006_s13 = smov 0   ;;  %s2354_s0 = inlined_call_operand.vmem [shape: bf16[648,144], index: 0, kind: input, shape index: {}]   ;;  %s2355_s1 = inlined_call_operand.vmem [shape: bf16[144,128], index: 1, kind: input, shape index: {}]   ;;  %s2356_s2 = inlined_call_operand.vmem [shape: f32[1,128], index: 2, kind: input, shape index: {}]   ;;  %s2357_s3 = inlined_call_operand.vmem [shape: bf16[648,128], index: 3, kind: output, shape index: {}]  }
   0x1   :  { %s2008_s14 = smov 0  }
   0x2 LB: > { %s2017_s15 = sadd.s32 4294967295, %s1949_s14   ;;  %s2019_s16 = sadd.s32 1, %s1949_s14   ;;  %s1949_s14 = sphi %s2008_s14, %s2364_s14   ;;  %s1945_s13 = sphi %s2006_s13, %s2363_s13   ;;  %s1941_s12 = sphi %s2004_s12, %s2362_s12  }
   0x3   : > { %s85_s17 = ssub.s32 %s1949_s14, %s2019_s16  ;;  %s88_s18 = sadd.s32 1, %s1945_s13 }
   0x4   : > { %p86_p0 = scmp.eq.s32.totalorder %s85_s17, 0  ;;  %p98_p1 = scmp.ne.s32.totalorder %s1945_s13, %s1941_s12 }
   0x5   : > { %p99_p2 = scmp.eq.s32.totalorder %s2017_s15, 1  ;;  %p1411_p3 = scmp.ge.s32.totalorder %s1949_s14, 1 }
   0x6   : > { %s2027_s19 = scalar_select %p86_p0, %s1945_s13, %s88_s18  }
   0x7   : > { %p2029_p4 = por %p99_p2, %p98_p1  ;;  %p149_p5 = scmp.lt.s32.totalorder %s1949_s14, 3 }
   0x9   : > { %p150_p6 = pnand %p1411_p3, %p149_p5 }
   0xa   : > { %v1819_v0 = vld [vmem:[%s2355_s1] sm:$0xff] (!%p150_p6)   ;;  %v1983_v1 = vmov (!%p150_p6), 0   ;;  %s2037_s23 = smul.u32 (!%p150_p6), 42, %s2017_s15  ;;  %v1820_v2 = vld [vmem:[%s2355_s1 + $0x8] sm:$0xff] (!%p150_p6)   ;;  %v1821_v3 = vld [vmem:[%s2355_s1 + $0x10] sm:$0xff] (!%p150_p6)   ;;  %vm511_vm0 = vcmask (!%p150_p6), 130048  }
   0xb   : > { %153 = sbr.rel (%p150_p6) target bundleno = 437 (0x1b5), region = 32  ;;  %575 = vmatprep.subr.bf16.mxu0 (!%p150_p6), %v1983_v1  ;;  %1710 = vmatprep.subr.bf16.mxu1 (!%p150_p6), %v1983_v1  ;;  %v1822_v4 = vld [vmem:[%s2355_s1 + $0x18] sm:$0xff] (!%p150_p6)   ;;  %v1823_v7 = vld [vmem:[%s2355_s1 + $0x20] sm:$0xff] (!%p150_p6)   ;;  %v1824_v8 = vld [vmem:[%s2355_s1 + $0x28] sm:$0xff] (!%p150_p6)   ;;  %s175_s27 = sand.u32 (!%p150_p6), 1, %s1941_s12  }
   0xc   : > { %576 = vmatpush1.bf16.msra.mxu0 (!%p150_p6), %v1819_v0  ;;  %1719 = vmatpush1.bf16.msra.mxu1 (!%p150_p6), %v1819_v0  ;;  %p184_p7 = scmp.lt.s32.totalorder (!%p150_p6), %s2037_s23, 80  ;;  %v1825_v9 = vld [vmem:[%s2355_s1 + $0x30] sm:$0xff] (!%p150_p6)   ;;  %v1826_v10 = vld [vmem:[%s2355_s1 + $0x38] sm:$0xff] (!%p150_p6)   ;;  %v1827_v11 = vld [vmem:[%s2355_s1 + $0x40] sm:$0xff] (!%p150_p6)   ;;  %s1728_s28 = smul.u32 (!%p150_p6), 168, %s175_s27 }
   0xd   : > { %577 = vmatprep.subr.bf16.mxu0 (!%p150_p6), %v1983_v1  ;;  %1711 = vmatprep.subr.bf16.mxu1 (!%p150_p6), %v1983_v1  ;;  %v2136_v52 = vld [vmem:[%s2356_s2] ss:$0 sm:$0xff] (!%p150_p6) }
   0xe   : > { %s2143_s12 = scalar_lea.vmem (!%p150_p6), [#allocation2], %s1728_s28  }
  0x10   : > { %578 = vmatpush1.bf16.msra.mxu0 (!%p150_p6), %v1820_v2  ;;  %1720 = vmatpush1.bf16.msra.mxu1 (!%p150_p6), %v1820_v2 }
  0x11   : > { %579 = vmatprep.subr.bf16.mxu0 (!%p150_p6), %v1983_v1  ;;  %1712 = vmatprep.subr.bf16.mxu1 (!%p150_p6), %v1983_v1 }
  0x12   : > { %s185_s26 = scalar_select %p184_p7, %s2037_s23, 80 }
  0x13   : > { %s1584_s30 = smul.u32 (%p2029_p4), 168, %s2017_s15 }
  0x14   : > { %s1541_s29 = sshll.u32 %s185_s26, 3  ;;  %580 = vmatpush1.bf16.msra.mxu0 %v1821_v3  ;;  %1721 = vmatpush1.bf16.msra.mxu1 %v1821_v3 }
  0x15   : > { %s2050_s5 = scalar_lea.vmem %s2354_s0, %s1541_s29  ;;  %581 = vmatprep.subr.bf16.mxu0 %v1983_v1  ;;  %1713 = vmatprep.subr.bf16.mxu1 %v1983_v1  ;;  %s1036_s29 = ssub.s32 (%p2029_p4), 81, %s2037_s23 }
  0x16   : > { %v1830_v5 = vld [vmem:[%s2050_s5 + $0x4] ss:$8 sps:$4 sm:$0xff]   ;;  %v1833_v6 = vld [vmem:[%s2050_s5 + $0xb4] ss:$8 sps:$4 sm:$0xff]   ;;  %v1828_v12 = vld [vmem:[%s2050_s5] ss:$8 sps:$4 sm:$0xff]   ;;  %s2211_s6 = scalar_lea.vmem (%p2029_p4), %s2357_s3, %s1584_s30  }
  0x17   : > { %1466 = vmatprep.mubr.msk.bf16.mxu0 %vm511_vm0, %v1830_v5  ;;  %1477 = vmatprep.mubr.msk.bf16.mxu1 %vm511_vm0, %v1833_v6  ;;  %v1831_v13 = vld [vmem:[%s2050_s5 + $0xb0] ss:$8 sps:$4 sm:$0xff]   ;;  %v1834_v14 = vld [vmem:[%s2050_s5 + $0x14] ss:$8 sps:$4 sm:$0xff]   ;;  %v1837_v15 = vld [vmem:[%s2050_s5 + $0xc4] ss:$8 sps:$4 sm:$0xff]  }
  0x18   : > { %582 = vmatpush1.bf16.msra.mxu0 %v1822_v4  ;;  %1722 = vmatpush1.bf16.msra.mxu1 %v1822_v4  ;;  %v1836_v16 = vld [vmem:[%s2050_s5 + $0x10] ss:$8 sps:$4 sm:$0xff]   ;;  %v1839_v17 = vld [vmem:[%s2050_s5 + $0xc0] ss:$8 sps:$4 sm:$0xff]   ;;  %v1840_v18 = vld [vmem:[%s2050_s5 + $0x24] ss:$8 sps:$4 sm:$0xff]  }
  0x19   : > { %583 = vmatprep.subr.bf16.mxu0 %v1983_v1  ;;  %1714 = vmatprep.subr.bf16.mxu1 %v1983_v1  ;;  %v1843_v19 = vld [vmem:[%s2050_s5 + $0xd4] ss:$8 sps:$4 sm:$0xff]   ;;  %v1842_v20 = vld [vmem:[%s2050_s5 + $0x20] ss:$8 sps:$4 sm:$0xff]   ;;  %v1845_v21 = vld [vmem:[%s2050_s5 + $0xd0] ss:$8 sps:$4 sm:$0xff]  }
  0x1a   : > { %v1846_v22 = vld [vmem:[%s2050_s5 + $0x34] ss:$8 sps:$4 sm:$0xff]   ;;  %v1849_v23 = vld [vmem:[%s2050_s5 + $0xe4] ss:$8 sps:$4 sm:$0xff]   ;;  %v1848_v24 = vld [vmem:[%s2050_s5 + $0x30] ss:$8 sps:$4 sm:$0xff]  }
  0x1b   : > { %v1851_v25 = vld [vmem:[%s2050_s5 + $0xe0] ss:$8 sps:$4 sm:$0xff]   ;;  %v1852_v26 = vld [vmem:[%s2050_s5 + $0x44] ss:$8 sps:$4 sm:$0xff]   ;;  %v1855_v27 = vld [vmem:[%s2050_s5 + $0xf4] ss:$8 sps:$4 sm:$0xff]  }
  0x1c   : > { %584 = vmatpush1.bf16.msra.mxu0 %v1823_v7  ;;  %1723 = vmatpush1.bf16.msra.mxu1 %v1823_v7  ;;  %v1854_v28 = vld [vmem:[%s2050_s5 + $0x40] ss:$8 sps:$4 sm:$0xff]   ;;  %v1857_v29 = vld [vmem:[%s2050_s5 + $0xf0] ss:$8 sps:$4 sm:$0xff]   ;;  %v1858_v30 = vld [vmem:[%s2050_s5 + $0x54] ss:$8 sps:$4 sm:$0xff]  }
  0x1d   : > { %585 = vmatprep.subr.bf16.mxu0 %v1983_v1  ;;  %1715 = vmatprep.subr.bf16.mxu1 %v1983_v1  ;;  %v1861_v31 = vld [vmem:[%s2050_s5 + $0x104] ss:$8 sps:$4 sm:$0xff]   ;;  %v1860_v32 = vld [vmem:[%s2050_s5 + $0x50] ss:$8 sps:$4 sm:$0xff]   ;;  %v1863_v33 = vld [vmem:[%s2050_s5 + $0x100] ss:$8 sps:$4 sm:$0xff]  }
  0x1e   : > { %v1864_v34 = vld [vmem:[%s2050_s5 + $0x64] ss:$8 sps:$4 sm:$0xff]   ;;  %v1867_v35 = vld [vmem:[%s2050_s5 + $0x114] ss:$8 sps:$4 sm:$0xff]   ;;  %v1866_v36 = vld [vmem:[%s2050_s5 + $0x60] ss:$8 sps:$4 sm:$0xff]  }
  0x1f   : > { %v1869_v37 = vld [vmem:[%s2050_s5 + $0x110] ss:$8 sps:$4 sm:$0xff]   ;;  %v1870_v38 = vld [vmem:[%s2050_s5 + $0x74] ss:$8 sps:$4 sm:$0xff]   ;;  %v1873_v39 = vld [vmem:[%s2050_s5 + $0x124] ss:$8 sps:$4 sm:$0xff]  }
  0x20   : > { %586 = vmatpush1.bf16.msra.mxu0 %v1824_v8  ;;  %1724 = vmatpush1.bf16.msra.mxu1 %v1824_v8  ;;  %v1872_v40 = vld [vmem:[%s2050_s5 + $0x70] ss:$8 sps:$4 sm:$0xff]   ;;  %v1875_v41 = vld [vmem:[%s2050_s5 + $0x120] ss:$8 sps:$4 sm:$0xff]   ;;  %v1876_v42 = vld [vmem:[%s2050_s5 + $0x84] ss:$8 sps:$4 sm:$0xff]  }
  0x21   : > { %587 = vmatprep.subr.bf16.mxu0 %v1983_v1  ;;  %1716 = vmatprep.subr.bf16.mxu1 %v1983_v1  ;;  %v1879_v43 = vld [vmem:[%s2050_s5 + $0x134] ss:$8 sps:$4 sm:$0xff]   ;;  %v1878_v44 = vld [vmem:[%s2050_s5 + $0x80] ss:$8 sps:$4 sm:$0xff]   ;;  %v1881_v45 = vld [vmem:[%s2050_s5 + $0x130] ss:$8 sps:$4 sm:$0xff]  }
  0x22   : > { %v1882_v46 = vld [vmem:[%s2050_s5 + $0x94] ss:$8 sps:$4 sm:$0xff]   ;;  %v1885_v47 = vld [vmem:[%s2050_s5 + $0x144] ss:$8 sps:$4 sm:$0xff]   ;;  %v1884_v48 = vld [vmem:[%s2050_s5 + $0x90] ss:$8 sps:$4 sm:$0xff]  }
  0x23   : > { %v1887_v49 = vld [vmem:[%s2050_s5 + $0x140] ss:$8 sps:$4 sm:$0xff]   ;;  %v1888_v50 = vld [vmem:[%s2050_s5 + $0xa4] ss:$8 sps:$4 sm:$0xff]   ;;  %p1037_p8 = scmp.lt.s32.totalorder (%p2029_p4), %s1036_s29, 42 }
  0x24   : > { %588 = vmatpush1.bf16.msra.mxu0 %v1825_v9  ;;  %1725 = vmatpush1.bf16.msra.mxu1 %v1825_v9  ;;  %v1890_v51 = vld [vmem:[%s2050_s5 + $0xa0] ss:$8 sps:$4 sm:$0xff]  }
  0x25   : > { %589 = vmatprep.subr.bf16.mxu0 %v1983_v1  ;;  %1717 = vmatprep.subr.bf16.mxu1 %v1983_v1 }
  0x28   : > { %590 = vmatpush1.bf16.msra.mxu0 %v1826_v10  ;;  %1726 = vmatpush1.bf16.msra.mxu1 %v1826_v10 }
  0x29   : > { %591 = vmatprep.subr.bf16.mxu0 %v1983_v1  ;;  %1718 = vmatprep.subr.bf16.mxu1 %v1983_v1 }
  0x2c   : > { %592 = vmatpush1.bf16.msra.mxu0 %v1827_v11  ;;  %1727 = vmatpush1.bf16.msra.mxu1 %v1827_v11 }
  0x2f   : > { %608 = vmatmul.mubr.bf16.vlgmr.msra.gmra.mrb[0].mxu0 %v1828_v12  ;;  %696 = vmatmul.mubr.bf16.vlgmr.msra.gmra.mrb[0].mxu1 %v1831_v13 }
  0x30   : > { %1467 = vmatprep.mubr.msk.bf16.mxu0 %vm511_vm0, %v1834_v14  ;;  %1478 = vmatprep.mubr.msk.bf16.mxu1 %vm511_vm0, %v1837_v15 }
  0x37   : > { %616 = vmatmul.mubr.bf16.gmra.mrb[4].mxu0 %v1836_v16  ;;  %704 = vmatmul.mubr.bf16.gmra.mrb[4].mxu1 %v1839_v17 }
  0x38   : > { %1468 = vmatprep.mubr.msk.bf16.mxu0 %vm511_vm0, %v1840_v18  ;;  %1479 = vmatprep.mubr.msk.bf16.mxu1 %vm511_vm0, %v1843_v19 }
  0x3f   : > { %624 = vmatmul.mubr.bf16.gmra.mrb[8].mxu0 %v1842_v20  ;;  %712 = vmatmul.mubr.bf16.gmra.mrb[8].mxu1 %v1845_v21 }
  0x40   : > { %1469 = vmatprep.mubr.msk.bf16.mxu0 %vm511_vm0, %v1846_v22  ;;  %1480 = vmatprep.mubr.msk.bf16.mxu1 %vm511_vm0, %v1849_v23 }
  0x47   : > { %632 = vmatmul.mubr.bf16.gmra.mrb[12].mxu0 %v1848_v24  ;;  %720 = vmatmul.mubr.bf16.gmra.mrb[12].mxu1 %v1851_v25 }
  0x48   : > { %1470 = vmatprep.mubr.msk.bf16.mxu0 %vm511_vm0, %v1852_v26  ;;  %1481 = vmatprep.mubr.msk.bf16.mxu1 %vm511_vm0, %v1855_v27 }
  0x4f   : > { %640 = vmatmul.mubr.bf16.gmra.mrb[16].mxu0 %v1854_v28  ;;  %728 = vmatmul.mubr.bf16.gmra.mrb[16].mxu1 %v1857_v29 }
  0x50   : > { %1471 = vmatprep.mubr.msk.bf16.mxu0 %vm511_vm0, %v1858_v30  ;;  %1482 = vmatprep.mubr.msk.bf16.mxu1 %vm511_vm0, %v1861_v31 }
  0x57   : > { %648 = vmatmul.mubr.bf16.gmra.mrb[20].mxu0 %v1860_v32  ;;  %736 = vmatmul.mubr.bf16.gmra.mrb[20].mxu1 %v1863_v33 }
  0x58   : > { %1472 = vmatprep.mubr.msk.bf16.mxu0 %vm511_vm0, %v1864_v34  ;;  %1483 = vmatprep.mubr.msk.bf16.mxu1 %vm511_vm0, %v1867_v35 }
  0x5f   : > { %656 = vmatmul.mubr.bf16.gmra.mrb[24].mxu0 %v1866_v36  ;;  %744 = vmatmul.mubr.bf16.gmra.mrb[24].mxu1 %v1869_v37 }
  0x60   : > { %1473 = vmatprep.mubr.msk.bf16.mxu0 %vm511_vm0, %v1870_v38  ;;  %1484 = vmatprep.mubr.msk.bf16.mxu1 %vm511_vm0, %v1873_v39 }
  0x67   : > { %664 = vmatmul.mubr.bf16.gmra.mrb[28].mxu0 %v1872_v40  ;;  %752 = vmatmul.mubr.bf16.gmra.mrb[28].mxu1 %v1875_v41 }
  0x68   : > { %1474 = vmatprep.mubr.msk.bf16.mxu0 %vm511_vm0, %v1876_v42  ;;  %1485 = vmatprep.mubr.msk.bf16.mxu1 %vm511_vm0, %v1879_v43 }
  0x6f   : > { %672 = vmatmul.mubr.bf16.gmra.mrb[32].mxu0 %v1878_v44  ;;  %760 = vmatmul.mubr.bf16.gmra.mrb[32].mxu1 %v1881_v45 }
  0x70   : > { %1475 = vmatprep.mubr.msk.bf16.mxu0 %vm511_vm0, %v1882_v46  ;;  %1486 = vmatprep.mubr.msk.bf16.mxu1 %vm511_vm0, %v1885_v47 }
  0x77   : > { %680 = vmatmul.mubr.bf16.gmra.mrb[36].mxu0 %v1884_v48  ;;  %768 = vmatmul.mubr.bf16.gmra.mrb[36].mxu1 %v1887_v49 }
  0x78   : > { %1476 = vmatprep.mubr.msk.bf16.mxu0 %vm511_vm0, %v1888_v50 }
  0x7f   : > { %688 = vmatmul.mubr.bf16.gmra.mrb[40].mxu0 %v1890_v51 }
 0x102   : > { %v609_v53 = vpop.f32.mrb[0].mxu0  ;;  %v697_v54 = vpop.f32.mrb[0].mxu1 }
 0x103   : > { %v610_v55 = vadd.f32 %v2136_v52, %v609_v53  ;;  %v611_v56 = vpop.f32.mrb[1].mxu0  ;;  %v698_v57 = vadd.f32 %v2136_v52, %v697_v54  ;;  %v699_v58 = vpop.f32.mrb[1].mxu1 }
 0x104   : > { %v612_v59 = vpop.f32.mrb[2].mxu0  ;;  %v700_v60 = vpop.f32.mrb[2].mxu1 }
 0x105   : > { %v613_v61 = vadd.f32 %v2136_v52, %v612_v59  ;;  %v614_v62 = vpop.f32.mrb[3].mxu0  ;;  %v798_v63 = vmax.f32 %v698_v57, 0.0  ;;  %v701_v0 = vadd.f32 %v2136_v52, %v700_v60  ;;  %v702_v1 = vpop.f32.mrb[3].mxu1  ;;  %v776_v2 = vmax.f32 %v610_v55, 0.0 }
 0x107   : > { %v777_v3 = vmax.f32 %v613_v61, 0.0  ;;  %v799_v4 = vmax.f32 %v701_v0, 0.0 }
 0x109   : > { %v1588_v5 = vpack.c.bf16 %v777_v3, %v776_v2  ;;  %v1643_v6 = vpack.c.bf16 %v799_v4, %v798_v63 }
 0x10a   : > { %v617_v7 = vpop.f32.mrb[4].mxu0  ;;  %v705_v8 = vpop.f32.mrb[4].mxu1 }
 0x10b   : > { %1589 = vst [vmem:[%s2143_s12] sm:$0xff] %v1588_v5   ;;  %1700 = vst [vmem:[%s2143_s12 + $0x58] sm:$0xff] %v1643_v6   ;;  %v618_v9 = vadd.f32 %v2136_v52, %v617_v7  ;;  %v619_v10 = vpop.f32.mrb[5].mxu0  ;;  %v706_v11 = vadd.f32 %v2136_v52, %v705_v8  ;;  %v707_v12 = vpop.f32.mrb[5].mxu1 }
 0x10c   : > { %v620_v13 = vpop.f32.mrb[6].mxu0  ;;  %v708_v14 = vpop.f32.mrb[6].mxu1 }
 0x10d   : > { %v621_v15 = vadd.f32 %v2136_v52, %v620_v13  ;;  %v622_v16 = vpop.f32.mrb[7].mxu0  ;;  %v800_v17 = vmax.f32 %v706_v11, 0.0  ;;  %v709_v18 = vadd.f32 %v2136_v52, %v708_v14  ;;  %v710_v19 = vpop.f32.mrb[7].mxu1  ;;  %v778_v20 = vmax.f32 %v618_v9, 0.0 }
 0x10f   : > { %v779_v21 = vmax.f32 %v621_v15, 0.0  ;;  %v801_v22 = vmax.f32 %v709_v18, 0.0 }
 0x111   : > { %v1593_v23 = vpack.c.bf16 %v779_v21, %v778_v20  ;;  %v1648_v24 = vpack.c.bf16 %v801_v22, %v800_v17 }
 0x112   : > { %v625_v25 = vpop.f32.mrb[8].mxu0  ;;  %v713_v26 = vpop.f32.mrb[8].mxu1 }
 0x113   : > { %1690 = vst [vmem:[%s2143_s12 + $0x8] sm:$0xff] %v1593_v23   ;;  %1701 = vst [vmem:[%s2143_s12 + $0x60] sm:$0xff] %v1648_v24   ;;  %v626_v27 = vadd.f32 %v2136_v52, %v625_v25  ;;  %v627_v28 = vpop.f32.mrb[9].mxu0  ;;  %v714_v29 = vadd.f32 %v2136_v52, %v713_v26  ;;  %v715_v30 = vpop.f32.mrb[9].mxu1 }
 0x114   : > { %v628_v31 = vpop.f32.mrb[10].mxu0  ;;  %v716_v32 = vpop.f32.mrb[10].mxu1 }
 0x115   : > { %v629_v33 = vadd.f32 %v2136_v52, %v628_v31  ;;  %v630_v34 = vpop.f32.mrb[11].mxu0  ;;  %v802_v35 = vmax.f32 %v714_v29, 0.0  ;;  %v717_v36 = vadd.f32 %v2136_v52, %v716_v32  ;;  %v718_v37 = vpop.f32.mrb[11].mxu1  ;;  %v780_v38 = vmax.f32 %v626_v27, 0.0 }
 0x117   : > { %v781_v39 = vmax.f32 %v629_v33, 0.0  ;;  %v803_v40 = vmax.f32 %v717_v36, 0.0 }
 0x119   : > { %v1598_v41 = vpack.c.bf16 %v781_v39, %v780_v38  ;;  %v1653_v42 = vpack.c.bf16 %v803_v40, %v802_v35 }
 0x11a   : > { %v633_v43 = vpop.f32.mrb[12].mxu0  ;;  %v721_v44 = vpop.f32.mrb[12].mxu1 }
 0x11b   : > { %1691 = vst [vmem:[%s2143_s12 + $0x10] sm:$0xff] %v1598_v41   ;;  %1702 = vst [vmem:[%s2143_s12 + $0x68] sm:$0xff] %v1653_v42   ;;  %v634_v45 = vadd.f32 %v2136_v52, %v633_v43  ;;  %v635_v46 = vpop.f32.mrb[13].mxu0  ;;  %v722_v47 = vadd.f32 %v2136_v52, %v721_v44  ;;  %v723_v48 = vpop.f32.mrb[13].mxu1 }
 0x11c   : > { %v636_v49 = vpop.f32.mrb[14].mxu0  ;;  %v724_v50 = vpop.f32.mrb[14].mxu1 }
 0x11d   : > { %v637_v51 = vadd.f32 %v2136_v52, %v636_v49  ;;  %v638_v53 = vpop.f32.mrb[15].mxu0  ;;  %v804_v54 = vmax.f32 %v722_v47, 0.0  ;;  %v725_v55 = vadd.f32 %v2136_v52, %v724_v50  ;;  %v726_v56 = vpop.f32.mrb[15].mxu1  ;;  %v782_v57 = vmax.f32 %v634_v45, 0.0 }
 0x11f   : > { %v783_v58 = vmax.f32 %v637_v51, 0.0  ;;  %v805_v59 = vmax.f32 %v725_v55, 0.0 }
 0x121   : > { %v1603_v60 = vpack.c.bf16 %v783_v58, %v782_v57  ;;  %v1658_v61 = vpack.c.bf16 %v805_v59, %v804_v54 }
 0x122   : > { %v641_v62 = vpop.f32.mrb[16].mxu0  ;;  %v729_v63 = vpop.f32.mrb[16].mxu1 }
 0x123   : > { %1692 = vst [vmem:[%s2143_s12 + $0x18] sm:$0xff] %v1603_v60   ;;  %1703 = vst [vmem:[%s2143_s12 + $0x70] sm:$0xff] %v1658_v61   ;;  %v642_v0 = vadd.f32 %v2136_v52, %v641_v62  ;;  %v643_v1 = vpop.f32.mrb[17].mxu0  ;;  %v730_v2 = vadd.f32 %v2136_v52, %v729_v63  ;;  %v731_v3 = vpop.f32.mrb[17].mxu1 }
 0x124   : > { %v644_v4 = vpop.f32.mrb[18].mxu0  ;;  %v732_v5 = vpop.f32.mrb[18].mxu1 }
 0x125   : > { %v645_v6 = vadd.f32 %v2136_v52, %v644_v4  ;;  %v646_v7 = vpop.f32.mrb[19].mxu0  ;;  %v806_v8 = vmax.f32 %v730_v2, 0.0  ;;  %v733_v9 = vadd.f32 %v2136_v52, %v732_v5  ;;  %v734_v10 = vpop.f32.mrb[19].mxu1  ;;  %v784_v11 = vmax.f32 %v642_v0, 0.0 }
 0x127   : > { %v785_v12 = vmax.f32 %v645_v6, 0.0  ;;  %v807_v13 = vmax.f32 %v733_v9, 0.0 }
 0x129   : > { %v1608_v14 = vpack.c.bf16 %v785_v12, %v784_v11  ;;  %v1663_v15 = vpack.c.bf16 %v807_v13, %v806_v8 }
 0x12a   : > { %v649_v16 = vpop.f32.mrb[20].mxu0  ;;  %v737_v17 = vpop.f32.mrb[20].mxu1 }
 0x12b   : > { %1693 = vst [vmem:[%s2143_s12 + $0x20] sm:$0xff] %v1608_v14   ;;  %1704 = vst [vmem:[%s2143_s12 + $0x78] sm:$0xff] %v1663_v15   ;;  %v650_v18 = vadd.f32 %v2136_v52, %v649_v16  ;;  %v651_v19 = vpop.f32.mrb[21].mxu0  ;;  %v738_v20 = vadd.f32 %v2136_v52, %v737_v17  ;;  %v739_v21 = vpop.f32.mrb[21].mxu1 }
 0x12c   : > { %v652_v22 = vpop.f32.mrb[22].mxu0  ;;  %v740_v23 = vpop.f32.mrb[22].mxu1 }
 0x12d   : > { %v653_v24 = vadd.f32 %v2136_v52, %v652_v22  ;;  %v654_v25 = vpop.f32.mrb[23].mxu0  ;;  %v808_v26 = vmax.f32 %v738_v20, 0.0  ;;  %v741_v27 = vadd.f32 %v2136_v52, %v740_v23  ;;  %v742_v28 = vpop.f32.mrb[23].mxu1  ;;  %v786_v29 = vmax.f32 %v650_v18, 0.0 }
 0x12f   : > { %v787_v30 = vmax.f32 %v653_v24, 0.0  ;;  %v809_v31 = vmax.f32 %v741_v27, 0.0 }
 0x131   : > { %v1613_v32 = vpack.c.bf16 %v787_v30, %v786_v29  ;;  %v1668_v33 = vpack.c.bf16 %v809_v31, %v808_v26 }
 0x132   : > { %v657_v34 = vpop.f32.mrb[24].mxu0  ;;  %v745_v35 = vpop.f32.mrb[24].mxu1 }
 0x133   : > { %1694 = vst [vmem:[%s2143_s12 + $0x28] sm:$0xff] %v1613_v32   ;;  %1705 = vst [vmem:[%s2143_s12 + $0x80] sm:$0xff] %v1668_v33   ;;  %v658_v36 = vadd.f32 %v2136_v52, %v657_v34  ;;  %v659_v37 = vpop.f32.mrb[25].mxu0  ;;  %v746_v38 = vadd.f32 %v2136_v52, %v745_v35  ;;  %v747_v39 = vpop.f32.mrb[25].mxu1 }
 0x134   : > { %v660_v40 = vpop.f32.mrb[26].mxu0  ;;  %v748_v41 = vpop.f32.mrb[26].mxu1 }
 0x135   : > { %v661_v42 = vadd.f32 %v2136_v52, %v660_v40  ;;  %v662_v43 = vpop.f32.mrb[27].mxu0  ;;  %v810_v44 = vmax.f32 %v746_v38, 0.0  ;;  %v749_v45 = vadd.f32 %v2136_v52, %v748_v41  ;;  %v750_v46 = vpop.f32.mrb[27].mxu1  ;;  %v788_v47 = vmax.f32 %v658_v36, 0.0 }
 0x137   : > { %v789_v48 = vmax.f32 %v661_v42, 0.0  ;;  %v811_v49 = vmax.f32 %v749_v45, 0.0 }
 0x139   : > { %v1618_v50 = vpack.c.bf16 %v789_v48, %v788_v47  ;;  %v1673_v51 = vpack.c.bf16 %v811_v49, %v810_v44 }
 0x13a   : > { %v665_v53 = vpop.f32.mrb[28].mxu0  ;;  %v753_v54 = vpop.f32.mrb[28].mxu1 }
 0x13b   : > { %1695 = vst [vmem:[%s2143_s12 + $0x30] sm:$0xff] %v1618_v50   ;;  %1706 = vst [vmem:[%s2143_s12 + $0x88] sm:$0xff] %v1673_v51   ;;  %v666_v55 = vadd.f32 %v2136_v52, %v665_v53  ;;  %v667_v56 = vpop.f32.mrb[29].mxu0  ;;  %v754_v57 = vadd.f32 %v2136_v52, %v753_v54  ;;  %v755_v58 = vpop.f32.mrb[29].mxu1 }
 0x13c   : > { %v668_v59 = vpop.f32.mrb[30].mxu0  ;;  %v756_v60 = vpop.f32.mrb[30].mxu1 }
 0x13d   : > { %v669_v61 = vadd.f32 %v2136_v52, %v668_v59  ;;  %v670_v62 = vpop.f32.mrb[31].mxu0  ;;  %v812_v63 = vmax.f32 %v754_v57, 0.0  ;;  %v757_v0 = vadd.f32 %v2136_v52, %v756_v60  ;;  %v758_v1 = vpop.f32.mrb[31].mxu1  ;;  %v790_v2 = vmax.f32 %v666_v55, 0.0 }
 0x13f   : > { %v791_v3 = vmax.f32 %v669_v61, 0.0  ;;  %v813_v4 = vmax.f32 %v757_v0, 0.0 }
 0x141   : > { %v1623_v5 = vpack.c.bf16 %v791_v3, %v790_v2  ;;  %v1678_v6 = vpack.c.bf16 %v813_v4, %v812_v63 }
 0x142   : > { %v673_v7 = vpop.f32.mrb[32].mxu0  ;;  %v761_v8 = vpop.f32.mrb[32].mxu1 }
 0x143   : > { %1696 = vst [vmem:[%s2143_s12 + $0x38] sm:$0xff] %v1623_v5   ;;  %1707 = vst [vmem:[%s2143_s12 + $0x90] sm:$0xff] %v1678_v6   ;;  %v674_v9 = vadd.f32 %v2136_v52, %v673_v7  ;;  %v675_v10 = vpop.f32.mrb[33].mxu0  ;;  %v762_v11 = vadd.f32 %v2136_v52, %v761_v8  ;;  %v763_v12 = vpop.f32.mrb[33].mxu1 }
 0x144   : > { %v676_v13 = vpop.f32.mrb[34].mxu0  ;;  %v764_v14 = vpop.f32.mrb[34].mxu1 }
 0x145   : > { %v677_v15 = vadd.f32 %v2136_v52, %v676_v13  ;;  %v678_v16 = vpop.f32.mrb[35].mxu0  ;;  %v814_v17 = vmax.f32 %v762_v11, 0.0  ;;  %v765_v18 = vadd.f32 %v2136_v52, %v764_v14  ;;  %v766_v19 = vpop.f32.mrb[35].mxu1  ;;  %v792_v20 = vmax.f32 %v674_v9, 0.0 }
 0x147   : > { %v793_v21 = vmax.f32 %v677_v15, 0.0  ;;  %v815_v22 = vmax.f32 %v765_v18, 0.0 }
 0x149   : > { %v1628_v23 = vpack.c.bf16 %v793_v21, %v792_v20  ;;  %v1683_v24 = vpack.c.bf16 %v815_v22, %v814_v17 }
 0x14a   : > { %v681_v25 = vpop.f32.mrb[36].mxu0  ;;  %v769_v26 = vpop.f32.mrb[36].mxu1 }
 0x14b   : > { %1697 = vst [vmem:[%s2143_s12 + $0x40] sm:$0xff] %v1628_v23   ;;  %1708 = vst [vmem:[%s2143_s12 + $0x98] sm:$0xff] %v1683_v24   ;;  %v682_v27 = vadd.f32 %v2136_v52, %v681_v25  ;;  %v683_v28 = vpop.f32.mrb[37].mxu0  ;;  %v770_v29 = vadd.f32 %v2136_v52, %v769_v26  ;;  %v771_v30 = vpop.f32.mrb[37].mxu1 }
 0x14c   : > { %v684_v31 = vpop.f32.mrb[38].mxu0  ;;  %v772_v32 = vpop.f32.mrb[38].mxu1 }
 0x14d   : > { %v685_v33 = vadd.f32 %v2136_v52, %v684_v31  ;;  %v686_v34 = vpop.f32.mrb[39].mxu0  ;;  %v816_v35 = vmax.f32 %v770_v29, 0.0  ;;  %v773_v36 = vadd.f32 %v2136_v52, %v772_v32  ;;  %v774_v37 = vpop.f32.mrb[39].mxu1  ;;  %v794_v38 = vmax.f32 %v682_v27, 0.0 }
 0x14f   : > { %v795_v39 = vmax.f32 %v685_v33, 0.0  ;;  %v817_v40 = vmax.f32 %v773_v36, 0.0 }
 0x151   : > { %v1633_v41 = vpack.c.bf16 %v795_v39, %v794_v38  ;;  %v1688_v42 = vpack.c.bf16 %v817_v40, %v816_v35 }
 0x152   : > { %v689_v43 = vpop.f32.mrb[40].mxu0 }
 0x153   : > { %1698 = vst [vmem:[%s2143_s12 + $0x48] sm:$0xff] %v1633_v41   ;;  %1709 = vst [vmem:[%s2143_s12 + $0xa0] sm:$0xff] %v1688_v42   ;;  %v690_v44 = vadd.f32 %v2136_v52, %v689_v43  ;;  %v691_v45 = vpop.f32.mrb[41].mxu0 }
 0x154   : > { %v692_v46 = vpop.f32.mrb[42].mxu0 }
 0x155   : > { %v693_v47 = vadd.f32 %v2136_v52, %v692_v46  ;;  %v694_v48 = vpop.f32.mrb[43].mxu0  ;;  %v796_v49 = vmax.f32 %v690_v44, 0.0  ;;  %1034 = sbr.rel (!%p2029_p4) target bundleno = 437 (0x1b5), region = 36 }
 0x157   : > { %v797_v50 = vmax.f32 %v693_v47, 0.0 }
 0x159   : > { %v1638_v51 = vpack.c.bf16 %v797_v50, %v796_v49 }
 0x15b   : > { %1699 = vst [vmem:[%s2143_s12 + $0x50] sm:$0xff] %v1638_v51  }
 0x15c   : > { %s2366_s29 = smov (!%p1037_p8, %s1036_s29), 42 }
 0x15d   : > { %s1529_s7 = sshll.u32 %s2366_s29, 6 }
 0x15e   : > { %p1532_p9 = scmp.eq.s32.totalorder %s1529_s7, 0 }
 0x15f   : > { %1891 = sdivrem.u32 (!%p1532_p9), %s2366_s29, 42 }
 0x160   : > { %1045 = sbr.rel (%p1532_p9) target bundleno = 437 (0x1b5), region = 40 }
 0x168   : > { %s2217_s20 = spop.drf %1891 }
 0x169   : > { %p1533_p10 = scmp.le.s32.totalorder %s2217_s20, 0 }
 0x16a   : > { %s2359_s15 = smov (!%p1533_p10), %s2211_s6  ;;  %s2360_s23 = smov (!%p1533_p10), %s2143_s12 }
 0x16b   : > { %1364 = sbr.rel (%p1533_p10) target bundleno = 408 (0x198), region = 112  ;;  %s2226_s8 = smov (!%p1533_p10), 0  }
 0x16c   : > { %s2228_s9 = smov (!%p1533_p10), 0  }
 0x172 LB: >> { %v1062_v52 = vld [vmem:[%s1957_s23] sm:$0xf]  ;;  %v1064_v53 = vld [vmem:[%s1957_s23 + $0x4] sm:$0xf]  ;;  %v1066_v54 = vld [vmem:[%s1957_s23 + $0x8] sm:$0xf]  ;;  %s1965_s9 = sphi %s2228_s9, %s1056_s9   ;;  %s1961_s8 = sphi %s2226_s8, %s2361_s8   ;;  %s1957_s23 = sphi %s2360_s23, %s1151_s23   ;;  %s1953_s15 = sphi %s2359_s15, %s1152_s15  }
 0x173   : >> { %1063 = vst [vmem:[%s1953_s15] sm:$0xf] %v1062_v52  ;;  %1065 = vst [vmem:[%s1953_s15 + $0x4] sm:$0xf] %v1064_v53  ;;  %v1068_v55 = vld [vmem:[%s1957_s23 + $0xc] sm:$0xf]  ;;  %s1146_s10 = sadd.s32 1, %s1961_s8 }
 0x174   : >> { %1067 = vst [vmem:[%s1953_s15 + $0x8] sm:$0xf] %v1066_v54  ;;  %v1070_v56 = vld [vmem:[%s1957_s23 + $0x10] sm:$0xf]  ;;  %v1072_v57 = vld [vmem:[%s1957_s23 + $0x14] sm:$0xf]  ;;  %p1147_p11 = scmp.ge.s32.totalorder %s1146_s10, %s2217_s20 }
 0x175   : >> { %1069 = vst [vmem:[%s1953_s15 + $0xc] sm:$0xf] %v1068_v55  ;;  %1071 = vst [vmem:[%s1953_s15 + $0x10] sm:$0xf] %v1070_v56  ;;  %v1074_v58 = vld [vmem:[%s1957_s23 + $0x18] sm:$0xf] }
 0x176   : >> { %1073 = vst [vmem:[%s1953_s15 + $0x14] sm:$0xf] %v1072_v57  ;;  %v1076_v59 = vld [vmem:[%s1957_s23 + $0x1c] sm:$0xf]  ;;  %v1078_v60 = vld [vmem:[%s1957_s23 + $0x20] sm:$0xf] }
 0x177   : >> { %1075 = vst [vmem:[%s1953_s15 + $0x18] sm:$0xf] %v1074_v58  ;;  %1077 = vst [vmem:[%s1953_s15 + $0x1c] sm:$0xf] %v1076_v59  ;;  %v1080_v61 = vld [vmem:[%s1957_s23 + $0x24] sm:$0xf] }
 0x178   : >> { %1079 = vst [vmem:[%s1953_s15 + $0x20] sm:$0xf] %v1078_v60  ;;  %v1082_v62 = vld [vmem:[%s1957_s23 + $0x28] sm:$0xf]  ;;  %v1084_v63 = vld [vmem:[%s1957_s23 + $0x2c] sm:$0xf] }
 0x179   : >> { %1081 = vst [vmem:[%s1953_s15 + $0x24] sm:$0xf] %v1080_v61  ;;  %1083 = vst [vmem:[%s1953_s15 + $0x28] sm:$0xf] %v1082_v62  ;;  %v1086_v0 = vld [vmem:[%s1957_s23 + $0x30] sm:$0xf] }
 0x17a   : >> { %1085 = vst [vmem:[%s1953_s15 + $0x2c] sm:$0xf] %v1084_v63  ;;  %v1088_v1 = vld [vmem:[%s1957_s23 + $0x34] sm:$0xf]  ;;  %v1090_v2 = vld [vmem:[%s1957_s23 + $0x38] sm:$0xf] }
 0x17b   : >> { %1087 = vst [vmem:[%s1953_s15 + $0x30] sm:$0xf] %v1086_v0  ;;  %1089 = vst [vmem:[%s1953_s15 + $0x34] sm:$0xf] %v1088_v1  ;;  %v1092_v3 = vld [vmem:[%s1957_s23 + $0x3c] sm:$0xf] }
 0x17c   : >> { %1091 = vst [vmem:[%s1953_s15 + $0x38] sm:$0xf] %v1090_v2  ;;  %v1094_v4 = vld [vmem:[%s1957_s23 + $0x40] sm:$0xf]  ;;  %v1096_v5 = vld [vmem:[%s1957_s23 + $0x44] sm:$0xf] }
 0x17d   : >> { %1093 = vst [vmem:[%s1953_s15 + $0x3c] sm:$0xf] %v1092_v3  ;;  %1095 = vst [vmem:[%s1953_s15 + $0x40] sm:$0xf] %v1094_v4  ;;  %v1098_v6 = vld [vmem:[%s1957_s23 + $0x48] sm:$0xf] }
 0x17e   : >> { %1097 = vst [vmem:[%s1953_s15 + $0x44] sm:$0xf] %v1096_v5  ;;  %v1100_v7 = vld [vmem:[%s1957_s23 + $0x4c] sm:$0xf]  ;;  %v1102_v8 = vld [vmem:[%s1957_s23 + $0x50] sm:$0xf] }
 0x17f   : >> { %1099 = vst [vmem:[%s1953_s15 + $0x48] sm:$0xf] %v1098_v6  ;;  %1101 = vst [vmem:[%s1953_s15 + $0x4c] sm:$0xf] %v1100_v7  ;;  %v1104_v9 = vld [vmem:[%s1957_s23 + $0x54] sm:$0xf] }
 0x180   : >> { %1103 = vst [vmem:[%s1953_s15 + $0x50] sm:$0xf] %v1102_v8  ;;  %v1106_v10 = vld [vmem:[%s1957_s23 + $0x58] sm:$0xf]  ;;  %v1108_v11 = vld [vmem:[%s1957_s23 + $0x5c] sm:$0xf] }
 0x181   : >> { %1105 = vst [vmem:[%s1953_s15 + $0x54] sm:$0xf] %v1104_v9  ;;  %1107 = vst [vmem:[%s1953_s15 + $0x58] sm:$0xf] %v1106_v10  ;;  %v1110_v12 = vld [vmem:[%s1957_s23 + $0x60] sm:$0xf] }
 0x182   : >> { %1109 = vst [vmem:[%s1953_s15 + $0x5c] sm:$0xf] %v1108_v11  ;;  %v1112_v13 = vld [vmem:[%s1957_s23 + $0x64] sm:$0xf]  ;;  %v1114_v14 = vld [vmem:[%s1957_s23 + $0x68] sm:$0xf] }
 0x183   : >> { %1111 = vst [vmem:[%s1953_s15 + $0x60] sm:$0xf] %v1110_v12  ;;  %1113 = vst [vmem:[%s1953_s15 + $0x64] sm:$0xf] %v1112_v13  ;;  %v1116_v15 = vld [vmem:[%s1957_s23 + $0x6c] sm:$0xf] }
 0x184   : >> { %1115 = vst [vmem:[%s1953_s15 + $0x68] sm:$0xf] %v1114_v14  ;;  %v1118_v16 = vld [vmem:[%s1957_s23 + $0x70] sm:$0xf]  ;;  %v1120_v17 = vld [vmem:[%s1957_s23 + $0x74] sm:$0xf] }
 0x185   : >> { %1117 = vst [vmem:[%s1953_s15 + $0x6c] sm:$0xf] %v1116_v15  ;;  %1119 = vst [vmem:[%s1953_s15 + $0x70] sm:$0xf] %v1118_v16  ;;  %v1122_v18 = vld [vmem:[%s1957_s23 + $0x78] sm:$0xf] }
 0x186   : >> { %1121 = vst [vmem:[%s1953_s15 + $0x74] sm:$0xf] %v1120_v17  ;;  %v1124_v19 = vld [vmem:[%s1957_s23 + $0x7c] sm:$0xf]  ;;  %v1126_v20 = vld [vmem:[%s1957_s23 + $0x80] sm:$0xf] }
 0x187   : >> { %1123 = vst [vmem:[%s1953_s15 + $0x78] sm:$0xf] %v1122_v18  ;;  %1125 = vst [vmem:[%s1953_s15 + $0x7c] sm:$0xf] %v1124_v19  ;;  %v1128_v21 = vld [vmem:[%s1957_s23 + $0x84] sm:$0xf] }
 0x188   : >> { %1127 = vst [vmem:[%s1953_s15 + $0x80] sm:$0xf] %v1126_v20  ;;  %v1130_v22 = vld [vmem:[%s1957_s23 + $0x88] sm:$0xf]  ;;  %v1132_v23 = vld [vmem:[%s1957_s23 + $0x8c] sm:$0xf] }
 0x189   : >> { %1129 = vst [vmem:[%s1953_s15 + $0x84] sm:$0xf] %v1128_v21  ;;  %1131 = vst [vmem:[%s1953_s15 + $0x88] sm:$0xf] %v1130_v22  ;;  %v1134_v24 = vld [vmem:[%s1957_s23 + $0x90] sm:$0xf] }
 0x18a   : >> { %1133 = vst [vmem:[%s1953_s15 + $0x8c] sm:$0xf] %v1132_v23  ;;  %v1136_v25 = vld [vmem:[%s1957_s23 + $0x94] sm:$0xf]  ;;  %v1138_v26 = vld [vmem:[%s1957_s23 + $0x98] sm:$0xf] }
 0x18b   : >> { %1135 = vst [vmem:[%s1953_s15 + $0x90] sm:$0xf] %v1134_v24  ;;  %1137 = vst [vmem:[%s1953_s15 + $0x94] sm:$0xf] %v1136_v25  ;;  %v1140_v27 = vld [vmem:[%s1957_s23 + $0x9c] sm:$0xf] }
 0x18c   : >> { %1139 = vst [vmem:[%s1953_s15 + $0x98] sm:$0xf] %v1138_v26  ;;  %v1142_v28 = vld [vmem:[%s1957_s23 + $0xa0] sm:$0xf]  ;;  %v1144_v29 = vld [vmem:[%s1957_s23 + $0xa4] sm:$0xf] }
 0x18d   : >> { %1141 = vst [vmem:[%s1953_s15 + $0x9c] sm:$0xf] %v1140_v27  ;;  %1143 = vst [vmem:[%s1953_s15 + $0xa0] sm:$0xf] %v1142_v28  ;;  %s2368_s10 = smov (%p1147_p11, %s1146_s10), 0  ;;  %s1056_s9 = sadd.s32 1, %s1965_s9  }
 0x18e   : >> { %1145 = vst [vmem:[%s1953_s15 + $0xa4] sm:$0xf] %v1144_v29  ;;  %s1149_s11 = smul.u32 168, %s2368_s10  ;;  %p1055_p12 = scmp.ge.s32.totalorder %s1056_s9, %s2217_s20 }
 0x18f   : >> { %s2361_s8 = smov %s2368_s10 }
 0x190   : >> { %s1151_s23 = scalar_lea.vmem %s2143_s12, %s1149_s11 [#allocation2]   ;;  %s1152_s15 = scalar_lea.vmem %s2211_s6, %s1149_s11  }
 0x191   : > { %1058 = sbr.rel (!%p1055_p12) target bundleno = 370 (0x172), region = 118 }
 0x198 PF: > { %1893 = sdivrem.u32 %s2366_s29, 42 }
 0x199   : > { %s1534_s14 = smul.u32 168, %s2217_s20 }
 0x19b   : > { %s1157_s17 = scalar_lea.vmem %s2143_s12, %s1534_s14 [#allocation2]   ;;  %s1159_s18 = scalar_lea.vmem %s2211_s6, %s1534_s14  }
 0x1a1   : > { %s1894_s21 = spop.drf %1893 }
 0x1a2   : > { %p1536_p13 = scmp.le.s32.totalorder %s1894_s21, 0 }
 0x1a3   : > { %s1967_s22 = smov (!%p1536_p13), %s1159_s18   ;;  %s1971_s24 = smov (!%p1536_p13), %s1157_s17  }
 0x1a4   : > { %1378 = sbr.rel (%p1536_p13) target bundleno = 437 (0x1b5), region = 123  ;;  %s1975_s25 = smov (!%p1536_p13), 0  }
 0x1a5   : > { %s1979_s26 = smov (!%p1536_p13), 0  }
 0x1ab LB: >> { %v1169_v30 = vld [vmem:[%s1973_s24] sm:$0xf]  ;;  %s1171_s27 = sadd.s32 1, %s1977_s25  ;;  %s1163_s26 = sadd.s32 1, %s1981_s26   ;;  %s1981_s26 = sphi %s1979_s26, %s1163_s26   ;;  %s1977_s25 = sphi %s1975_s25, %s1976_s25   ;;  %s1973_s24 = sphi %s1971_s24, %s1176_s24   ;;  %s1969_s22 = sphi %s1967_s22, %s1177_s22  }
 0x1ac   : >> { %1170 = vst [vmem:[%s1969_s22] sm:$0xf] %v1169_v30  ;;  %p1172_p0 = scmp.ge.s32.totalorder %s1171_s27, %s1894_s21  ;;  %p1162_p1 = scmp.ge.s32.totalorder %s1163_s26, %s1894_s21 }
 0x1ae   : >> { %s2370_s27 = smov (%p1172_p0, %s1171_s27), 0  ;;  %1165 = sbr.rel (!%p1162_p1) target bundleno = 427 (0x1ab), region = 129 }
 0x1af   : >> { %s1537_s28 = sshll.u32 %s2370_s27, 2  ;;  %s1976_s25 = smov %s2370_s27  }
 0x1b0   : >> { %s1176_s24 = scalar_lea.vmem %s1157_s17, %s1537_s28 [#allocation2]   ;;  %s1177_s22 = scalar_lea.vmem %s1159_s18, %s1537_s28  }
 0x1b5 PF: > { %p10_p2 = scmp.ge.s32.totalorder %s2019_s16, 4   ;;  %s2362_s12 = smov %s1945_s13 }
 0x1b6   : > { %s2363_s13 = smov %s2027_s19  ;;  %s2364_s14 = smov %s2019_s16 }
 0x1b7   :  { %12 = sbr.rel (!%p10_p2) target bundleno = 2 (0x2), region = 140 }

// kernel: resnet_forward.12
= control target key start
LH: loop header
LB: loop body
LE: loop exit
PB: predicated region body
PF: predicated region fallthrough
CT: control target
= control target key end

     0   :  { %s2321_s15 = smov 0   ;;  %s2323_s16 = smov 0   ;;  %s2701_s0 = inlined_call_operand.vmem [shape: bf16[648,144], index: 0, kind: input, shape index: {}]   ;;  %s2702_s1 = inlined_call_operand.vmem [shape: bf16[144,128], index: 1, kind: input, shape index: {}]   ;;  %s2703_s2 = inlined_call_operand.vmem [shape: f32[1,128], index: 2, kind: input, shape index: {}]   ;;  %s2704_s3 = inlined_call_operand.vmem [shape: bf16[648,128], index: 3, kind: input, shape index: {}]   ;;  %s2705_s4 = inlined_call_operand.vmem [shape: bf16[648,128], index: 4, kind: output, shape index: {}]  }
   0x1   :  { %s2325_s17 = smov 0  }
   0x2 LB: > { %s2334_s18 = sadd.s32 4294967295, %s2261_s17   ;;  %s2336_s19 = sadd.s32 1, %s2261_s17   ;;  %s2261_s17 = sphi %s2325_s17, %s2712_s17   ;;  %s2257_s16 = sphi %s2323_s16, %s2711_s16   ;;  %s2253_s15 = sphi %s2321_s15, %s2710_s15  }
   0x3   : > { %s112_s20 = ssub.s32 %s2261_s17, %s2336_s19  ;;  %s115_s21 = sadd.s32 1, %s2257_s16 }
   0x4   : > { %p113_p0 = scmp.eq.s32.totalorder %s112_s20, 0  ;;  %p125_p1 = scmp.ne.s32.totalorder %s2257_s16, %s2253_s15 }
   0x5   : > { %p126_p2 = scmp.eq.s32.totalorder %s2334_s18, 1  ;;  %p1618_p3 = scmp.ge.s32.totalorder %s2261_s17, 1 }
   0x6   : > { %s2344_s22 = scalar_select %p113_p0, %s2257_s16, %s115_s21  }
   0x7   : > { %p2346_p4 = por %p126_p2, %p125_p1  ;;  %p193_p5 = scmp.lt.s32.totalorder %s2261_s17, 3 }
   0x9   : > { %p194_p6 = pnand %p1618_p3, %p193_p5 }
   0xa   : > { %v2131_v0 = vld [vmem:[%s2702_s1] sm:$0xff] (!%p194_p6)   ;;  %v2295_v1 = vmov (!%p194_p6), 0   ;;  %s2354_s26 = smul.u32 (!%p194_p6), 42, %s2334_s18  ;;  %v2132_v2 = vld [vmem:[%s2702_s1 + $0x8] sm:$0xff] (!%p194_p6)   ;;  %v2133_v3 = vld [vmem:[%s2702_s1 + $0x10] sm:$0xff] (!%p194_p6)   ;;  %vm580_vm0 = vcmask (!%p194_p6), 130048  }
   0xb   : > { %197 = sbr.rel (%p194_p6) target bundleno = 439 (0x1b7), region = 36  ;;  %644 = vmatprep.subr.bf16.mxu0 (!%p194_p6), %v2295_v1  ;;  %2022 = vmatprep.subr.bf16.mxu1 (!%p194_p6), %v2295_v1  ;;  %v2134_v4 = vld [vmem:[%s2702_s1 + $0x18] sm:$0xff] (!%p194_p6)   ;;  %v2135_v7 = vld [vmem:[%s2702_s1 + $0x20] sm:$0xff] (!%p194_p6)   ;;  %v2136_v8 = vld [vmem:[%s2702_s1 + $0x28] sm:$0xff] (!%p194_p6)  }
   0xc   : > { %645 = vmatpush1.bf16.msra.mxu0 (!%p194_p6), %v2131_v0  ;;  %2031 = vmatpush1.bf16.msra.mxu1 (!%p194_p6), %v2131_v0  ;;  %p239_p7 = scmp.lt.s32.totalorder (!%p194_p6), %s2354_s26, 80  ;;  %v2137_v9 = vld [vmem:[%s2702_s1 + $0x30] sm:$0xff] (!%p194_p6)   ;;  %v2138_v10 = vld [vmem:[%s2702_s1 + $0x38] sm:$0xff] (!%p194_p6)   ;;  %v2139_v11 = vld [vmem:[%s2702_s1 + $0x40] sm:$0xff] (!%p194_p6)  }
   0xd   : > { %646 = vmatprep.subr.bf16.mxu0 (!%p194_p6), %v2295_v1  ;;  %2023 = vmatprep.subr.bf16.mxu1 (!%p194_p6), %v2295_v1  ;;  %v2464_v54 = vld [vmem:[%s2703_s2] ss:$0 sm:$0xff] (!%p194_p6) }
  0x10   : > { %647 = vmatpush1.bf16.msra.mxu0 (!%p194_p6), %v2132_v2  ;;  %2032 = vmatpush1.bf16.msra.mxu1 (!%p194_p6), %v2132_v2 }
  0x11   : > { %648 = vmatprep.subr.bf16.mxu0 (!%p194_p6), %v2295_v1  ;;  %2024 = vmatprep.subr.bf16.mxu1 (!%p194_p6), %v2295_v1 }
  0x12   : > { %s2361_s29 = scalar_select %p239_p7, %s2354_s26, 80 }
  0x13   : > { %s1231_s11 = ssub.s32 (%p2346_p4), 81, %s2354_s26  ;;  %s1792_s12 = smul.u32 (%p2346_p4), 168, %s2334_s18 }
  0x14   : > { %s1749_s6 = sshll.u32 %s2361_s29, 3  ;;  %649 = vmatpush1.bf16.msra.mxu0 %v2133_v3  ;;  %2033 = vmatpush1.bf16.msra.mxu1 %v2133_v3  ;;  %s1621_s30 = sshll.u32 %s2361_s29, 2 }
  0x15   : > { %s2370_s9 = scalar_lea.vmem %s2701_s0, %s1749_s6  ;;  %650 = vmatprep.subr.bf16.mxu0 %v2295_v1  ;;  %2025 = vmatprep.subr.bf16.mxu1 %v2295_v1  ;;  %s2457_s7 = scalar_lea.vmem %s2704_s3, %s1621_s30 }
  0x16   : > { %v2142_v5 = vld [vmem:[%s2370_s9 + $0x4] ss:$8 sps:$4 sm:$0xff]   ;;  %v2145_v6 = vld [vmem:[%s2370_s9 + $0xb4] ss:$8 sps:$4 sm:$0xff]   ;;  %v2140_v12 = vld [vmem:[%s2370_s9] ss:$8 sps:$4 sm:$0xff]   ;;  %s2558_s17 = scalar_lea.vmem (%p2346_p4), %s2705_s4, %s1792_s12  }
  0x17   : > { %1674 = vmatprep.mubr.msk.bf16.mxu0 %vm580_vm0, %v2142_v5  ;;  %1685 = vmatprep.mubr.msk.bf16.mxu1 %vm580_vm0, %v2145_v6  ;;  %v2143_v13 = vld [vmem:[%s2370_s9 + $0xb0] ss:$8 sps:$4 sm:$0xff]   ;;  %v2146_v14 = vld [vmem:[%s2370_s9 + $0x14] ss:$8 sps:$4 sm:$0xff]   ;;  %v2149_v15 = vld [vmem:[%s2370_s9 + $0xc4] ss:$8 sps:$4 sm:$0xff]  }
  0x18   : > { %651 = vmatpush1.bf16.msra.mxu0 %v2134_v4  ;;  %2034 = vmatpush1.bf16.msra.mxu1 %v2134_v4  ;;  %v2148_v16 = vld [vmem:[%s2370_s9 + $0x10] ss:$8 sps:$4 sm:$0xff]   ;;  %v2151_v17 = vld [vmem:[%s2370_s9 + $0xc0] ss:$8 sps:$4 sm:$0xff]   ;;  %v2152_v18 = vld [vmem:[%s2370_s9 + $0x24] ss:$8 sps:$4 sm:$0xff]  }
  0x19   : > { %652 = vmatprep.subr.bf16.mxu0 %v2295_v1  ;;  %2026 = vmatprep.subr.bf16.mxu1 %v2295_v1  ;;  %v2155_v19 = vld [vmem:[%s2370_s9 + $0xd4] ss:$8 sps:$4 sm:$0xff]   ;;  %v2154_v20 = vld [vmem:[%s2370_s9 + $0x20] ss:$8 sps:$4 sm:$0xff]   ;;  %v2157_v21 = vld [vmem:[%s2370_s9 + $0xd0] ss:$8 sps:$4 sm:$0xff]  }
  0x1a   : > { %v2158_v22 = vld [vmem:[%s2370_s9 + $0x34] ss:$8 sps:$4 sm:$0xff]   ;;  %v2161_v23 = vld [vmem:[%s2370_s9 + $0xe4] ss:$8 sps:$4 sm:$0xff]   ;;  %v2160_v24 = vld [vmem:[%s2370_s9 + $0x30] ss:$8 sps:$4 sm:$0xff]  }
  0x1b   : > { %v2163_v25 = vld [vmem:[%s2370_s9 + $0xe0] ss:$8 sps:$4 sm:$0xff]   ;;  %v2164_v26 = vld [vmem:[%s2370_s9 + $0x44] ss:$8 sps:$4 sm:$0xff]   ;;  %v2167_v27 = vld [vmem:[%s2370_s9 + $0xf4] ss:$8 sps:$4 sm:$0xff]  }
  0x1c   : > { %653 = vmatpush1.bf16.msra.mxu0 %v2135_v7  ;;  %2035 = vmatpush1.bf16.msra.mxu1 %v2135_v7  ;;  %v2166_v28 = vld [vmem:[%s2370_s9 + $0x40] ss:$8 sps:$4 sm:$0xff]   ;;  %v2169_v29 = vld [vmem:[%s2370_s9 + $0xf0] ss:$8 sps:$4 sm:$0xff]   ;;  %v2170_v30 = vld [vmem:[%s2370_s9 + $0x54] ss:$8 sps:$4 sm:$0xff]  }
  0x1d   : > { %654 = vmatprep.subr.bf16.mxu0 %v2295_v1  ;;  %2027 = vmatprep.subr.bf16.mxu1 %v2295_v1  ;;  %v2173_v31 = vld [vmem:[%s2370_s9 + $0x104] ss:$8 sps:$4 sm:$0xff]   ;;  %v2172_v32 = vld [vmem:[%s2370_s9 + $0x50] ss:$8 sps:$4 sm:$0xff]   ;;  %v2175_v33 = vld [vmem:[%s2370_s9 + $0x100] ss:$8 sps:$4 sm:$0xff]  }
  0x1e   : > { %v2176_v34 = vld [vmem:[%s2370_s9 + $0x64] ss:$8 sps:$4 sm:$0xff]   ;;  %v2179_v35 = vld [vmem:[%s2370_s9 + $0x114] ss:$8 sps:$4 sm:$0xff]   ;;  %v2178_v36 = vld [vmem:[%s2370_s9 + $0x60] ss:$8 sps:$4 sm:$0xff]  }
  0x1f   : > { %v2181_v37 = vld [vmem:[%s2370_s9 + $0x110] ss:$8 sps:$4 sm:$0xff]   ;;  %v2182_v38 = vld [vmem:[%s2370_s9 + $0x74] ss:$8 sps:$4 sm:$0xff]   ;;  %v2185_v39 = vld [vmem:[%s2370_s9 + $0x124] ss:$8 sps:$4 sm:$0xff]  }
  0x20   : > { %655 = vmatpush1.bf16.msra.mxu0 %v2136_v8  ;;  %2036 = vmatpush1.bf16.msra.mxu1 %v2136_v8  ;;  %v2184_v40 = vld [vmem:[%s2370_s9 + $0x70] ss:$8 sps:$4 sm:$0xff]   ;;  %v2187_v41 = vld [vmem:[%s2370_s9 + $0x120] ss:$8 sps:$4 sm:$0xff]   ;;  %v2188_v42 = vld [vmem:[%s2370_s9 + $0x84] ss:$8 sps:$4 sm:$0xff]  }
  0x21   : > { %656 = vmatprep.subr.bf16.mxu0 %v2295_v1  ;;  %2028 = vmatprep.subr.bf16.mxu1 %v2295_v1  ;;  %v2191_v43 = vld [vmem:[%s2370_s9 + $0x134] ss:$8 sps:$4 sm:$0xff]   ;;  %v2190_v44 = vld [vmem:[%s2370_s9 + $0x80] ss:$8 sps:$4 sm:$0xff]   ;;  %v2193_v45 = vld [vmem:[%s2370_s9 + $0x130] ss:$8 sps:$4 sm:$0xff]  }
  0x22   : > { %v2194_v46 = vld [vmem:[%s2370_s9 + $0x94] ss:$8 sps:$4 sm:$0xff]   ;;  %v2197_v47 = vld [vmem:[%s2370_s9 + $0x144] ss:$8 sps:$4 sm:$0xff]   ;;  %v2196_v48 = vld [vmem:[%s2370_s9 + $0x90] ss:$8 sps:$4 sm:$0xff]  }
  0x23   : > { %v2199_v49 = vld [vmem:[%s2370_s9 + $0x140] ss:$8 sps:$4 sm:$0xff]   ;;  %v2200_v50 = vld [vmem:[%s2370_s9 + $0xa4] ss:$8 sps:$4 sm:$0xff]   ;;  %v1992_v53 = vld [vmem:[%s2457_s7 + $0x58] sm:$0xff]   ;;  %s230_s29 = sand.u32 1, %s2253_s15  }
  0x24   : > { %657 = vmatpush1.bf16.msra.mxu0 %v2137_v9  ;;  %2037 = vmatpush1.bf16.msra.mxu1 %v2137_v9  ;;  %v2202_v51 = vld [vmem:[%s2370_s9 + $0xa0] ss:$8 sps:$4 sm:$0xff]   ;;  %v1839_v56 = vunpack.c.l.bf16 %v1992_v53  ;;  %v1840_v0 = vunpack.c.h.bf16 %v1992_v53  ;;  %s2040_s9 = smul.u32 168, %s230_s29  ;;  %p1232_p8 = scmp.lt.s32.totalorder (%p2346_p4), %s1231_s11, 42 }
  0x25   : > { %658 = vmatprep.subr.bf16.mxu0 %v2295_v1  ;;  %2029 = vmatprep.subr.bf16.mxu1 %v2295_v1  ;;  %v1794_v52 = vld [vmem:[%s2457_s7] sm:$0xff]   ;;  %v1982_v8 = vld [vmem:[%s2457_s7 + $0x8] sm:$0xff]  }
  0x26   : > { %v1795_v55 = vunpack.c.l.bf16 %v1794_v52  ;;  %v1796_v61 = vunpack.c.h.bf16 %v1794_v52  ;;  %s2475_s15 = scalar_lea.vmem [#allocation2], %s2040_s9  }
  0x28   : > { %659 = vmatpush1.bf16.msra.mxu0 %v2138_v10  ;;  %2038 = vmatpush1.bf16.msra.mxu1 %v2138_v10  ;;  %v1993_v10 = vld [vmem:[%s2457_s7 + $0x60] sm:$0xff]  }
  0x29   : > { %660 = vmatprep.subr.bf16.mxu0 %v2295_v1  ;;  %2030 = vmatprep.subr.bf16.mxu1 %v2295_v1 }
  0x2c   : > { %661 = vmatpush1.bf16.msra.mxu0 %v2139_v11  ;;  %2039 = vmatpush1.bf16.msra.mxu1 %v2139_v11 }
  0x2f   : > { %677 = vmatmul.mubr.bf16.vlgmr.msra.gmra.mrb[0].mxu0 %v2140_v12  ;;  %765 = vmatmul.mubr.bf16.vlgmr.msra.gmra.mrb[0].mxu1 %v2143_v13 }
  0x30   : > { %1675 = vmatprep.mubr.msk.bf16.mxu0 %vm580_vm0, %v2146_v14  ;;  %1686 = vmatprep.mubr.msk.bf16.mxu1 %vm580_vm0, %v2149_v15  ;;  %v1799_v14 = vunpack.c.l.bf16 %v1982_v8 }
  0x37   : > { %685 = vmatmul.mubr.bf16.gmra.mrb[4].mxu0 %v2148_v16  ;;  %773 = vmatmul.mubr.bf16.gmra.mrb[4].mxu1 %v2151_v17 }
  0x38   : > { %1676 = vmatprep.mubr.msk.bf16.mxu0 %vm580_vm0, %v2152_v18  ;;  %1687 = vmatprep.mubr.msk.bf16.mxu1 %vm580_vm0, %v2155_v19  ;;  %v1843_v18 = vunpack.c.l.bf16 %v1993_v10 }
  0x3f   : > { %693 = vmatmul.mubr.bf16.gmra.mrb[8].mxu0 %v2154_v20  ;;  %781 = vmatmul.mubr.bf16.gmra.mrb[8].mxu1 %v2157_v21  ;;  %v1800_v20 = vunpack.c.h.bf16 %v1982_v8 }
  0x40   : > { %1677 = vmatprep.mubr.msk.bf16.mxu0 %vm580_vm0, %v2158_v22  ;;  %1688 = vmatprep.mubr.msk.bf16.mxu1 %vm580_vm0, %v2161_v23  ;;  %v1844_v22 = vunpack.c.h.bf16 %v1993_v10 }
  0x47   : > { %701 = vmatmul.mubr.bf16.gmra.mrb[12].mxu0 %v2160_v24  ;;  %789 = vmatmul.mubr.bf16.gmra.mrb[12].mxu1 %v2163_v25 }
  0x48   : > { %1678 = vmatprep.mubr.msk.bf16.mxu0 %vm580_vm0, %v2164_v26  ;;  %1689 = vmatprep.mubr.msk.bf16.mxu1 %vm580_vm0, %v2167_v27 }
  0x4f   : > { %709 = vmatmul.mubr.bf16.gmra.mrb[16].mxu0 %v2166_v28  ;;  %797 = vmatmul.mubr.bf16.gmra.mrb[16].mxu1 %v2169_v29 }
  0x50   : > { %1679 = vmatprep.mubr.msk.bf16.mxu0 %vm580_vm0, %v2170_v30  ;;  %1690 = vmatprep.mubr.msk.bf16.mxu1 %vm580_vm0, %v2173_v31 }
  0x57   : > { %717 = vmatmul.mubr.bf16.gmra.mrb[20].mxu0 %v2172_v32  ;;  %805 = vmatmul.mubr.bf16.gmra.mrb[20].mxu1 %v2175_v33 }
  0x58   : > { %1680 = vmatprep.mubr.msk.bf16.mxu0 %vm580_vm0, %v2176_v34  ;;  %1691 = vmatprep.mubr.msk.bf16.mxu1 %vm580_vm0, %v2179_v35 }
  0x5f   : > { %725 = vmatmul.mubr.bf16.gmra.mrb[24].mxu0 %v2178_v36  ;;  %813 = vmatmul.mubr.bf16.gmra.mrb[24].mxu1 %v2181_v37  ;;  %v1983_v36 = vld [vmem:[%s2457_s7 + $0x10] sm:$0xff]  }
  0x60   : > { %1681 = vmatprep.mubr.msk.bf16.mxu0 %vm580_vm0, %v2182_v38  ;;  %1692 = vmatprep.mubr.msk.bf16.mxu1 %vm580_vm0, %v2185_v39  ;;  %v1994_v38 = vld [vmem:[%s2457_s7 + $0x68] sm:$0xff]  }
  0x67   : > { %733 = vmatmul.mubr.bf16.gmra.mrb[28].mxu0 %v2184_v40  ;;  %821 = vmatmul.mubr.bf16.gmra.mrb[28].mxu1 %v2187_v41 }
  0x68   : > { %1682 = vmatprep.mubr.msk.bf16.mxu0 %vm580_vm0, %v2188_v42  ;;  %1693 = vmatprep.mubr.msk.bf16.mxu1 %vm580_vm0, %v2191_v43  ;;  %v1803_v42 = vunpack.c.l.bf16 %v1983_v36 }
  0x6f   : > { %741 = vmatmul.mubr.bf16.gmra.mrb[32].mxu0 %v2190_v44  ;;  %829 = vmatmul.mubr.bf16.gmra.mrb[32].mxu1 %v2193_v45 }
  0x70   : > { %1683 = vmatprep.mubr.msk.bf16.mxu0 %vm580_vm0, %v2194_v46  ;;  %1694 = vmatprep.mubr.msk.bf16.mxu1 %vm580_vm0, %v2197_v47  ;;  %v1847_v46 = vunpack.c.l.bf16 %v1994_v38 }
  0x77   : > { %749 = vmatmul.mubr.bf16.gmra.mrb[36].mxu0 %v2196_v48  ;;  %837 = vmatmul.mubr.bf16.gmra.mrb[36].mxu1 %v2199_v49  ;;  %v1804_v48 = vunpack.c.h.bf16 %v1983_v36 }
  0x78   : > { %1684 = vmatprep.mubr.msk.bf16.mxu0 %vm580_vm0, %v2200_v50  ;;  %v1848_v50 = vunpack.c.h.bf16 %v1994_v38 }
  0x7f   : > { %757 = vmatmul.mubr.bf16.gmra.mrb[40].mxu0 %v2202_v51 }
 0x102   : > { %v678_v57 = vpop.f32.mrb[0].mxu0  ;;  %v766_v58 = vpop.f32.mrb[0].mxu1 }
 0x103   : > { %v679_v59 = vadd.f32 %v2464_v54, %v678_v57  ;;  %v680_v60 = vpop.f32.mrb[1].mxu0  ;;  %v767_v62 = vadd.f32 %v2464_v54, %v766_v58  ;;  %v768_v63 = vpop.f32.mrb[1].mxu1 }
 0x104   : > { %v681_v1 = vpop.f32.mrb[2].mxu0  ;;  %v769_v2 = vpop.f32.mrb[2].mxu1 }
 0x105   : > { %v929_v3 = vadd.f32 %v1795_v55, %v679_v59  ;;  %v682_v4 = vadd.f32 %v2464_v54, %v681_v1  ;;  %v683_v5 = vpop.f32.mrb[3].mxu0  ;;  %v951_v6 = vadd.f32 %v1839_v56, %v767_v62  ;;  %v770_v7 = vadd.f32 %v2464_v54, %v769_v2  ;;  %v771_v9 = vpop.f32.mrb[3].mxu1  ;;  %v1984_v1 = vld [vmem:[%s2457_s7 + $0x18] sm:$0xff]  }
 0x107   : > { %v930_v11 = vadd.f32 %v1796_v61, %v682_v4  ;;  %v993_v12 = vmax.f32 %v951_v6, 0.0  ;;  %v952_v13 = vadd.f32 %v1840_v0, %v770_v7  ;;  %v971_v15 = vmax.f32 %v929_v3, 0.0  ;;  %v1995_v3 = vld [vmem:[%s2457_s7 + $0x70] sm:$0xff]  }
 0x108   : > { %v1807_v7 = vunpack.c.l.bf16 %v1984_v1 }
 0x109   : > { %v972_v16 = vmax.f32 %v930_v11, 0.0  ;;  %v994_v17 = vmax.f32 %v952_v13, 0.0  ;;  %v1851_v11 = vunpack.c.l.bf16 %v1995_v3  ;;  %v1808_v13 = vunpack.c.h.bf16 %v1984_v1 }
 0x10a   : > { %v686_v19 = vpop.f32.mrb[4].mxu0  ;;  %v774_v21 = vpop.f32.mrb[4].mxu1 }
 0x10b   : > { %v1880_v23 = vpack.c.bf16 %v972_v16, %v971_v15  ;;  %v1935_v24 = vpack.c.bf16 %v994_v17, %v993_v12  ;;  %v687_v25 = vadd.f32 %v2464_v54, %v686_v19  ;;  %v688_v26 = vpop.f32.mrb[5].mxu0  ;;  %v775_v27 = vadd.f32 %v2464_v54, %v774_v21  ;;  %v776_v28 = vpop.f32.mrb[5].mxu1 }
 0x10c   : > { %v689_v29 = vpop.f32.mrb[6].mxu0  ;;  %v777_v30 = vpop.f32.mrb[6].mxu1  ;;  %v1852_v15 = vunpack.c.h.bf16 %v1995_v3 }
 0x10d   : > { %1881 = vst [vmem:[%s2475_s15] sm:$0xff] %v1880_v23   ;;  %2012 = vst [vmem:[%s2475_s15 + $0x58] sm:$0xff] %v1935_v24   ;;  %v931_v31 = vadd.f32 %v1799_v14, %v687_v25  ;;  %v690_v32 = vadd.f32 %v2464_v54, %v689_v29  ;;  %v691_v33 = vpop.f32.mrb[7].mxu0  ;;  %v953_v34 = vadd.f32 %v1843_v18, %v775_v27  ;;  %v779_v37 = vpop.f32.mrb[7].mxu1  ;;  %v1985_v29 = vld [vmem:[%s2457_s7 + $0x20] sm:$0xff]  }
 0x10e   : > { %v778_v35 = vadd.f32 %v2464_v54, %v777_v30 }
 0x10f   : > { %v932_v39 = vadd.f32 %v1800_v20, %v690_v32  ;;  %v995_v40 = vmax.f32 %v953_v34, 0.0  ;;  %v973_v43 = vmax.f32 %v931_v31, 0.0  ;;  %v1996_v31 = vld [vmem:[%s2457_s7 + $0x78] sm:$0xff]  }
 0x110   : > { %v954_v41 = vadd.f32 %v1844_v22, %v778_v35  ;;  %v1811_v35 = vunpack.c.l.bf16 %v1985_v29 }
 0x111   : > { %v974_v44 = vmax.f32 %v932_v39, 0.0  ;;  %v1855_v39 = vunpack.c.l.bf16 %v1996_v31 }
 0x112   : > { %v996_v45 = vmax.f32 %v954_v41, 0.0  ;;  %v694_v47 = vpop.f32.mrb[8].mxu0  ;;  %v782_v49 = vpop.f32.mrb[8].mxu1  ;;  %v1812_v41 = vunpack.c.h.bf16 %v1985_v29 }
 0x113   : > { %v1885_v51 = vpack.c.bf16 %v974_v44, %v973_v43  ;;  %v695_v53 = vadd.f32 %v2464_v54, %v694_v47  ;;  %v696_v55 = vpop.f32.mrb[9].mxu0  ;;  %v783_v56 = vadd.f32 %v2464_v54, %v782_v49  ;;  %v784_v57 = vpop.f32.mrb[9].mxu1  ;;  %v1856_v43 = vunpack.c.h.bf16 %v1996_v31 }
 0x114   : > { %v1940_v52 = vpack.c.bf16 %v996_v45, %v995_v40  ;;  %v697_v58 = vpop.f32.mrb[10].mxu0  ;;  %v785_v59 = vpop.f32.mrb[10].mxu1 }
 0x115   : > { %2002 = vst [vmem:[%s2475_s15 + $0x8] sm:$0xff] %v1885_v51   ;;  %v933_v60 = vadd.f32 %v1803_v42, %v695_v53  ;;  %v698_v61 = vadd.f32 %v2464_v54, %v697_v58  ;;  %v699_v62 = vpop.f32.mrb[11].mxu0  ;;  %v955_v63 = vadd.f32 %v1847_v46, %v783_v56  ;;  %v786_v0 = vadd.f32 %v2464_v54, %v785_v59  ;;  %v787_v2 = vpop.f32.mrb[11].mxu1  ;;  %v1986_v58 = vld [vmem:[%s2457_s7 + $0x28] sm:$0xff]  }
 0x116   : > { %2013 = vst [vmem:[%s2475_s15 + $0x60] sm:$0xff] %v1940_v52  }
 0x117   : > { %v934_v4 = vadd.f32 %v1804_v48, %v698_v61  ;;  %v997_v5 = vmax.f32 %v955_v63, 0.0  ;;  %v956_v6 = vadd.f32 %v1848_v50, %v786_v0  ;;  %v975_v8 = vmax.f32 %v933_v60, 0.0  ;;  %v1997_v60 = vld [vmem:[%s2457_s7 + $0x80] sm:$0xff]  }
 0x118   : > { %v1815_v0 = vunpack.c.l.bf16 %v1986_v58 }
 0x119   : > { %v976_v9 = vmax.f32 %v934_v4, 0.0  ;;  %v998_v10 = vmax.f32 %v956_v6, 0.0  ;;  %v1859_v4 = vunpack.c.l.bf16 %v1997_v60  ;;  %v1816_v6 = vunpack.c.h.bf16 %v1986_v58 }
 0x11a   : > { %v702_v12 = vpop.f32.mrb[12].mxu0  ;;  %v790_v14 = vpop.f32.mrb[12].mxu1 }
 0x11b   : > { %v1890_v16 = vpack.c.bf16 %v976_v9, %v975_v8  ;;  %v1945_v17 = vpack.c.bf16 %v998_v10, %v997_v5  ;;  %v703_v18 = vadd.f32 %v2464_v54, %v702_v12  ;;  %v704_v19 = vpop.f32.mrb[13].mxu0  ;;  %v791_v20 = vadd.f32 %v2464_v54, %v790_v14  ;;  %v792_v21 = vpop.f32.mrb[13].mxu1 }
 0x11c   : > { %v705_v22 = vpop.f32.mrb[14].mxu0  ;;  %v793_v23 = vpop.f32.mrb[14].mxu1  ;;  %v1860_v8 = vunpack.c.h.bf16 %v1997_v60 }
 0x11d   : > { %2003 = vst [vmem:[%s2475_s15 + $0x10] sm:$0xff] %v1890_v16   ;;  %2014 = vst [vmem:[%s2475_s15 + $0x68] sm:$0xff] %v1945_v17   ;;  %v935_v24 = vadd.f32 %v1807_v7, %v703_v18  ;;  %v706_v25 = vadd.f32 %v2464_v54, %v705_v22  ;;  %v707_v26 = vpop.f32.mrb[15].mxu0  ;;  %v957_v27 = vadd.f32 %v1851_v11, %v791_v20  ;;  %v795_v30 = vpop.f32.mrb[15].mxu1  ;;  %v1987_v22 = vld [vmem:[%s2457_s7 + $0x30] sm:$0xff]  }
 0x11e   : > { %v794_v28 = vadd.f32 %v2464_v54, %v793_v23 }
 0x11f   : > { %v936_v32 = vadd.f32 %v1808_v13, %v706_v25  ;;  %v999_v33 = vmax.f32 %v957_v27, 0.0  ;;  %v977_v36 = vmax.f32 %v935_v24, 0.0  ;;  %v1998_v24 = vld [vmem:[%s2457_s7 + $0x88] sm:$0xff]  }
 0x120   : > { %v958_v34 = vadd.f32 %v1852_v15, %v794_v28  ;;  %v1819_v28 = vunpack.c.l.bf16 %v1987_v22 }
 0x121   : > { %v978_v37 = vmax.f32 %v936_v32, 0.0  ;;  %v1863_v32 = vunpack.c.l.bf16 %v1998_v24 }
 0x122   : > { %v1000_v38 = vmax.f32 %v958_v34, 0.0  ;;  %v710_v40 = vpop.f32.mrb[16].mxu0  ;;  %v798_v42 = vpop.f32.mrb[16].mxu1  ;;  %v1820_v34 = vunpack.c.h.bf16 %v1987_v22 }
 0x123   : > { %v1895_v44 = vpack.c.bf16 %v978_v37, %v977_v36  ;;  %v711_v46 = vadd.f32 %v2464_v54, %v710_v40  ;;  %v712_v47 = vpop.f32.mrb[17].mxu0  ;;  %v799_v48 = vadd.f32 %v2464_v54, %v798_v42  ;;  %v800_v49 = vpop.f32.mrb[17].mxu1  ;;  %v1864_v36 = vunpack.c.h.bf16 %v1998_v24 }
 0x124   : > { %v1950_v45 = vpack.c.bf16 %v1000_v38, %v999_v33  ;;  %v713_v50 = vpop.f32.mrb[18].mxu0  ;;  %v801_v51 = vpop.f32.mrb[18].mxu1 }
 0x125   : > { %2004 = vst [vmem:[%s2475_s15 + $0x18] sm:$0xff] %v1895_v44   ;;  %v937_v52 = vadd.f32 %v1811_v35, %v711_v46  ;;  %v714_v53 = vadd.f32 %v2464_v54, %v713_v50  ;;  %v715_v55 = vpop.f32.mrb[19].mxu0  ;;  %v959_v56 = vadd.f32 %v1855_v39, %v799_v48  ;;  %v802_v57 = vadd.f32 %v2464_v54, %v801_v51  ;;  %v803_v59 = vpop.f32.mrb[19].mxu1  ;;  %v1988_v50 = vld [vmem:[%s2457_s7 + $0x38] sm:$0xff]  }
 0x126   : > { %2015 = vst [vmem:[%s2475_s15 + $0x70] sm:$0xff] %v1950_v45  }
 0x127   : > { %v938_v61 = vadd.f32 %v1812_v41, %v714_v53  ;;  %v1001_v62 = vmax.f32 %v959_v56, 0.0  ;;  %v960_v63 = vadd.f32 %v1856_v43, %v802_v57  ;;  %v979_v1 = vmax.f32 %v937_v52, 0.0  ;;  %v1999_v52 = vld [vmem:[%s2457_s7 + $0x90] sm:$0xff]  }
 0x128   : > { %v1823_v57 = vunpack.c.l.bf16 %v1988_v50 }
 0x129   : > { %v980_v2 = vmax.f32 %v938_v61, 0.0  ;;  %v1002_v3 = vmax.f32 %v960_v63, 0.0  ;;  %v1867_v61 = vunpack.c.l.bf16 %v1999_v52  ;;  %v1824_v63 = vunpack.c.h.bf16 %v1988_v50 }
 0x12a   : > { %v718_v5 = vpop.f32.mrb[20].mxu0  ;;  %v806_v7 = vpop.f32.mrb[20].mxu1 }
 0x12b   : > { %v1900_v9 = vpack.c.bf16 %v980_v2, %v979_v1  ;;  %v1955_v10 = vpack.c.bf16 %v1002_v3, %v1001_v62  ;;  %v719_v11 = vadd.f32 %v2464_v54, %v718_v5  ;;  %v720_v12 = vpop.f32.mrb[21].mxu0  ;;  %v807_v13 = vadd.f32 %v2464_v54, %v806_v7  ;;  %v808_v14 = vpop.f32.mrb[21].mxu1 }
 0x12c   : > { %v721_v15 = vpop.f32.mrb[22].mxu0  ;;  %v809_v16 = vpop.f32.mrb[22].mxu1  ;;  %v1868_v1 = vunpack.c.h.bf16 %v1999_v52 }
 0x12d   : > { %2005 = vst [vmem:[%s2475_s15 + $0x20] sm:$0xff] %v1900_v9   ;;  %2016 = vst [vmem:[%s2475_s15 + $0x78] sm:$0xff] %v1955_v10   ;;  %v939_v17 = vadd.f32 %v1815_v0, %v719_v11  ;;  %v722_v18 = vadd.f32 %v2464_v54, %v721_v15  ;;  %v723_v19 = vpop.f32.mrb[23].mxu0  ;;  %v961_v20 = vadd.f32 %v1859_v4, %v807_v13  ;;  %v811_v23 = vpop.f32.mrb[23].mxu1  ;;  %v1989_v15 = vld [vmem:[%s2457_s7 + $0x40] sm:$0xff]  }
 0x12e   : > { %v810_v21 = vadd.f32 %v2464_v54, %v809_v16 }
 0x12f   : > { %v940_v25 = vadd.f32 %v1816_v6, %v722_v18  ;;  %v1003_v26 = vmax.f32 %v961_v20, 0.0  ;;  %v981_v29 = vmax.f32 %v939_v17, 0.0  ;;  %v2000_v17 = vld [vmem:[%s2457_s7 + $0x98] sm:$0xff]  }
 0x130   : > { %v962_v27 = vadd.f32 %v1860_v8, %v810_v21  ;;  %v1827_v21 = vunpack.c.l.bf16 %v1989_v15 }
 0x131   : > { %v982_v30 = vmax.f32 %v940_v25, 0.0  ;;  %v1871_v25 = vunpack.c.l.bf16 %v2000_v17 }
 0x132   : > { %v1004_v31 = vmax.f32 %v962_v27, 0.0  ;;  %v726_v33 = vpop.f32.mrb[24].mxu0  ;;  %v814_v35 = vpop.f32.mrb[24].mxu1  ;;  %v1828_v27 = vunpack.c.h.bf16 %v1989_v15 }
 0x133   : > { %v1905_v37 = vpack.c.bf16 %v982_v30, %v981_v29  ;;  %v727_v39 = vadd.f32 %v2464_v54, %v726_v33  ;;  %v728_v40 = vpop.f32.mrb[25].mxu0  ;;  %v815_v41 = vadd.f32 %v2464_v54, %v814_v35  ;;  %v816_v42 = vpop.f32.mrb[25].mxu1  ;;  %v1872_v29 = vunpack.c.h.bf16 %v2000_v17 }
 0x134   : > { %v1960_v38 = vpack.c.bf16 %v1004_v31, %v1003_v26  ;;  %v729_v43 = vpop.f32.mrb[26].mxu0  ;;  %v817_v44 = vpop.f32.mrb[26].mxu1 }
 0x135   : > { %2006 = vst [vmem:[%s2475_s15 + $0x28] sm:$0xff] %v1905_v37   ;;  %v941_v45 = vadd.f32 %v1819_v28, %v727_v39  ;;  %v730_v46 = vadd.f32 %v2464_v54, %v729_v43  ;;  %v731_v47 = vpop.f32.mrb[27].mxu0  ;;  %v963_v48 = vadd.f32 %v1863_v32, %v815_v41  ;;  %v818_v49 = vadd.f32 %v2464_v54, %v817_v44  ;;  %v819_v51 = vpop.f32.mrb[27].mxu1  ;;  %v1990_v43 = vld [vmem:[%s2457_s7 + $0x48] sm:$0xff]  }
 0x136   : > { %2017 = vst [vmem:[%s2475_s15 + $0x80] sm:$0xff] %v1960_v38  }
 0x137   : > { %v942_v53 = vadd.f32 %v1820_v34, %v730_v46  ;;  %v1005_v55 = vmax.f32 %v963_v48, 0.0  ;;  %v964_v56 = vadd.f32 %v1864_v36, %v818_v49  ;;  %v983_v58 = vmax.f32 %v941_v45, 0.0  ;;  %v2001_v45 = vld [vmem:[%s2457_s7 + $0xa0] sm:$0xff]  }
 0x138   : > { %v1831_v49 = vunpack.c.l.bf16 %v1990_v43 }
 0x139   : > { %v984_v59 = vmax.f32 %v942_v53, 0.0  ;;  %v1006_v60 = vmax.f32 %v964_v56, 0.0  ;;  %v1875_v53 = vunpack.c.l.bf16 %v2001_v45  ;;  %v1832_v56 = vunpack.c.h.bf16 %v1990_v43 }
 0x13a   : > { %v734_v62 = vpop.f32.mrb[28].mxu0  ;;  %v822_v0 = vpop.f32.mrb[28].mxu1 }
 0x13b   : > { %v1910_v2 = vpack.c.bf16 %v984_v59, %v983_v58  ;;  %v1965_v3 = vpack.c.bf16 %v1006_v60, %v1005_v55  ;;  %v735_v4 = vadd.f32 %v2464_v54, %v734_v62  ;;  %v736_v5 = vpop.f32.mrb[29].mxu0  ;;  %v823_v6 = vadd.f32 %v2464_v54, %v822_v0  ;;  %v824_v7 = vpop.f32.mrb[29].mxu1 }
 0x13c   : > { %v737_v8 = vpop.f32.mrb[30].mxu0  ;;  %v825_v9 = vpop.f32.mrb[30].mxu1  ;;  %v1876_v58 = vunpack.c.h.bf16 %v2001_v45 }
 0x13d   : > { %2007 = vst [vmem:[%s2475_s15 + $0x30] sm:$0xff] %v1910_v2   ;;  %2018 = vst [vmem:[%s2475_s15 + $0x88] sm:$0xff] %v1965_v3   ;;  %v943_v10 = vadd.f32 %v1823_v57, %v735_v4  ;;  %v738_v11 = vadd.f32 %v2464_v54, %v737_v8  ;;  %v739_v12 = vpop.f32.mrb[31].mxu0  ;;  %v965_v13 = vadd.f32 %v1867_v61, %v823_v6  ;;  %v827_v16 = vpop.f32.mrb[31].mxu1 }
 0x13e   : > { %v826_v14 = vadd.f32 %v2464_v54, %v825_v9  ;;  %v1991_v9 = vld [vmem:[%s2457_s7 + $0x50] sm:$0xff]  }
 0x13f   : > { %v944_v18 = vadd.f32 %v1824_v63, %v738_v11  ;;  %v1007_v19 = vmax.f32 %v965_v13, 0.0  ;;  %v985_v22 = vmax.f32 %v943_v10, 0.0  ;;  %v1835_v16 = vunpack.c.l.bf16 %v1991_v9 }
 0x140   : > { %v966_v20 = vadd.f32 %v1868_v1, %v826_v14 }
 0x141   : > { %v986_v23 = vmax.f32 %v944_v18, 0.0 }
 0x142   : > { %v1008_v24 = vmax.f32 %v966_v20, 0.0  ;;  %v742_v26 = vpop.f32.mrb[32].mxu0  ;;  %v830_v28 = vpop.f32.mrb[32].mxu1 }
 0x143   : > { %v1915_v30 = vpack.c.bf16 %v986_v23, %v985_v22  ;;  %v743_v32 = vadd.f32 %v2464_v54, %v742_v26  ;;  %v744_v33 = vpop.f32.mrb[33].mxu0  ;;  %v831_v34 = vadd.f32 %v2464_v54, %v830_v28  ;;  %v832_v35 = vpop.f32.mrb[33].mxu1  ;;  %v1836_v22 = vunpack.c.h.bf16 %v1991_v9 }
 0x144   : > { %v1970_v31 = vpack.c.bf16 %v1008_v24, %v1007_v19  ;;  %v745_v36 = vpop.f32.mrb[34].mxu0  ;;  %v833_v37 = vpop.f32.mrb[34].mxu1 }
 0x145   : > { %2008 = vst [vmem:[%s2475_s15 + $0x38] sm:$0xff] %v1915_v30   ;;  %v945_v38 = vadd.f32 %v1827_v21, %v743_v32  ;;  %v746_v39 = vadd.f32 %v2464_v54, %v745_v36  ;;  %v747_v40 = vpop.f32.mrb[35].mxu0  ;;  %v967_v41 = vadd.f32 %v1871_v25, %v831_v34  ;;  %v834_v42 = vadd.f32 %v2464_v54, %v833_v37  ;;  %v835_v44 = vpop.f32.mrb[35].mxu1 }
 0x146   : > { %2019 = vst [vmem:[%s2475_s15 + $0x90] sm:$0xff] %v1970_v31  }
 0x147   : > { %v946_v46 = vadd.f32 %v1828_v27, %v746_v39  ;;  %v1009_v47 = vmax.f32 %v967_v41, 0.0  ;;  %v968_v48 = vadd.f32 %v1872_v29, %v834_v42  ;;  %v987_v50 = vmax.f32 %v945_v38, 0.0 }
 0x149   : > { %v988_v51 = vmax.f32 %v946_v46, 0.0  ;;  %v1010_v52 = vmax.f32 %v968_v48, 0.0 }
 0x14a   : > { %v750_v55 = vpop.f32.mrb[36].mxu0  ;;  %v838_v57 = vpop.f32.mrb[36].mxu1 }
 0x14b   : > { %v1920_v59 = vpack.c.bf16 %v988_v51, %v987_v50  ;;  %v1975_v60 = vpack.c.bf16 %v1010_v52, %v1009_v47  ;;  %v751_v61 = vadd.f32 %v2464_v54, %v750_v55  ;;  %v752_v62 = vpop.f32.mrb[37].mxu0  ;;  %v839_v63 = vadd.f32 %v2464_v54, %v838_v57  ;;  %v840_v0 = vpop.f32.mrb[37].mxu1 }
 0x14c   : > { %v753_v1 = vpop.f32.mrb[38].mxu0  ;;  %v841_v2 = vpop.f32.mrb[38].mxu1 }
 0x14d   : > { %2009 = vst [vmem:[%s2475_s15 + $0x40] sm:$0xff] %v1920_v59   ;;  %2020 = vst [vmem:[%s2475_s15 + $0x98] sm:$0xff] %v1975_v60   ;;  %v947_v3 = vadd.f32 %v1831_v49, %v751_v61  ;;  %v754_v4 = vadd.f32 %v2464_v54, %v753_v1  ;;  %v755_v5 = vpop.f32.mrb[39].mxu0  ;;  %v969_v6 = vadd.f32 %v1875_v53, %v839_v63  ;;  %v843_v8 = vpop.f32.mrb[39].mxu1 }
 0x14e   : > { %v842_v7 = vadd.f32 %v2464_v54, %v841_v2 }
 0x14f   : > { %v948_v10 = vadd.f32 %v1832_v56, %v754_v4  ;;  %v1011_v11 = vmax.f32 %v969_v6, 0.0  ;;  %v989_v13 = vmax.f32 %v947_v3, 0.0 }
 0x150   : > { %v970_v12 = vadd.f32 %v1876_v58, %v842_v7 }
 0x151   : > { %v990_v14 = vmax.f32 %v948_v10, 0.0 }
 0x152   : > { %v1012_v15 = vmax.f32 %v970_v12, 0.0  ;;  %v758_v17 = vpop.f32.mrb[40].mxu0 }
 0x153   : > { %v1925_v18 = vpack.c.bf16 %v990_v14, %v989_v13  ;;  %v759_v20 = vadd.f32 %v2464_v54, %v758_v17  ;;  %v760_v21 = vpop.f32.mrb[41].mxu0 }
 0x154   : > { %v1980_v19 = vpack.c.bf16 %v1012_v15, %v1011_v11  ;;  %v761_v23 = vpop.f32.mrb[42].mxu0 }
 0x155   : > { %2010 = vst [vmem:[%s2475_s15 + $0x48] sm:$0xff] %v1925_v18   ;;  %v949_v24 = vadd.f32 %v1835_v16, %v759_v20  ;;  %v762_v25 = vadd.f32 %v2464_v54, %v761_v23  ;;  %v763_v26 = vpop.f32.mrb[43].mxu0 }
 0x156   : > { %2021 = vst [vmem:[%s2475_s15 + $0xa0] sm:$0xff] %v1980_v19  }
 0x157   : > { %v950_v27 = vadd.f32 %v1836_v22, %v762_v25  ;;  %v991_v28 = vmax.f32 %v949_v24, 0.0  ;;  %1229 = sbr.rel (!%p2346_p4) target bundleno = 439 (0x1b7), region = 40 }
 0x159   : > { %v992_v29 = vmax.f32 %v950_v27, 0.0 }
 0x15b   : > { %v1930_v30 = vpack.c.bf16 %v992_v29, %v991_v28 }
 0x15d   : > { %2011 = vst [vmem:[%s2475_s15 + $0x50] sm:$0xff] %v1930_v30  }
 0x15e   : > { %s2714_s11 = smov (!%p1232_p8, %s1231_s11), 42 }
 0x15f   : > { %s1737_s20 = sshll.u32 %s2714_s11, 6 }
 0x160   : > { %p1740_p9 = scmp.eq.s32.totalorder %s1737_s20, 0 }
 0x161   : > { %2203 = sdivrem.u32 (!%p1740_p9), %s2714_s11, 42 }
 0x162   : > { %1240 = sbr.rel (%p1740_p9) target bundleno = 439 (0x1b7), region = 44 }
 0x16a   : > { %s2564_s23 = spop.drf %2203 }
 0x16b   : > { %p1741_p10 = scmp.le.s32.totalorder %s2564_s23, 0 }
 0x16c   : > { %s2707_s18 = smov (!%p1741_p10), %s2558_s17  ;;  %s2708_s26 = smov (!%p1741_p10), %s2475_s15 }
 0x16d   : > { %1565 = sbr.rel (%p1741_p10) target bundleno = 410 (0x19a), region = 119  ;;  %s2573_s21 = smov (!%p1741_p10), 0  }
 0x16e   : > { %s2575_s24 = smov (!%p1741_p10), 0  }
 0x174 LB: >> { %v1257_v54 = vld [vmem:[%s2269_s26] sm:$0xf]  ;;  %v1259_v31 = vld [vmem:[%s2269_s26 + $0x4] sm:$0xf]  ;;  %v1261_v32 = vld [vmem:[%s2269_s26 + $0x8] sm:$0xf]  ;;  %s2277_s24 = sphi %s2575_s24, %s1251_s24   ;;  %s2273_s21 = sphi %s2573_s21, %s2709_s21   ;;  %s2269_s26 = sphi %s2708_s26, %s1346_s26   ;;  %s2265_s18 = sphi %s2707_s18, %s1347_s18  }
 0x175   : >> { %1258 = vst [vmem:[%s2265_s18] sm:$0xf] %v1257_v54  ;;  %1260 = vst [vmem:[%s2265_s18 + $0x4] sm:$0xf] %v1259_v31  ;;  %v1263_v33 = vld [vmem:[%s2269_s26 + $0xc] sm:$0xf]  ;;  %s1341_s25 = sadd.s32 1, %s2273_s21 }
 0x176   : >> { %1262 = vst [vmem:[%s2265_s18 + $0x8] sm:$0xf] %v1261_v32  ;;  %v1265_v34 = vld [vmem:[%s2269_s26 + $0x10] sm:$0xf]  ;;  %v1267_v35 = vld [vmem:[%s2269_s26 + $0x14] sm:$0xf]  ;;  %p1342_p11 = scmp.ge.s32.totalorder %s1341_s25, %s2564_s23 }
 0x177   : >> { %1264 = vst [vmem:[%s2265_s18 + $0xc] sm:$0xf] %v1263_v33  ;;  %1266 = vst [vmem:[%s2265_s18 + $0x10] sm:$0xf] %v1265_v34  ;;  %v1269_v36 = vld [vmem:[%s2269_s26 + $0x18] sm:$0xf] }
 0x178   : >> { %1268 = vst [vmem:[%s2265_s18 + $0x14] sm:$0xf] %v1267_v35  ;;  %v1271_v37 = vld [vmem:[%s2269_s26 + $0x1c] sm:$0xf]  ;;  %v1273_v38 = vld [vmem:[%s2269_s26 + $0x20] sm:$0xf] }
 0x179   : >> { %1270 = vst [vmem:[%s2265_s18 + $0x18] sm:$0xf] %v1269_v36  ;;  %1272 = vst [vmem:[%s2265_s18 + $0x1c] sm:$0xf] %v1271_v37  ;;  %v1275_v39 = vld [vmem:[%s2269_s26 + $0x24] sm:$0xf] }
 0x17a   : >> { %1274 = vst [vmem:[%s2265_s18 + $0x20] sm:$0xf] %v1273_v38  ;;  %v1277_v40 = vld [vmem:[%s2269_s26 + $0x28] sm:$0xf]  ;;  %v1279_v41 = vld [vmem:[%s2269_s26 + $0x2c] sm:$0xf] }
 0x17b   : >> { %1276 = vst [vmem:[%s2265_s18 + $0x24] sm:$0xf] %v1275_v39  ;;  %1278 = vst [vmem:[%s2265_s18 + $0x28] sm:$0xf] %v1277_v40  ;;  %v1281_v42 = vld [vmem:[%s2269_s26 + $0x30] sm:$0xf] }
 0x17c   : >> { %1280 = vst [vmem:[%s2265_s18 + $0x2c] sm:$0xf] %v1279_v41  ;;  %v1283_v43 = vld [vmem:[%s2269_s26 + $0x34] sm:$0xf]  ;;  %v1285_v44 = vld [vmem:[%s2269_s26 + $0x38] sm:$0xf] }
 0x17d   : >> { %1282 = vst [vmem:[%s2265_s18 + $0x30] sm:$0xf] %v1281_v42  ;;  %1284 = vst [vmem:[%s2265_s18 + $0x34] sm:$0xf] %v1283_v43  ;;  %v1287_v45 = vld [vmem:[%s2269_s26 + $0x3c] sm:$0xf] }
 0x17e   : >> { %1286 = vst [vmem:[%s2265_s18 + $0x38] sm:$0xf] %v1285_v44  ;;  %v1289_v46 = vld [vmem:[%s2269_s26 + $0x40] sm:$0xf]  ;;  %v1291_v47 = vld [vmem:[%s2269_s26 + $0x44] sm:$0xf] }
 0x17f   : >> { %1288 = vst [vmem:[%s2265_s18 + $0x3c] sm:$0xf] %v1287_v45  ;;  %1290 = vst [vmem:[%s2265_s18 + $0x40] sm:$0xf] %v1289_v46  ;;  %v1293_v48 = vld [vmem:[%s2269_s26 + $0x48] sm:$0xf] }
 0x180   : >> { %1292 = vst [vmem:[%s2265_s18 + $0x44] sm:$0xf] %v1291_v47  ;;  %v1295_v49 = vld [vmem:[%s2269_s26 + $0x4c] sm:$0xf]  ;;  %v1297_v50 = vld [vmem:[%s2269_s26 + $0x50] sm:$0xf] }
 0x181   : >> { %1294 = vst [vmem:[%s2265_s18 + $0x48] sm:$0xf] %v1293_v48  ;;  %1296 = vst [vmem:[%s2265_s18 + $0x4c] sm:$0xf] %v1295_v49  ;;  %v1299_v51 = vld [vmem:[%s2269_s26 + $0x54] sm:$0xf] }
 0x182   : >> { %1298 = vst [vmem:[%s2265_s18 + $0x50] sm:$0xf] %v1297_v50  ;;  %v1301_v52 = vld [vmem:[%s2269_s26 + $0x58] sm:$0xf]  ;;  %v1303_v53 = vld [vmem:[%s2269_s26 + $0x5c] sm:$0xf] }
 0x183   : >> { %1300 = vst [vmem:[%s2265_s18 + $0x54] sm:$0xf] %v1299_v51  ;;  %1302 = vst [vmem:[%s2265_s18 + $0x58] sm:$0xf] %v1301_v52  ;;  %v1305_v55 = vld [vmem:[%s2269_s26 + $0x60] sm:$0xf] }
 0x184   : >> { %1304 = vst [vmem:[%s2265_s18 + $0x5c] sm:$0xf] %v1303_v53  ;;  %v1307_v56 = vld [vmem:[%s2269_s26 + $0x64] sm:$0xf]  ;;  %v1309_v57 = vld [vmem:[%s2269_s26 + $0x68] sm:$0xf] }
 0x185   : >> { %1306 = vst [vmem:[%s2265_s18 + $0x60] sm:$0xf] %v1305_v55  ;;  %1308 = vst [vmem:[%s2265_s18 + $0x64] sm:$0xf] %v1307_v56  ;;  %v1311_v58 = vld [vmem:[%s2269_s26 + $0x6c] sm:$0xf] }
 0x186   : >> { %1310 = vst [vmem:[%s2265_s18 + $0x68] sm:$0xf] %v1309_v57  ;;  %v1313_v59 = vld [vmem:[%s2269_s26 + $0x70] sm:$0xf]  ;;  %v1315_v60 = vld [vmem:[%s2269_s26 + $0x74] sm:$0xf] }
 0x187   : >> { %1312 = vst [vmem:[%s2265_s18 + $0x6c] sm:$0xf] %v1311_v58  ;;  %1314 = vst [vmem:[%s2265_s18 + $0x70] sm:$0xf] %v1313_v59  ;;  %v1317_v61 = vld [vmem:[%s2269_s26 + $0x78] sm:$0xf] }
 0x188   : >> { %1316 = vst [vmem:[%s2265_s18 + $0x74] sm:$0xf] %v1315_v60  ;;  %v1319_v62 = vld [vmem:[%s2269_s26 + $0x7c] sm:$0xf]  ;;  %v1321_v63 = vld [vmem:[%s2269_s26 + $0x80] sm:$0xf] }
 0x189   : >> { %1318 = vst [vmem:[%s2265_s18 + $0x78] sm:$0xf] %v1317_v61  ;;  %1320 = vst [vmem:[%s2265_s18 + $0x7c] sm:$0xf] %v1319_v62  ;;  %v1323_v0 = vld [vmem:[%s2269_s26 + $0x84] sm:$0xf] }
 0x18a   : >> { %1322 = vst [vmem:[%s2265_s18 + $0x80] sm:$0xf] %v1321_v63  ;;  %v1325_v1 = vld [vmem:[%s2269_s26 + $0x88] sm:$0xf]  ;;  %v1327_v2 = vld [vmem:[%s2269_s26 + $0x8c] sm:$0xf] }
 0x18b   : >> { %1324 = vst [vmem:[%s2265_s18 + $0x84] sm:$0xf] %v1323_v0  ;;  %1326 = vst [vmem:[%s2265_s18 + $0x88] sm:$0xf] %v1325_v1  ;;  %v1329_v3 = vld [vmem:[%s2269_s26 + $0x90] sm:$0xf] }
 0x18c   : >> { %1328 = vst [vmem:[%s2265_s18 + $0x8c] sm:$0xf] %v1327_v2  ;;  %v1331_v4 = vld [vmem:[%s2269_s26 + $0x94] sm:$0xf]  ;;  %v1333_v5 = vld [vmem:[%s2269_s26 + $0x98] sm:$0xf] }
 0x18d   : >> { %1330 = vst [vmem:[%s2265_s18 + $0x90] sm:$0xf] %v1329_v3  ;;  %1332 = vst [vmem:[%s2265_s18 + $0x94] sm:$0xf] %v1331_v4  ;;  %v1335_v6 = vld [vmem:[%s2269_s26 + $0x9c] sm:$0xf] }
 0x18e   : >> { %1334 = vst [vmem:[%s2265_s18 + $0x98] sm:$0xf] %v1333_v5  ;;  %v1337_v7 = vld [vmem:[%s2269_s26 + $0xa0] sm:$0xf]  ;;  %v1339_v8 = vld [vmem:[%s2269_s26 + $0xa4] sm:$0xf] }
 0x18f   : >> { %1336 = vst [vmem:[%s2265_s18 + $0x9c] sm:$0xf] %v1335_v6  ;;  %1338 = vst [vmem:[%s2265_s18 + $0xa0] sm:$0xf] %v1337_v7  ;;  %s2716_s25 = smov (%p1342_p11, %s1341_s25), 0  ;;  %s1251_s24 = sadd.s32 1, %s2277_s24  }
 0x190   : >> { %1340 = vst [vmem:[%s2265_s18 + $0xa4] sm:$0xf] %v1339_v8  ;;  %s1344_s27 = smul.u32 168, %s2716_s25  ;;  %p1250_p12 = scmp.ge.s32.totalorder %s1251_s24, %s2564_s23 }
 0x191   : >> { %s2709_s21 = smov %s2716_s25 }
 0x192   : >> { %s1346_s26 = scalar_lea.vmem %s2475_s15, %s1344_s27 [#allocation2]   ;;  %s1347_s18 = scalar_lea.vmem %s2558_s17, %s1344_s27  }
 0x193   : > { %1253 = sbr.rel (!%p1250_p12) target bundleno = 372 (0x174), region = 125 }
 0x19a PF: > { %2205 = sdivrem.u32 %s2714_s11, 42 }
 0x19b   : > { %s1742_s28 = smul.u32 168, %s2564_s23 }
 0x19d   : > { %s1352_s30 = scalar_lea.vmem %s2475_s15, %s1742_s28 [#allocation2]   ;;  %s1354_s5 = scalar_lea.vmem %s2558_s17, %s1742_s28  }
 0x1a3   : > { %s2206_s6 = spop.drf %2205 }
 0x1a4   : > { %p1744_p13 = scmp.le.s32.totalorder %s2206_s6, 0 }
 0x1a5   : > { %s2279_s7 = smov (!%p1744_p13), %s1354_s5   ;;  %s2283_s8 = smov (!%p1744_p13), %s1352_s30  }
 0x1a6   : > { %1579 = sbr.rel (%p1744_p13) target bundleno = 439 (0x1b7), region = 130  ;;  %s2287_s10 = smov (!%p1744_p13), 0  }
 0x1a7   : > { %s2291_s29 = smov (!%p1744_p13), 0  }
 0x1ad LB: >> { %v1364_v9 = vld [vmem:[%s2285_s8] sm:$0xf]  ;;  %s1366_s9 = sadd.s32 1, %s2289_s10  ;;  %s1358_s29 = sadd.s32 1, %s2293_s29   ;;  %s2293_s29 = sphi %s2291_s29, %s1358_s29   ;;  %s2289_s10 = sphi %s2287_s10, %s2288_s10   ;;  %s2285_s8 = sphi %s2283_s8, %s1371_s8   ;;  %s2281_s7 = sphi %s2279_s7, %s1372_s7  }
 0x1ae   : >> { %1365 = vst [vmem:[%s2281_s7] sm:$0xf] %v1364_v9  ;;  %p1367_p0 = scmp.ge.s32.totalorder %s1366_s9, %s2206_s6  ;;  %p1357_p1 = scmp.ge.s32.totalorder %s1358_s29, %s2206_s6 }
 0x1b0   : >> { %s2718_s9 = smov (%p1367_p0, %s1366_s9), 0  ;;  %1360 = sbr.rel (!%p1357_p1) target bundleno = 429 (0x1ad), region = 136 }
 0x1b1   : >> { %s1745_s15 = sshll.u32 %s2718_s9, 2  ;;  %s2288_s10 = smov %s2718_s9  }
 0x1b2   : >> { %s1371_s8 = scalar_lea.vmem %s1352_s30, %s1745_s15 [#allocation2]   ;;  %s1372_s7 = scalar_lea.vmem %s1354_s5, %s1745_s15  }
 0x1b7 PF: > { %p11_p2 = scmp.ge.s32.totalorder %s2336_s19, 4   ;;  %s2710_s15 = smov %s2257_s16 }
 0x1b8   : > { %s2711_s16 = smov %s2344_s22  ;;  %s2712_s17 = smov %s2336_s19 }
 0x1b9   :  { %13 = sbr.rel (!%p11_p2) target bundleno = 2 (0x2), region = 147 }

// kernel: resnet_forward.14
= control target key start
LH: loop header
LB: loop body
LE: loop exit
PB: predicated region body
PF: predicated region fallthrough
CT: control target
= control target key end

     0   :  { %v567_v0 = vmov 0.0   ;;  %vm568_vm0 = vmmov 0   ;;  %vm104_vm1 = vcmask 130048   ;;  %s706_s1 = inlined_call_operand.vmem [shape: bf16[16,128], index: 1, kind: input, shape index: {}]   ;;  %s707_s0 = inlined_call_operand.vmem [shape: bf16[162,16], index: 0, kind: input, shape index: {}]   ;;  %s708_s2 = inlined_call_operand.vmem [shape: f32[1,128], index: 2, kind: input, shape index: {}]   ;;  %s709_s3 = inlined_call_operand.vmem [shape: bf16[162,128], index: 3, kind: output, shape index: {}]  }
   0x1   :  { %505 = vmatprep.subr.bf16.mxu0 %v567_v0  ;;  %v555_v1 = vld [vmem:[%s706_s1] sm:$0xff]   ;;  %507 = vmatprep.mubr.msk.bf16.mxu0 %vm568_vm0, %v567_v0  ;;  %v557_v3 = vld [vmem:[%s707_s0 + $0x30] sm:$0xff]   ;;  %v558_v4 = vld [vmem:[%s707_s0 + $0x8] sm:$0xff]  }
   0x2   :  { %v556_v2 = vld [vmem:[%s707_s0] sm:$0xff]   ;;  %551 = vmatprep.subr.bf16.mxu1 %v567_v0  ;;  %531 = vmatprep.mubr.msk.bf16.mxu1 %vm568_vm0, %v567_v0  ;;  %v559_v5 = vld [vmem:[%s707_s0 + $0x38] sm:$0xff]   ;;  %v560_v6 = vld [vmem:[%s707_s0 + $0x10] sm:$0xff]  }
   0x3   :  { %506 = vmatpush3.bf16.msra.mxu0 %v555_v1  ;;  %552 = vmatpush3.bf16.msra.mxu1 %v555_v1  ;;  %v561_v7 = vld [vmem:[%s707_s0 + $0x40] sm:$0xff]   ;;  %v562_v8 = vld [vmem:[%s707_s0 + $0x18] sm:$0xff]   ;;  %v563_v9 = vld [vmem:[%s707_s0 + $0x48] sm:$0xff]  }
   0x4   :  { %v564_v10 = vld [vmem:[%s707_s0 + $0x20] sm:$0xff]   ;;  %v565_v11 = vld [vmem:[%s707_s0 + $0x50] ss:$0 sps:$4 sm:$0x11]   ;;  %v566_v12 = vld [vmem:[%s707_s0 + $0x28] sm:$0xff]  }
   0x5   :  { %v650_v13 = vld [vmem:[%s708_s2] ss:$0 sm:$0xff] }
   0x6   :  { %508 = vmatmul.mubr.msk.bf16.vlgmr.msra.gmra.mrb[0].mxu0 %vm104_vm1, %v556_v2  ;;  %532 = vmatmul.mubr.msk.bf16.vlgmr.msra.gmra.mrb[0].mxu1 %vm104_vm1, %v557_v3 }
   0x7   :  { %511 = vmatprep.mubr.msk.bf16.mxu0 %vm568_vm0, %v567_v0  ;;  %535 = vmatprep.mubr.msk.bf16.mxu1 %vm568_vm0, %v567_v0 }
   0xe   :  { %512 = vmatmul.mubr.msk.bf16.gmra.mrb[4].mxu0 %vm104_vm1, %v558_v4  ;;  %536 = vmatmul.mubr.msk.bf16.gmra.mrb[4].mxu1 %vm104_vm1, %v559_v5 }
   0xf   :  { %515 = vmatprep.mubr.msk.bf16.mxu0 %vm568_vm0, %v567_v0  ;;  %539 = vmatprep.mubr.msk.bf16.mxu1 %vm568_vm0, %v567_v0 }
  0x16   :  { %516 = vmatmul.mubr.msk.bf16.gmra.mrb[8].mxu0 %vm104_vm1, %v560_v6  ;;  %540 = vmatmul.mubr.msk.bf16.gmra.mrb[8].mxu1 %vm104_vm1, %v561_v7 }
  0x17   :  { %519 = vmatprep.mubr.msk.bf16.mxu0 %vm568_vm0, %v567_v0  ;;  %543 = vmatprep.mubr.msk.bf16.mxu1 %vm568_vm0, %v567_v0 }
  0x1e   :  { %520 = vmatmul.mubr.msk.bf16.gmra.mrb[12].mxu0 %vm104_vm1, %v562_v8  ;;  %544 = vmatmul.mubr.msk.bf16.gmra.mrb[12].mxu1 %vm104_vm1, %v563_v9 }
  0x1f   :  { %523 = vmatprep.mubr.msk.bf16.mxu0 %vm568_vm0, %v567_v0  ;;  %547 = vmatprep.mubr.msk.bf16.mxu1 %vm568_vm0, %v567_v0 }
  0x26   :  { %524 = vmatmul.mubr.msk.bf16.gmra.mrb[16].mxu0 %vm104_vm1, %v564_v10  ;;  %548 = vmatmul.mubr.msk.bf16.gmra.mrb[16].mxu1 %vm104_vm1, %v565_v11 }
  0x27   :  { %527 = vmatprep.mubr.msk.bf16.mxu0 %vm568_vm0, %v567_v0 }
  0x2e   :  { %528 = vmatmul.mubr.msk.bf16.gmra.mrb[20].mxu0 %vm104_vm1, %v566_v12 }
  0xd9   :  { %v172_v14 = vpop.f32.mrb[0].mxu0  ;;  %v220_v15 = vpop.f32.mrb[0].mxu1 }
  0xda   :  { %v509_v16 = vpop.f32.mrb[1].mxu0  ;;  %v221_v17 = vadd.f32 %v650_v13, %v220_v15  ;;  %v533_v18 = vpop.f32.mrb[1].mxu1  ;;  %v173_v21 = vadd.f32 %v650_v13, %v172_v14 }
  0xdb   :  { %v175_v19 = vpop.f32.mrb[2].mxu0  ;;  %v223_v20 = vpop.f32.mrb[2].mxu1 }
  0xdc   :  { %v176_v22 = vadd.f32 %v650_v13, %v175_v19  ;;  %v510_v23 = vpop.f32.mrb[3].mxu0  ;;  %v224_v24 = vadd.f32 %v650_v13, %v223_v20  ;;  %v534_v25 = vpop.f32.mrb[3].mxu1 }
  0xde   :  { %v437_v26 = vpack.c.bf16 %v176_v22, %v173_v21  ;;  %v467_v27 = vpack.c.bf16 %v224_v24, %v221_v17 }
  0xe0   :  { %438 = vst [vmem:[%s709_s3] sm:$0xff] %v437_v26   ;;  %489 = vst [vmem:[%s709_s3 + $0x30] sm:$0xff] %v467_v27  }
  0xe1   :  { %v180_v28 = vpop.f32.mrb[4].mxu0  ;;  %v228_v29 = vpop.f32.mrb[4].mxu1 }
  0xe2   :  { %v513_v30 = vpop.f32.mrb[5].mxu0  ;;  %v229_v31 = vadd.f32 %v650_v13, %v228_v29  ;;  %v537_v32 = vpop.f32.mrb[5].mxu1  ;;  %v181_v35 = vadd.f32 %v650_v13, %v180_v28 }
  0xe3   :  { %v183_v33 = vpop.f32.mrb[6].mxu0  ;;  %v231_v34 = vpop.f32.mrb[6].mxu1 }
  0xe4   :  { %v184_v36 = vadd.f32 %v650_v13, %v183_v33  ;;  %v514_v37 = vpop.f32.mrb[7].mxu0  ;;  %v232_v38 = vadd.f32 %v650_v13, %v231_v34  ;;  %v538_v39 = vpop.f32.mrb[7].mxu1 }
  0xe6   :  { %v442_v40 = vpack.c.bf16 %v184_v36, %v181_v35  ;;  %v472_v41 = vpack.c.bf16 %v232_v38, %v229_v31 }
  0xe8   :  { %484 = vst [vmem:[%s709_s3 + $0x8] sm:$0xff] %v442_v40   ;;  %490 = vst [vmem:[%s709_s3 + $0x38] sm:$0xff] %v472_v41  }
  0xe9   :  { %v188_v42 = vpop.f32.mrb[8].mxu0  ;;  %v236_v43 = vpop.f32.mrb[8].mxu1 }
  0xea   :  { %v517_v44 = vpop.f32.mrb[9].mxu0  ;;  %v237_v45 = vadd.f32 %v650_v13, %v236_v43  ;;  %v541_v46 = vpop.f32.mrb[9].mxu1  ;;  %v189_v49 = vadd.f32 %v650_v13, %v188_v42 }
  0xeb   :  { %v191_v47 = vpop.f32.mrb[10].mxu0  ;;  %v239_v48 = vpop.f32.mrb[10].mxu1 }
  0xec   :  { %v192_v50 = vadd.f32 %v650_v13, %v191_v47  ;;  %v518_v51 = vpop.f32.mrb[11].mxu0  ;;  %v240_v52 = vadd.f32 %v650_v13, %v239_v48  ;;  %v542_v53 = vpop.f32.mrb[11].mxu1 }
  0xee   :  { %v447_v54 = vpack.c.bf16 %v192_v50, %v189_v49  ;;  %v477_v55 = vpack.c.bf16 %v240_v52, %v237_v45 }
  0xf0   :  { %485 = vst [vmem:[%s709_s3 + $0x10] sm:$0xff] %v447_v54   ;;  %491 = vst [vmem:[%s709_s3 + $0x40] sm:$0xff] %v477_v55  }
  0xf1   :  { %v196_v56 = vpop.f32.mrb[12].mxu0  ;;  %v244_v57 = vpop.f32.mrb[12].mxu1 }
  0xf2   :  { %v521_v58 = vpop.f32.mrb[13].mxu0  ;;  %v245_v59 = vadd.f32 %v650_v13, %v244_v57  ;;  %v545_v60 = vpop.f32.mrb[13].mxu1  ;;  %v197_v63 = vadd.f32 %v650_v13, %v196_v56 }
  0xf3   :  { %v199_v61 = vpop.f32.mrb[14].mxu0  ;;  %v247_v62 = vpop.f32.mrb[14].mxu1 }
  0xf4   :  { %v200_v0 = vadd.f32 %v650_v13, %v199_v61  ;;  %v522_v1 = vpop.f32.mrb[15].mxu0  ;;  %v248_v2 = vadd.f32 %v650_v13, %v247_v62  ;;  %v546_v3 = vpop.f32.mrb[15].mxu1 }
  0xf6   :  { %v452_v4 = vpack.c.bf16 %v200_v0, %v197_v63  ;;  %v482_v5 = vpack.c.bf16 %v248_v2, %v245_v59 }
  0xf8   :  { %486 = vst [vmem:[%s709_s3 + $0x18] sm:$0xff] %v452_v4   ;;  %492 = vst [vmem:[%s709_s3 + $0x48] sm:$0xff] %v482_v5  }
  0xf9   :  { %v204_v6 = vpop.f32.mrb[16].mxu0  ;;  %v252_v7 = vpop.f32.mrb[16].mxu1 }
  0xfa   :  { %v525_v8 = vpop.f32.mrb[17].mxu0  ;;  %v253_v9 = vadd.f32 %v650_v13, %v252_v7  ;;  %v549_v10 = vpop.f32.mrb[17].mxu1  ;;  %v205_v14 = vadd.f32 %v650_v13, %v204_v6 }
  0xfb   :  { %v207_v11 = vpop.f32.mrb[18].mxu0  ;;  %v255_v12 = vpop.f32.mrb[18].mxu1 }
  0xfc   :  { %v208_v15 = vadd.f32 %v650_v13, %v207_v11  ;;  %v526_v16 = vpop.f32.mrb[19].mxu0  ;;  %v433_v17 = vpack.c.bf16 %v253_v9, %v253_v9  ;;  %v550_v18 = vpop.f32.mrb[19].mxu1 }
  0xfe   :  { %v457_v19 = vpack.c.bf16 %v208_v15, %v205_v14  ;;  %363 = vst [vmem:[%s709_s3 + $0x50] sm:$0x1] %v433_v17 }
 0x100   :  { %487 = vst [vmem:[%s709_s3 + $0x20] sm:$0xff] %v457_v19  }
 0x101   :  { %v212_v20 = vpop.f32.mrb[20].mxu0 }
 0x102   :  { %v529_v21 = vpop.f32.mrb[21].mxu0  ;;  %v213_v23 = vadd.f32 %v650_v13, %v212_v20 }
 0x103   :  { %v215_v22 = vpop.f32.mrb[22].mxu0 }
 0x104   :  { %v216_v24 = vadd.f32 %v650_v13, %v215_v22  ;;  %v530_v25 = vpop.f32.mrb[23].mxu0 }
 0x106   :  { %v462_v26 = vpack.c.bf16 %v216_v24, %v213_v23 }
 0x108   :  { %488 = vst [vmem:[%s709_s3 + $0x28] sm:$0xff] %v462_v26  }

// kernel: resnet_forward.13
= control target key start
LH: loop header
LB: loop body
LE: loop exit
PB: predicated region body
PF: predicated region fallthrough
CT: control target
= control target key end

     0   :  { %v700_v0 = vmov 0   ;;  %vm211_vm0 = vcmask 130048   ;;  %s881_s1 = inlined_call_operand.vmem [shape: bf16[144,128], index: 1, kind: input, shape index: {}]   ;;  %s882_s0 = inlined_call_operand.vmem [shape: bf16[162,144], index: 0, kind: input, shape index: {}]   ;;  %s883_s2 = inlined_call_operand.vmem [shape: f32[1,128], index: 2, kind: input, shape index: {}]   ;;  %s884_s3 = inlined_call_operand.vmem [shape: bf16[162,128], index: 3, kind: output, shape index: {}]  }
   0x1   :  { %245 = vmatprep.subr.bf16.mxu0 %v700_v0  ;;  %v659_v1 = vld [vmem:[%s881_s1] sm:$0xff]   ;;  %640 = vmatprep.subr.bf16.mxu1 %v700_v0  ;;  %v660_v2 = vld [vmem:[%s881_s1 + $0x8] sm:$0xff]   ;;  %v661_v3 = vld [vmem:[%s881_s1 + $0x10] sm:$0xff]  }
   0x2   :  { %246 = vmatpush1.bf16.msra.mxu0 %v659_v1  ;;  %649 = vmatpush1.bf16.msra.mxu1 %v659_v1  ;;  %v662_v4 = vld [vmem:[%s881_s1 + $0x18] sm:$0xff]   ;;  %v670_v5 = vld [vmem:[%s882_s0 + $0x4] ss:$8 sps:$4 sm:$0xff]   ;;  %v665_v9 = vld [vmem:[%s881_s1 + $0x30] sm:$0xff]  }
   0x3   :  { %247 = vmatprep.subr.bf16.mxu0 %v700_v0  ;;  %641 = vmatprep.subr.bf16.mxu1 %v700_v0  ;;  %v673_v6 = vld [vmem:[%s882_s0 + $0x64] ss:$8 sps:$4 sm:$0xff]   ;;  %v666_v10 = vld [vmem:[%s881_s1 + $0x38] sm:$0xff]   ;;  %v668_v12 = vld [vmem:[%s882_s0] ss:$8 sps:$4 sm:$0xff]  }
   0x4   :  { %528 = vmatprep.mubr.msk.bf16.mxu0 %vm211_vm0, %v670_v5  ;;  %534 = vmatprep.mubr.msk.bf16.mxu1 %vm211_vm0, %v673_v6  ;;  %v663_v7 = vld [vmem:[%s881_s1 + $0x20] sm:$0xff]   ;;  %v664_v8 = vld [vmem:[%s881_s1 + $0x28] sm:$0xff]   ;;  %v674_v14 = vld [vmem:[%s882_s0 + $0x14] ss:$8 sps:$4 sm:$0xff]  }
   0x5   :  { %v667_v11 = vld [vmem:[%s881_s1 + $0x40] sm:$0xff]   ;;  %v677_v15 = vld [vmem:[%s882_s0 + $0x74] ss:$8 sps:$4 sm:$0xff]   ;;  %v676_v16 = vld [vmem:[%s882_s0 + $0x10] ss:$8 sps:$4 sm:$0xff]  }
   0x6   :  { %248 = vmatpush1.bf16.msra.mxu0 %v660_v2  ;;  %650 = vmatpush1.bf16.msra.mxu1 %v660_v2  ;;  %v671_v13 = vld [vmem:[%s882_s0 + $0x60] ss:$8 sps:$4 sm:$0xff]   ;;  %v681_v17 = vld [vmem:[%s882_s0 + $0x70] ss:$8 sps:$4 sm:$0xff]   ;;  %v679_v18 = vld [vmem:[%s882_s0 + $0x24] ss:$8 sps:$4 sm:$0xff]  }
   0x7   :  { %249 = vmatprep.subr.bf16.mxu0 %v700_v0  ;;  %642 = vmatprep.subr.bf16.mxu1 %v700_v0  ;;  %v683_v19 = vld [vmem:[%s882_s0 + $0x84] ss:$8 sps:$4 sm:$0xff]   ;;  %v682_v20 = vld [vmem:[%s882_s0 + $0x20] ss:$8 sps:$4 sm:$0xff]   ;;  %v685_v22 = vld [vmem:[%s882_s0 + $0x34] ss:$8 sps:$4 sm:$0xff]  }
   0x8   :  { %v687_v21 = vld [vmem:[%s882_s0 + $0x80] ss:$8 sps:$4 sm:$0xff]   ;;  %v689_v23 = vld [vmem:[%s882_s0 + $0x94] ss:$8 sps:$4 sm:$0xff]   ;;  %v688_v25 = vld [vmem:[%s882_s0 + $0x30] ss:$8 sps:$4 sm:$0xff]  }
   0x9   :  { %v35_v24 = vld [vmem:[%s882_s0 + $0xa0] sm:$0x11]  ;;  %v693_v26 = vld [vmem:[%s882_s0 + $0x90] ss:$8 sps:$4 sm:$0xff]   ;;  %v696_v31 = vld [vmem:[%s882_s0 + $0x54] ss:$8 sps:$4 sm:$0xff]  }
   0xa   :  { %250 = vmatpush1.bf16.msra.mxu0 %v661_v3  ;;  %651 = vmatpush1.bf16.msra.mxu1 %v661_v3  ;;  %v691_v27 = vld [vmem:[%s882_s0 + $0x44] ss:$8 sps:$4 sm:$0xff]   ;;  %v518_v28 = vcombine.high %v35_v24, %v35_v24  ;;  %v694_v29 = vld [vmem:[%s882_s0 + $0x40] ss:$8 sps:$4 sm:$0xff]   ;;  %v517_v30 = vcombine.low %v35_v24, %v35_v24  ;;  %v699_v32 = vld [vmem:[%s882_s0 + $0x50] ss:$8 sps:$4 sm:$0xff]  }
   0xb   :  { %251 = vmatprep.subr.bf16.mxu0 %v700_v0  ;;  %643 = vmatprep.subr.bf16.mxu1 %v700_v0  ;;  %v825_v33 = vld [vmem:[%s883_s2] ss:$0 sm:$0xff] }
   0xe   :  { %252 = vmatpush1.bf16.msra.mxu0 %v662_v4  ;;  %652 = vmatpush1.bf16.msra.mxu1 %v662_v4 }
   0xf   :  { %253 = vmatprep.subr.bf16.mxu0 %v700_v0  ;;  %644 = vmatprep.subr.bf16.mxu1 %v700_v0 }
  0x12   :  { %254 = vmatpush1.bf16.msra.mxu0 %v663_v7  ;;  %653 = vmatpush1.bf16.msra.mxu1 %v663_v7 }
  0x13   :  { %255 = vmatprep.subr.bf16.mxu0 %v700_v0  ;;  %645 = vmatprep.subr.bf16.mxu1 %v700_v0 }
  0x16   :  { %256 = vmatpush1.bf16.msra.mxu0 %v664_v8  ;;  %654 = vmatpush1.bf16.msra.mxu1 %v664_v8 }
  0x17   :  { %257 = vmatprep.subr.bf16.mxu0 %v700_v0  ;;  %646 = vmatprep.subr.bf16.mxu1 %v700_v0 }
  0x1a   :  { %258 = vmatpush1.bf16.msra.mxu0 %v665_v9  ;;  %655 = vmatpush1.bf16.msra.mxu1 %v665_v9 }
  0x1b   :  { %259 = vmatprep.subr.bf16.mxu0 %v700_v0  ;;  %647 = vmatprep.subr.bf16.mxu1 %v700_v0 }
  0x1e   :  { %260 = vmatpush1.bf16.msra.mxu0 %v666_v10  ;;  %656 = vmatpush1.bf16.msra.mxu1 %v666_v10 }
  0x1f   :  { %261 = vmatprep.subr.bf16.mxu0 %v700_v0  ;;  %648 = vmatprep.subr.bf16.mxu1 %v700_v0 }
  0x22   :  { %262 = vmatpush1.bf16.msra.mxu0 %v667_v11  ;;  %657 = vmatpush1.bf16.msra.mxu1 %v667_v11 }
  0x25   :  { %278 = vmatmul.mubr.bf16.vlgmr.msra.gmra.mrb[0].mxu0 %v668_v12  ;;  %326 = vmatmul.mubr.bf16.vlgmr.msra.gmra.mrb[0].mxu1 %v671_v13 }
  0x26   :  { %529 = vmatprep.mubr.msk.bf16.mxu0 %vm211_vm0, %v674_v14  ;;  %535 = vmatprep.mubr.msk.bf16.mxu1 %vm211_vm0, %v677_v15 }
  0x2d   :  { %286 = vmatmul.mubr.bf16.gmra.mrb[4].mxu0 %v676_v16  ;;  %334 = vmatmul.mubr.bf16.gmra.mrb[4].mxu1 %v681_v17 }
  0x2e   :  { %530 = vmatprep.mubr.msk.bf16.mxu0 %vm211_vm0, %v679_v18  ;;  %536 = vmatprep.mubr.msk.bf16.mxu1 %vm211_vm0, %v683_v19 }
  0x35   :  { %294 = vmatmul.mubr.bf16.gmra.mrb[8].mxu0 %v682_v20  ;;  %342 = vmatmul.mubr.bf16.gmra.mrb[8].mxu1 %v687_v21 }
  0x36   :  { %531 = vmatprep.mubr.msk.bf16.mxu0 %vm211_vm0, %v685_v22  ;;  %537 = vmatprep.mubr.msk.bf16.mxu1 %vm211_vm0, %v689_v23 }
  0x3d   :  { %302 = vmatmul.mubr.bf16.gmra.mrb[12].mxu0 %v688_v25  ;;  %350 = vmatmul.mubr.bf16.gmra.mrb[12].mxu1 %v693_v26 }
  0x3e   :  { %532 = vmatprep.mubr.msk.bf16.mxu0 %vm211_vm0, %v691_v27  ;;  %538 = vmatprep.mubr.msk.bf16.mxu1 %vm211_vm0, %v518_v28 }
  0x45   :  { %310 = vmatmul.mubr.bf16.gmra.mrb[16].mxu0 %v694_v29  ;;  %358 = vmatmul.mubr.bf16.gmra.mrb[16].mxu1 %v517_v30 }
  0x46   :  { %533 = vmatprep.mubr.msk.bf16.mxu0 %vm211_vm0, %v696_v31 }
  0x4d   :  { %318 = vmatmul.mubr.bf16.gmra.mrb[20].mxu0 %v699_v32 }
  0xf8   :  { %v279_v34 = vpop.f32.mrb[0].mxu0  ;;  %v327_v35 = vpop.f32.mrb[0].mxu1 }
  0xf9   :  { %v280_v36 = vadd.f32 %v825_v33, %v279_v34  ;;  %v281_v37 = vpop.f32.mrb[1].mxu0  ;;  %v328_v38 = vadd.f32 %v825_v33, %v327_v35  ;;  %v329_v39 = vpop.f32.mrb[1].mxu1 }
  0xfa   :  { %v282_v40 = vpop.f32.mrb[2].mxu0  ;;  %v330_v41 = vpop.f32.mrb[2].mxu1 }
  0xfb   :  { %v283_v42 = vadd.f32 %v825_v33, %v282_v40  ;;  %v284_v43 = vpop.f32.mrb[3].mxu0  ;;  %v377_v44 = vmax.f32 %v328_v38, 0.0  ;;  %v331_v45 = vadd.f32 %v825_v33, %v330_v41  ;;  %v332_v46 = vpop.f32.mrb[3].mxu1  ;;  %v365_v47 = vmax.f32 %v280_v36, 0.0 }
  0xfd   :  { %v366_v48 = vmax.f32 %v283_v42, 0.0  ;;  %v378_v49 = vmax.f32 %v331_v45, 0.0 }
  0xff   :  { %v584_v50 = vpack.c.bf16 %v366_v48, %v365_v47  ;;  %v614_v51 = vpack.c.bf16 %v378_v49, %v377_v44 }
 0x100   :  { %v287_v52 = vpop.f32.mrb[4].mxu0  ;;  %v335_v53 = vpop.f32.mrb[4].mxu1 }
 0x101   :  { %585 = vst [vmem:[%s884_s3] sm:$0xff] %v584_v50   ;;  %v288_v54 = vadd.f32 %v825_v33, %v287_v52  ;;  %v289_v55 = vpop.f32.mrb[5].mxu0  ;;  %636 = vst [vmem:[%s884_s3 + $0x30] sm:$0xff] %v614_v51   ;;  %v336_v56 = vadd.f32 %v825_v33, %v335_v53  ;;  %v337_v57 = vpop.f32.mrb[5].mxu1 }
 0x102   :  { %v290_v58 = vpop.f32.mrb[6].mxu0  ;;  %v338_v59 = vpop.f32.mrb[6].mxu1 }
 0x103   :  { %v291_v60 = vadd.f32 %v825_v33, %v290_v58  ;;  %v292_v61 = vpop.f32.mrb[7].mxu0  ;;  %v379_v62 = vmax.f32 %v336_v56, 0.0  ;;  %v339_v63 = vadd.f32 %v825_v33, %v338_v59  ;;  %v340_v0 = vpop.f32.mrb[7].mxu1  ;;  %v367_v1 = vmax.f32 %v288_v54, 0.0 }
 0x105   :  { %v368_v2 = vmax.f32 %v291_v60, 0.0  ;;  %v380_v3 = vmax.f32 %v339_v63, 0.0 }
 0x107   :  { %v589_v4 = vpack.c.bf16 %v368_v2, %v367_v1  ;;  %v619_v5 = vpack.c.bf16 %v380_v3, %v379_v62 }
 0x108   :  { %v295_v6 = vpop.f32.mrb[8].mxu0  ;;  %v343_v7 = vpop.f32.mrb[8].mxu1 }
 0x109   :  { %631 = vst [vmem:[%s884_s3 + $0x8] sm:$0xff] %v589_v4   ;;  %v296_v8 = vadd.f32 %v825_v33, %v295_v6  ;;  %v297_v9 = vpop.f32.mrb[9].mxu0  ;;  %637 = vst [vmem:[%s884_s3 + $0x38] sm:$0xff] %v619_v5   ;;  %v344_v10 = vadd.f32 %v825_v33, %v343_v7  ;;  %v345_v11 = vpop.f32.mrb[9].mxu1 }
 0x10a   :  { %v298_v12 = vpop.f32.mrb[10].mxu0  ;;  %v346_v13 = vpop.f32.mrb[10].mxu1 }
 0x10b   :  { %v299_v14 = vadd.f32 %v825_v33, %v298_v12  ;;  %v300_v15 = vpop.f32.mrb[11].mxu0  ;;  %v381_v16 = vmax.f32 %v344_v10, 0.0  ;;  %v347_v17 = vadd.f32 %v825_v33, %v346_v13  ;;  %v348_v18 = vpop.f32.mrb[11].mxu1  ;;  %v369_v19 = vmax.f32 %v296_v8, 0.0 }
 0x10d   :  { %v370_v20 = vmax.f32 %v299_v14, 0.0  ;;  %v382_v21 = vmax.f32 %v347_v17, 0.0 }
 0x10f   :  { %v594_v22 = vpack.c.bf16 %v370_v20, %v369_v19  ;;  %v624_v23 = vpack.c.bf16 %v382_v21, %v381_v16 }
 0x110   :  { %v303_v24 = vpop.f32.mrb[12].mxu0  ;;  %v351_v25 = vpop.f32.mrb[12].mxu1 }
 0x111   :  { %632 = vst [vmem:[%s884_s3 + $0x10] sm:$0xff] %v594_v22   ;;  %v304_v26 = vadd.f32 %v825_v33, %v303_v24  ;;  %v305_v27 = vpop.f32.mrb[13].mxu0  ;;  %638 = vst [vmem:[%s884_s3 + $0x40] sm:$0xff] %v624_v23   ;;  %v352_v28 = vadd.f32 %v825_v33, %v351_v25  ;;  %v353_v29 = vpop.f32.mrb[13].mxu1 }
 0x112   :  { %v306_v30 = vpop.f32.mrb[14].mxu0  ;;  %v354_v31 = vpop.f32.mrb[14].mxu1 }
 0x113   :  { %v307_v32 = vadd.f32 %v825_v33, %v306_v30  ;;  %v308_v34 = vpop.f32.mrb[15].mxu0  ;;  %v383_v35 = vmax.f32 %v352_v28, 0.0  ;;  %v355_v36 = vadd.f32 %v825_v33, %v354_v31  ;;  %v356_v37 = vpop.f32.mrb[15].mxu1  ;;  %v371_v38 = vmax.f32 %v304_v26, 0.0 }
 0x115   :  { %v372_v39 = vmax.f32 %v307_v32, 0.0  ;;  %v384_v40 = vmax.f32 %v355_v36, 0.0 }
 0x117   :  { %v599_v41 = vpack.c.bf16 %v372_v39, %v371_v38  ;;  %v629_v42 = vpack.c.bf16 %v384_v40, %v383_v35 }
 0x118   :  { %v311_v43 = vpop.f32.mrb[16].mxu0  ;;  %v359_v44 = vpop.f32.mrb[16].mxu1 }
 0x119   :  { %633 = vst [vmem:[%s884_s3 + $0x18] sm:$0xff] %v599_v41   ;;  %v312_v45 = vadd.f32 %v825_v33, %v311_v43  ;;  %v313_v46 = vpop.f32.mrb[17].mxu0  ;;  %639 = vst [vmem:[%s884_s3 + $0x48] sm:$0xff] %v629_v42   ;;  %v360_v47 = vadd.f32 %v825_v33, %v359_v44  ;;  %v361_v48 = vpop.f32.mrb[17].mxu1 }
 0x11a   :  { %v314_v49 = vpop.f32.mrb[18].mxu0  ;;  %v362_v50 = vpop.f32.mrb[18].mxu1 }
 0x11b   :  { %v315_v51 = vadd.f32 %v825_v33, %v314_v49  ;;  %v316_v52 = vpop.f32.mrb[19].mxu0  ;;  %v385_v53 = vmax.f32 %v360_v47, 0.0  ;;  %v363_v54 = vpop.f32.mrb[19].mxu1  ;;  %v373_v55 = vmax.f32 %v312_v45, 0.0 }
 0x11d   :  { %v374_v56 = vmax.f32 %v315_v51, 0.0  ;;  %v580_v57 = vpack.c.bf16 %v385_v53, %v385_v53 }
 0x11f   :  { %v604_v58 = vpack.c.bf16 %v374_v56, %v373_v55  ;;  %491 = vst [vmem:[%s884_s3 + $0x50] sm:$0x1] %v580_v57 }
 0x120   :  { %v319_v59 = vpop.f32.mrb[20].mxu0 }
 0x121   :  { %634 = vst [vmem:[%s884_s3 + $0x20] sm:$0xff] %v604_v58   ;;  %v320_v60 = vadd.f32 %v825_v33, %v319_v59  ;;  %v321_v61 = vpop.f32.mrb[21].mxu0 }
 0x122   :  { %v322_v62 = vpop.f32.mrb[22].mxu0 }
 0x123   :  { %v323_v63 = vadd.f32 %v825_v33, %v322_v62  ;;  %v324_v0 = vpop.f32.mrb[23].mxu0  ;;  %v375_v1 = vmax.f32 %v320_v60, 0.0 }
 0x125   :  { %v376_v2 = vmax.f32 %v323_v63, 0.0 }
 0x127   :  { %v609_v3 = vpack.c.bf16 %v376_v2, %v375_v1 }
 0x129   :  { %635 = vst [vmem:[%s884_s3 + $0x28] sm:$0xff] %v609_v3  }

// kernel: resnet_forward.17
= control target key start
LH: loop header
LB: loop body
LE: loop exit
PB: predicated region body
PF: predicated region fallthrough
CT: control target
= control target key end

     0   :  { %vm63_vm0 = vcmask 261120   ;;  %s303_s1 = inlined_call_operand.vmem [shape: bf16[32,128], index: 1, kind: input, shape index: {}]   ;;  %s304_s0 = inlined_call_operand.vmem [shape: bf16[50,32], index: 0, kind: input, shape index: {}]   ;;  %s305_s2 = inlined_call_operand.vmem [shape: f32[1,128], index: 2, kind: input, shape index: {}]   ;;  %s306_s3 = inlined_call_operand.vmem [shape: bf16[50,128], index: 3, kind: output, shape index: {}]  }
   0x1   :  { %v244_v0 = vld [vmem:[%s303_s1] sm:$0xff]   ;;  %v245_v1 = vld [vmem:[%s303_s1 + $0x8] sm:$0xff]   ;;  %v247_v3 = vld [vmem:[%s304_s0 + $0x10] sm:$0xff]  }
   0x2   :  { %228 = vmatprep.subr.bf16.mxu0 %v244_v0  ;;  %240 = vmatprep.subr.bf16.mxu1 %v244_v0  ;;  %v246_v2 = vld [vmem:[%s304_s0] sm:$0xff]   ;;  %v248_v4 = vld [vmem:[%s304_s0 + $0x8] sm:$0xff]   ;;  %v249_v5 = vld [vmem:[%s304_s0 + $0x18] ss:$0 sps:$4 sm:$0x11]  }
   0x3   :  { %229 = vmatpush3.bf16.msra.mxu0 %v244_v0  ;;  %242 = vmatpush3.bf16.msra.mxu1 %v244_v0  ;;  %v180_v6 = vld [vmem:[%s305_s2] ss:$0 sm:$0xff] }
   0x4   :  { %230 = vmatprep.subr.bf16.mxu0 %v245_v1  ;;  %241 = vmatprep.subr.bf16.mxu1 %v245_v1 }
   0x5   :  { %232 = vmatprep.mubr.msk.bf16.mxu0 %vm63_vm0, %v246_v2  ;;  %236 = vmatprep.mubr.msk.bf16.mxu1 %vm63_vm0, %v247_v3 }
   0x7   :  { %231 = vmatpush3.bf16.msra.mxu0 %v245_v1  ;;  %243 = vmatpush3.bf16.msra.mxu1 %v245_v1 }
   0xa   :  { %233 = vmatmul.mubr.msk.bf16.vlgmr.msra.gmra.mrb[0].mxu0 %vm63_vm0, %v248_v4  ;;  %237 = vmatmul.mubr.msk.bf16.vlgmr.msra.gmra.mrb[0].mxu1 %vm63_vm0, %v249_v5 }
  0xdd   :  { %v234_v7 = vpop.f32.mrb[0].mxu0  ;;  %v238_v8 = vpop.f32.mrb[0].mxu1 }
  0xde   :  { %v135_v9 = vadd.f32 %v238_v8, %v180_v6  ;;  %v110_v10 = vpop.f32.mrb[1].mxu0  ;;  %v126_v11 = vpop.f32.mrb[1].mxu1  ;;  %v119_v14 = vadd.f32 %v234_v7, %v180_v6 }
  0xdf   :  { %v235_v12 = vpop.f32.mrb[2].mxu0  ;;  %v239_v13 = vpop.f32.mrb[2].mxu1  ;;  %v111_v19 = vadd.f32 %v180_v6, %v110_v10  ;;  %v127_v20 = vadd.f32 %v180_v6, %v126_v11 }
  0xe0   :  { %v204_v15 = vpack.c.bf16 %v135_v9, %v135_v9  ;;  %v122_v16 = vadd.f32 %v235_v12, %v180_v6  ;;  %v113_v17 = vpop.f32.mrb[3].mxu0  ;;  %v129_v18 = vpop.f32.mrb[3].mxu1 }
  0xe1   :  { %v114_v21 = vadd.f32 %v180_v6, %v113_v17  ;;  %v130_v22 = vadd.f32 %v180_v6, %v129_v18 }
  0xe2   :  { %175 = vst [vmem:[%s306_s3 + $0x18] sm:$0x1] %v204_v15  ;;  %v213_v23 = vpack.c.bf16 %v122_v16, %v119_v14 }
  0xe3   :  { %v208_v24 = vpack.c.bf16 %v114_v21, %v111_v19  ;;  %v218_v25 = vpack.c.bf16 %v130_v22, %v127_v20 }
  0xe4   :  { %220 = vst [vmem:[%s306_s3 + $0x8] sm:$0xff] %v213_v23  }
  0xe5   :  { %209 = vst [vmem:[%s306_s3] sm:$0xff] %v208_v24   ;;  %221 = vst [vmem:[%s306_s3 + $0x10] sm:$0xff] %v218_v25  }

// kernel: resnet_forward.15
= control target key start
LH: loop header
LB: loop body
LE: loop exit
PB: predicated region body
PF: predicated region fallthrough
CT: control target
= control target key end

     0   :  { %v1258_v1 = vmov 0.0   ;;  %vm1259_vm0 = vmmov 0   ;;  %vm371_vm1 = vcmask 261120   ;;  %s1562_s1 = inlined_call_operand.vmem [shape: bf16[288,128], index: 1, kind: input, shape index: {}]   ;;  %s1563_s0 = inlined_call_operand.vmem [shape: bf16[162,288], index: 0, kind: input, shape index: {}]   ;;  %s1564_s2 = inlined_call_operand.vmem [shape: f32[1,128], index: 2, kind: input, shape index: {}]   ;;  %s1565_s3 = inlined_call_operand.vmem [shape: bf16[162,128], index: 3, kind: input, shape index: {}]   ;;  %s1566_s4 = inlined_call_operand.vmem [shape: bf16[162,128], index: 4, kind: output, shape index: {}]  }
   0x1   :  { %v1197_v0 = vld [vmem:[%s1562_s1 + $0x40] sm:$0xff]   ;;  %1147 = vmatprep.subr.bf16.mxu1 %v1258_v1  ;;  %1151 = vmatprep.mubr.msk.bf16.mxu1 %vm1259_vm0, %v1258_v1  ;;  %v1199_v3 = vld [vmem:[%s1562_s1 + $0x48] sm:$0xff]   ;;  %v1201_v5 = vld [vmem:[%s1562_s1 + $0x50] sm:$0xff]  }
   0x2   :  { %v1198_v2 = vld [vmem:[%s1562_s1] sm:$0xff]   ;;  %1052 = vmatprep.subr.bf16.mxu0 %v1197_v0  ;;  %v1200_v4 = vld [vmem:[%s1562_s1 + $0x8] sm:$0xff]   ;;  %v1202_v6 = vld [vmem:[%s1562_s1 + $0x10] sm:$0xff]  }
   0x3   :  { %1053 = vmatpush3.bf16.msra.mxu0 %v1198_v2  ;;  %v1203_v7 = vld [vmem:[%s1562_s1 + $0x58] sm:$0xff]   ;;  %v1205_v9 = vld [vmem:[%s1562_s1 + $0x60] sm:$0xff]   ;;  %v1207_v12 = vld [vmem:[%s1562_s1 + $0x68] sm:$0xff]  }
   0x4   :  { %1054 = vmatprep.subr.bf16.mxu0 %v1199_v3  ;;  %v1204_v8 = vld [vmem:[%s1562_s1 + $0x18] sm:$0xff]   ;;  %v1211_v10 = vld [vmem:[%s1562_s1 + $0x80] sm:$0xff]   ;;  %v1208_v13 = vld [vmem:[%s1562_s1 + $0x28] sm:$0xff]  }
   0x5   :  { %v1206_v11 = vld [vmem:[%s1562_s1 + $0x20] sm:$0xff]   ;;  %1148 = vmatpush3.bf16.msra.mxu1 %v1211_v10  ;;  %v1209_v14 = vld [vmem:[%s1562_s1 + $0x70] sm:$0xff]   ;;  %v1217_v16 = vld [vmem:[%s1562_s1 + $0x88] sm:$0xff]  }
   0x6   :  { %1149 = vmatprep.subr.bf16.mxu1 %v1258_v1  ;;  %v1216_v15 = vld [vmem:[%s1563_s0 + $0x4] ss:$12 sps:$4 sm:$0xff]   ;;  %v1218_v17 = vld [vmem:[%s1563_s0 + $0x8] ss:$12 sps:$4 sm:$0xff]   ;;  %v1212_v19 = vld [vmem:[%s1562_s1 + $0x78] sm:$0xff]  }
   0x7   :  { %1055 = vmatpush3.bf16.msra.mxu0 %v1200_v4  ;;  %437 = vmatprep.mubr.bf16.mxu0 %v1216_v15  ;;  %v1210_v18 = vld [vmem:[%s1562_s1 + $0x30] sm:$0xff]   ;;  %v1213_v20 = vld [vmem:[%s1562_s1 + $0x38] sm:$0xff]   ;;  %v1222_v21 = vld [vmem:[%s1563_s0 + $0x20] ss:$12 sps:$4 sm:$0xff]  }
   0x8   :  { %1056 = vmatprep.subr.bf16.mxu0 %v1201_v5  ;;  %v1214_v22 = vld [vmem:[%s1563_s0] ss:$12 sps:$4 sm:$0xff]   ;;  %v1219_v23 = vld [vmem:[%s1563_s0 + $0x1c] ss:$12 sps:$4 sm:$0xff]   ;;  %v1226_v24 = vld [vmem:[%s1563_s0 + $0x38] ss:$12 sps:$4 sm:$0xff]  }
   0x9   :  { %1150 = vmatpush3.bf16.msra.mxu1 %v1217_v16  ;;  %v1221_v25 = vld [vmem:[%s1563_s0 + $0x18] ss:$12 sps:$4 sm:$0xff]   ;;  %v1223_v26 = vld [vmem:[%s1563_s0 + $0x34] ss:$12 sps:$4 sm:$0xff]   ;;  %v1230_v27 = vld [vmem:[%s1563_s0 + $0x50] ss:$12 sps:$4 sm:$0xff]  }
   0xa   :  { %v1225_v28 = vld [vmem:[%s1563_s0 + $0x30] ss:$12 sps:$4 sm:$0xff]   ;;  %v1227_v29 = vld [vmem:[%s1563_s0 + $0x4c] ss:$12 sps:$4 sm:$0xff]   ;;  %v1234_v30 = vld [vmem:[%s1563_s0 + $0x68] ss:$12 sps:$4 sm:$0xff]  }
   0xb   :  { %1057 = vmatpush3.bf16.msra.mxu0 %v1202_v6  ;;  %v1229_v31 = vld [vmem:[%s1563_s0 + $0x48] ss:$12 sps:$4 sm:$0xff]   ;;  %v1231_v32 = vld [vmem:[%s1563_s0 + $0x64] ss:$12 sps:$4 sm:$0xff]   ;;  %v1238_v33 = vld [vmem:[%s1563_s0 + $0x80] ss:$12 sps:$4 sm:$0xff]  }
   0xc   :  { %1058 = vmatprep.subr.bf16.mxu0 %v1203_v7  ;;  %1152 = vmatmul.mubr.msk.bf16.vlgmr.msra.gmra.mrb[0].mxu1 %vm371_vm1, %v1218_v17  ;;  %v1233_v34 = vld [vmem:[%s1563_s0 + $0x60] ss:$12 sps:$4 sm:$0xff]   ;;  %v1235_v35 = vld [vmem:[%s1563_s0 + $0x7c] ss:$12 sps:$4 sm:$0xff]   ;;  %v1242_v36 = vld [vmem:[%s1563_s0 + $0x98] ss:$12 sps:$4 sm:$0xff]  }
   0xd   :  { %1155 = vmatprep.mubr.msk.bf16.mxu1 %vm1259_vm0, %v1258_v1  ;;  %v1237_v37 = vld [vmem:[%s1563_s0 + $0x78] ss:$12 sps:$4 sm:$0xff]   ;;  %v1239_v38 = vld [vmem:[%s1563_s0 + $0x94] ss:$12 sps:$4 sm:$0xff]   ;;  %v1246_v39 = vld [vmem:[%s1563_s0 + $0xb0] ss:$12 sps:$4 sm:$0xff]  }
   0xe   :  { %v1241_v40 = vld [vmem:[%s1563_s0 + $0x90] ss:$12 sps:$4 sm:$0xff]   ;;  %v1243_v41 = vld [vmem:[%s1563_s0 + $0xac] ss:$12 sps:$4 sm:$0xff]   ;;  %v1250_v42 = vld [vmem:[%s1563_s0 + $0xc8] ss:$12 sps:$4 sm:$0xff]  }
   0xf   :  { %1059 = vmatpush3.bf16.msra.mxu0 %v1204_v8  ;;  %v1245_v43 = vld [vmem:[%s1563_s0 + $0xa8] ss:$12 sps:$4 sm:$0xff]   ;;  %v1247_v44 = vld [vmem:[%s1563_s0 + $0xc4] ss:$12 sps:$4 sm:$0xff]   ;;  %v1254_v45 = vld [vmem:[%s1563_s0 + $0xe0] ss:$12 sps:$4 sm:$0xff]  }
  0x10   :  { %1060 = vmatprep.subr.bf16.mxu0 %v1205_v9  ;;  %v1249_v46 = vld [vmem:[%s1563_s0 + $0xc0] ss:$12 sps:$4 sm:$0xff]   ;;  %v1251_v47 = vld [vmem:[%s1563_s0 + $0xdc] ss:$12 sps:$4 sm:$0xff]   ;;  %v58_v48 = vld [vmem:[%s1563_s0 + $0xf0] sm:$0x11] }
  0x11   :  { %v1257_v49 = vld [vmem:[%s1563_s0 + $0xf8] ss:$0 sps:$4 sm:$0x11]   ;;  %v871_v51 = vcombine.high %v58_v48, %v58_v48  ;;  %v870_v52 = vcombine.low %v58_v48, %v58_v48  ;;  %v1473_v62 = vld [vmem:[%s1564_s2] ss:$0 sm:$0xff]  ;;  %v1034_v15 = vld [vmem:[%s1565_s3 + $0x8] sm:$0xff]  }
  0x12   :  { %v1253_v50 = vld [vmem:[%s1563_s0 + $0xd8] ss:$12 sps:$4 sm:$0xff]  }
  0x13   :  { %1061 = vmatpush3.bf16.msra.mxu0 %v1206_v11  ;;  %v945_v63 = vld [vmem:[%s1565_s3] sm:$0xff]  }
  0x14   :  { %1062 = vmatprep.subr.bf16.mxu0 %v1207_v12  ;;  %1156 = vmatmul.mubr.msk.bf16.gmra.mrb[4].mxu1 %vm371_vm1, %v1222_v21  ;;  %v946_v5 = vunpack.c.l.bf16 %v945_v63  ;;  %v947_v9 = vunpack.c.h.bf16 %v945_v63 }
  0x15   :  { %1159 = vmatprep.mubr.msk.bf16.mxu1 %vm1259_vm0, %v1258_v1 }
  0x17   :  { %1063 = vmatpush3.bf16.msra.mxu0 %v1208_v13 }
  0x18   :  { %1064 = vmatprep.subr.bf16.mxu0 %v1209_v14 }
  0x1b   :  { %1065 = vmatpush3.bf16.msra.mxu0 %v1210_v18 }
  0x1c   :  { %1066 = vmatprep.subr.bf16.mxu0 %v1212_v19  ;;  %1160 = vmatmul.mubr.msk.bf16.gmra.mrb[8].mxu1 %vm371_vm1, %v1226_v24 }
  0x1d   :  { %1163 = vmatprep.mubr.msk.bf16.mxu1 %vm1259_vm0, %v1258_v1 }
  0x1f   :  { %1067 = vmatpush3.bf16.msra.mxu0 %v1213_v20 }
  0x22   :  { %438 = vmatmul.mubr.bf16.vlgmr.msra.gmra.mrb[0].mxu0 %v1214_v22  ;;  %v950_v22 = vunpack.c.l.bf16 %v1034_v15 }
  0x23   :  { %445 = vmatprep.mubr.bf16.mxu0 %v1219_v23 }
  0x24   :  { %1164 = vmatmul.mubr.msk.bf16.gmra.mrb[12].mxu1 %vm371_vm1, %v1230_v27 }
  0x25   :  { %1167 = vmatprep.mubr.msk.bf16.mxu1 %vm1259_vm0, %v1258_v1 }
  0x2a   :  { %446 = vmatmul.mubr.bf16.gmra.mrb[4].mxu0 %v1221_v25 }
  0x2b   :  { %453 = vmatprep.mubr.bf16.mxu0 %v1223_v26 }
  0x2c   :  { %1168 = vmatmul.mubr.msk.bf16.gmra.mrb[16].mxu1 %vm371_vm1, %v1234_v30 }
  0x2d   :  { %1171 = vmatprep.mubr.msk.bf16.mxu1 %vm1259_vm0, %v1258_v1 }
  0x32   :  { %454 = vmatmul.mubr.bf16.gmra.mrb[8].mxu0 %v1225_v28 }
  0x33   :  { %461 = vmatprep.mubr.bf16.mxu0 %v1227_v29 }
  0x34   :  { %1172 = vmatmul.mubr.msk.bf16.gmra.mrb[20].mxu1 %vm371_vm1, %v1238_v33 }
  0x35   :  { %1175 = vmatprep.mubr.msk.bf16.mxu1 %vm1259_vm0, %v1258_v1 }
  0x3a   :  { %462 = vmatmul.mubr.bf16.gmra.mrb[12].mxu0 %v1229_v31  ;;  %v951_v31 = vunpack.c.h.bf16 %v1034_v15 }
  0x3b   :  { %469 = vmatprep.mubr.bf16.mxu0 %v1231_v32 }
  0x3c   :  { %1176 = vmatmul.mubr.msk.bf16.gmra.mrb[24].mxu1 %vm371_vm1, %v1242_v36 }
  0x3d   :  { %1179 = vmatprep.mubr.msk.bf16.mxu1 %vm1259_vm0, %v1258_v1 }
  0x42   :  { %470 = vmatmul.mubr.bf16.gmra.mrb[16].mxu0 %v1233_v34 }
  0x43   :  { %477 = vmatprep.mubr.bf16.mxu0 %v1235_v35 }
  0x44   :  { %1180 = vmatmul.mubr.msk.bf16.gmra.mrb[28].mxu1 %vm371_vm1, %v1246_v39 }
  0x45   :  { %1183 = vmatprep.mubr.msk.bf16.mxu1 %vm1259_vm0, %v1258_v1 }
  0x4a   :  { %478 = vmatmul.mubr.bf16.gmra.mrb[20].mxu0 %v1237_v37  ;;  %v1035_v37 = vld [vmem:[%s1565_s3 + $0x10] sm:$0xff]  }
  0x4b   :  { %485 = vmatprep.mubr.bf16.mxu0 %v1239_v38 }
  0x4c   :  { %1184 = vmatmul.mubr.msk.bf16.gmra.mrb[32].mxu1 %vm371_vm1, %v1250_v42 }
  0x4d   :  { %1187 = vmatprep.mubr.msk.bf16.mxu1 %vm1259_vm0, %v1258_v1 }
  0x52   :  { %486 = vmatmul.mubr.bf16.gmra.mrb[24].mxu0 %v1241_v40 }
  0x53   :  { %493 = vmatprep.mubr.bf16.mxu0 %v1243_v41 }
  0x54   :  { %1188 = vmatmul.mubr.msk.bf16.gmra.mrb[36].mxu1 %vm371_vm1, %v1254_v45 }
  0x55   :  { %1191 = vmatprep.mubr.msk.bf16.mxu1 %vm1259_vm0, %v1258_v1 }
  0x5a   :  { %494 = vmatmul.mubr.bf16.gmra.mrb[28].mxu0 %v1245_v43 }
  0x5b   :  { %501 = vmatprep.mubr.bf16.mxu0 %v1247_v44  ;;  %v954_v44 = vunpack.c.l.bf16 %v1035_v37 }
  0x5c   :  { %1192 = vmatmul.mubr.msk.bf16.gmra.mrb[40].mxu1 %vm371_vm1, %v1257_v49 }
  0x62   :  { %502 = vmatmul.mubr.bf16.gmra.mrb[32].mxu0 %v1249_v46 }
  0x63   :  { %509 = vmatprep.mubr.bf16.mxu0 %v1251_v47 }
  0x6a   :  { %510 = vmatmul.mubr.bf16.gmra.mrb[36].mxu0 %v1253_v50 }
  0x6b   :  { %517 = vmatprep.mubr.bf16.mxu0 %v871_v51 }
  0x72   :  { %518 = vmatmul.mubr.bf16.gmra.mrb[40].mxu0 %v870_v52 }
  0xdf   :  { %v559_v53 = vpop.f32.mrb[0].mxu1 }
  0xe0   :  { %v1153_v54 = vpop.f32.mrb[1].mxu1 }
  0xe1   :  { %v562_v55 = vpop.f32.mrb[2].mxu1 }
  0xe2   :  { %v1154_v56 = vpop.f32.mrb[3].mxu1 }
  0xe7   :  { %v567_v57 = vpop.f32.mrb[4].mxu1 }
  0xe8   :  { %v1157_v58 = vpop.f32.mrb[5].mxu1 }
  0xe9   :  { %v570_v60 = vpop.f32.mrb[6].mxu1 }
  0xea   :  { %v1158_v0 = vpop.f32.mrb[7].mxu1 }
  0xef   :  { %v575_v10 = vpop.f32.mrb[8].mxu1 }
  0xf0   :  { %v1161_v11 = vpop.f32.mrb[9].mxu1 }
  0xf1   :  { %v578_v16 = vpop.f32.mrb[10].mxu1 }
  0xf2   :  { %v1162_v18 = vpop.f32.mrb[11].mxu1 }
  0xf3   :  { %v1037_v18 = vld [vmem:[%s1565_s3 + $0x20] sm:$0xff]  }
  0xf5   :  { %v1068_v59 = vpop.f32.mrb[0].mxu0 }
  0xf6   :  { %v1069_v61 = vpop.f32.mrb[1].mxu0 }
  0xf7   :  { %v1070_v1 = vadd.f32 %v1069_v61, %v1068_v59  ;;  %v1071_v2 = vpop.f32.mrb[2].mxu0  ;;  %v583_v32 = vpop.f32.mrb[12].mxu1  ;;  %v1036_v59 = vld [vmem:[%s1565_s3 + $0x18] sm:$0xff]  }
  0xf8   :  { %v1072_v3 = vpop.f32.mrb[3].mxu0  ;;  %v1165_v33 = vpop.f32.mrb[13].mxu1 }
  0xf9   :  { %v440_v4 = vadd.f32 %v1070_v1, %v1473_v62  ;;  %v1073_v6 = vadd.f32 %v1072_v3, %v1071_v2  ;;  %v586_v38 = vpop.f32.mrb[14].mxu1  ;;  %v958_v3 = vunpack.c.l.bf16 %v1036_v59 }
  0xfa   :  { %v1166_v40 = vpop.f32.mrb[15].mxu1 }
  0xfb   :  { %v560_v7 = vadd.f32 %v559_v53, %v440_v4  ;;  %v443_v8 = vadd.f32 %v1073_v6, %v1473_v62  ;;  %v955_v53 = vunpack.c.h.bf16 %v1035_v37  ;;  %v1038_v40 = vld [vmem:[%s1565_s3 + $0x28] sm:$0xff]  }
  0xfd   :  { %v687_v12 = vadd.f32 %v946_v5, %v560_v7  ;;  %v563_v13 = vadd.f32 %v562_v55, %v443_v8  ;;  %v1074_v14 = vpop.f32.mrb[4].mxu0 }
  0xfe   :  { %v1075_v17 = vpop.f32.mrb[5].mxu0 }
  0xff   :  { %v688_v19 = vadd.f32 %v947_v9, %v563_v13  ;;  %v1076_v20 = vadd.f32 %v1075_v17, %v1074_v14  ;;  %v1077_v21 = vpop.f32.mrb[6].mxu0  ;;  %v708_v24 = vmax.f32 %v687_v12, 0.0  ;;  %v591_v54 = vpop.f32.mrb[16].mxu1  ;;  %v959_v12 = vunpack.c.h.bf16 %v1036_v59 }
 0x100   :  { %v1078_v23 = vpop.f32.mrb[7].mxu0  ;;  %v1169_v55 = vpop.f32.mrb[17].mxu1 }
 0x101   :  { %v709_v25 = vmax.f32 %v688_v19, 0.0  ;;  %v448_v26 = vadd.f32 %v1076_v20, %v1473_v62  ;;  %v1079_v27 = vadd.f32 %v1078_v23, %v1077_v21 }
 0x103   :  { %v987_v28 = vpack.c.bf16 %v709_v25, %v708_v24  ;;  %v568_v29 = vadd.f32 %v567_v57, %v448_v26  ;;  %v451_v30 = vadd.f32 %v1079_v27, %v1473_v62  ;;  %v962_v25 = vunpack.c.l.bf16 %v1037_v18 }
 0x105   :  { %988 = vst [vmem:[%s1566_s4] sm:$0xff] %v987_v28   ;;  %v689_v34 = vadd.f32 %v950_v22, %v568_v29  ;;  %v571_v35 = vadd.f32 %v570_v60, %v451_v30  ;;  %v1080_v36 = vpop.f32.mrb[8].mxu0  ;;  %v594_v60 = vpop.f32.mrb[18].mxu1 }
 0x106   :  { %v1081_v39 = vpop.f32.mrb[9].mxu0  ;;  %v1170_v63 = vpop.f32.mrb[19].mxu1 }
 0x107   :  { %v690_v41 = vadd.f32 %v951_v31, %v571_v35  ;;  %v1082_v42 = vadd.f32 %v1081_v39, %v1080_v36  ;;  %v1083_v43 = vpop.f32.mrb[10].mxu0  ;;  %v710_v46 = vmax.f32 %v689_v34, 0.0  ;;  %v599_v13 = vpop.f32.mrb[20].mxu1  ;;  %v963_v34 = vunpack.c.h.bf16 %v1037_v18  ;;  %v1039_v63 = vld [vmem:[%s1565_s3 + $0x30] sm:$0xff]  }
 0x108   :  { %v1084_v45 = vpop.f32.mrb[11].mxu0  ;;  %v1173_v14 = vpop.f32.mrb[21].mxu1 }
 0x109   :  { %v711_v47 = vmax.f32 %v690_v41, 0.0  ;;  %v456_v48 = vadd.f32 %v1082_v42, %v1473_v62  ;;  %v1085_v49 = vadd.f32 %v1084_v45, %v1083_v43  ;;  %v602_v19 = vpop.f32.mrb[22].mxu1 }
 0x10a   :  { %v1174_v21 = vpop.f32.mrb[23].mxu1 }
 0x10b   :  { %v992_v50 = vpack.c.bf16 %v711_v47, %v710_v46  ;;  %v576_v51 = vadd.f32 %v575_v10, %v456_v48  ;;  %v459_v52 = vadd.f32 %v1085_v49, %v1473_v62  ;;  %v966_v47 = vunpack.c.l.bf16 %v1038_v40  ;;  %v1040_v21 = vld [vmem:[%s1565_s3 + $0x38] sm:$0xff]  }
 0x10d   :  { %1043 = vst [vmem:[%s1566_s4 + $0x8] sm:$0xff] %v992_v50   ;;  %v691_v56 = vadd.f32 %v954_v44, %v576_v51  ;;  %v579_v57 = vadd.f32 %v578_v16, %v459_v52  ;;  %v1086_v58 = vpop.f32.mrb[12].mxu0 }
 0x10e   :  { %v1087_v61 = vpop.f32.mrb[13].mxu0 }
 0x10f   :  { %v692_v0 = vadd.f32 %v955_v53, %v579_v57  ;;  %v1088_v1 = vadd.f32 %v1087_v61, %v1086_v58  ;;  %v1089_v2 = vpop.f32.mrb[14].mxu0  ;;  %v712_v5 = vmax.f32 %v691_v56, 0.0  ;;  %v607_v35 = vpop.f32.mrb[24].mxu1  ;;  %v967_v56 = vunpack.c.h.bf16 %v1038_v40 }
 0x110   :  { %v1090_v4 = vpop.f32.mrb[15].mxu0  ;;  %v1177_v36 = vpop.f32.mrb[25].mxu1 }
 0x111   :  { %v713_v6 = vmax.f32 %v692_v0, 0.0  ;;  %v464_v7 = vadd.f32 %v1088_v1, %v1473_v62  ;;  %v1091_v8 = vadd.f32 %v1090_v4, %v1089_v2  ;;  %v610_v41 = vpop.f32.mrb[26].mxu1 }
 0x112   :  { %v1178_v43 = vpop.f32.mrb[27].mxu1 }
 0x113   :  { %v997_v9 = vpack.c.bf16 %v713_v6, %v712_v5  ;;  %v584_v10 = vadd.f32 %v583_v32, %v464_v7  ;;  %v467_v11 = vadd.f32 %v1091_v8, %v1473_v62  ;;  %v970_v6 = vunpack.c.l.bf16 %v1039_v63  ;;  %v1041_v43 = vld [vmem:[%s1565_s3 + $0x40] sm:$0xff]  }
 0x115   :  { %1044 = vst [vmem:[%s1566_s4 + $0x10] sm:$0xff] %v997_v9   ;;  %v693_v15 = vadd.f32 %v958_v3, %v584_v10  ;;  %v587_v16 = vadd.f32 %v586_v38, %v467_v11  ;;  %v1092_v17 = vpop.f32.mrb[16].mxu0 }
 0x116   :  { %v1093_v20 = vpop.f32.mrb[17].mxu0 }
 0x117   :  { %v694_v22 = vadd.f32 %v959_v12, %v587_v16  ;;  %v1094_v23 = vadd.f32 %v1093_v20, %v1092_v17  ;;  %v1095_v24 = vpop.f32.mrb[18].mxu0  ;;  %v714_v27 = vmax.f32 %v693_v15, 0.0  ;;  %v615_v57 = vpop.f32.mrb[28].mxu1  ;;  %v971_v15 = vunpack.c.h.bf16 %v1039_v63 }
 0x118   :  { %v1096_v26 = vpop.f32.mrb[19].mxu0  ;;  %v1181_v58 = vpop.f32.mrb[29].mxu1 }
 0x119   :  { %v715_v28 = vmax.f32 %v694_v22, 0.0  ;;  %v472_v29 = vadd.f32 %v1094_v23, %v1473_v62  ;;  %v1097_v30 = vadd.f32 %v1096_v26, %v1095_v24  ;;  %v618_v0 = vpop.f32.mrb[30].mxu1 }
 0x11a   :  { %v1182_v2 = vpop.f32.mrb[31].mxu1 }
 0x11b   :  { %v1002_v31 = vpack.c.bf16 %v715_v28, %v714_v27  ;;  %v592_v32 = vadd.f32 %v591_v54, %v472_v29  ;;  %v475_v33 = vadd.f32 %v1097_v30, %v1473_v62  ;;  %v974_v28 = vunpack.c.l.bf16 %v1040_v21  ;;  %v1042_v2 = vld [vmem:[%s1565_s3 + $0x48] sm:$0xff]  }
 0x11d   :  { %1045 = vst [vmem:[%s1566_s4 + $0x18] sm:$0xff] %v1002_v31   ;;  %v695_v37 = vadd.f32 %v962_v25, %v592_v32  ;;  %v595_v38 = vadd.f32 %v594_v60, %v475_v33  ;;  %v1098_v39 = vpop.f32.mrb[20].mxu0 }
 0x11e   :  { %v1099_v42 = vpop.f32.mrb[21].mxu0 }
 0x11f   :  { %v696_v44 = vadd.f32 %v963_v34, %v595_v38  ;;  %v1100_v45 = vadd.f32 %v1099_v42, %v1098_v39  ;;  %v1101_v46 = vpop.f32.mrb[22].mxu0  ;;  %v716_v49 = vmax.f32 %v695_v37, 0.0  ;;  %v623_v16 = vpop.f32.mrb[32].mxu1  ;;  %v975_v37 = vunpack.c.h.bf16 %v1040_v21 }
 0x120   :  { %v1102_v48 = vpop.f32.mrb[23].mxu0  ;;  %v1185_v17 = vpop.f32.mrb[33].mxu1 }
 0x121   :  { %v717_v50 = vmax.f32 %v696_v44, 0.0  ;;  %v480_v51 = vadd.f32 %v1100_v45, %v1473_v62  ;;  %v1103_v52 = vadd.f32 %v1102_v48, %v1101_v46  ;;  %v626_v22 = vpop.f32.mrb[34].mxu1 }
 0x122   :  { %v1186_v24 = vpop.f32.mrb[35].mxu1 }
 0x123   :  { %v1007_v53 = vpack.c.bf16 %v717_v50, %v716_v49  ;;  %v600_v54 = vadd.f32 %v599_v13, %v480_v51  ;;  %v483_v55 = vadd.f32 %v1103_v52, %v1473_v62  ;;  %v978_v50 = vunpack.c.l.bf16 %v1041_v43 }
 0x125   :  { %1046 = vst [vmem:[%s1566_s4 + $0x20] sm:$0xff] %v1007_v53   ;;  %v697_v59 = vadd.f32 %v966_v47, %v600_v54  ;;  %v603_v60 = vadd.f32 %v602_v19, %v483_v55  ;;  %v1104_v61 = vpop.f32.mrb[24].mxu0 }
 0x126   :  { %v1105_v1 = vpop.f32.mrb[25].mxu0 }
 0x127   :  { %v698_v3 = vadd.f32 %v967_v56, %v603_v60  ;;  %v1106_v4 = vadd.f32 %v1105_v1, %v1104_v61  ;;  %v1107_v5 = vpop.f32.mrb[26].mxu0  ;;  %v718_v8 = vmax.f32 %v697_v59, 0.0  ;;  %v631_v38 = vpop.f32.mrb[36].mxu1  ;;  %v979_v59 = vunpack.c.h.bf16 %v1041_v43 }
 0x128   :  { %v1108_v7 = vpop.f32.mrb[27].mxu0  ;;  %v1189_v39 = vpop.f32.mrb[37].mxu1 }
 0x129   :  { %v719_v9 = vmax.f32 %v698_v3, 0.0  ;;  %v488_v10 = vadd.f32 %v1106_v4, %v1473_v62  ;;  %v1109_v11 = vadd.f32 %v1108_v7, %v1107_v5  ;;  %v634_v44 = vpop.f32.mrb[38].mxu1 }
 0x12a   :  { %v1190_v46 = vpop.f32.mrb[39].mxu1 }
 0x12b   :  { %v1012_v12 = vpack.c.bf16 %v719_v9, %v718_v8  ;;  %v608_v13 = vadd.f32 %v607_v35, %v488_v10  ;;  %v491_v14 = vadd.f32 %v1109_v11, %v1473_v62  ;;  %v982_v9 = vunpack.c.l.bf16 %v1042_v2 }
 0x12d   :  { %1047 = vst [vmem:[%s1566_s4 + $0x28] sm:$0xff] %v1012_v12   ;;  %v699_v18 = vadd.f32 %v970_v6, %v608_v13  ;;  %v611_v19 = vadd.f32 %v610_v41, %v491_v14  ;;  %v1110_v20 = vpop.f32.mrb[28].mxu0 }
 0x12e   :  { %v1111_v23 = vpop.f32.mrb[29].mxu0 }
 0x12f   :  { %v700_v25 = vadd.f32 %v971_v15, %v611_v19  ;;  %v1112_v26 = vadd.f32 %v1111_v23, %v1110_v20  ;;  %v1113_v27 = vpop.f32.mrb[30].mxu0  ;;  %v720_v30 = vmax.f32 %v699_v18, 0.0  ;;  %v639_v60 = vpop.f32.mrb[40].mxu1  ;;  %v983_v18 = vunpack.c.h.bf16 %v1042_v2  ;;  %v665_v23 = vld [vmem:[%s1565_s3 + $0x50] sm:$0x1] }
 0x130   :  { %v1114_v29 = vpop.f32.mrb[31].mxu0  ;;  %v1193_v61 = vpop.f32.mrb[41].mxu1 }
 0x131   :  { %v721_v31 = vmax.f32 %v700_v25, 0.0  ;;  %v496_v32 = vadd.f32 %v1112_v26, %v1473_v62  ;;  %v1115_v33 = vadd.f32 %v1114_v29, %v1113_v27  ;;  %v642_v3 = vpop.f32.mrb[42].mxu1 }
 0x132   :  { %v1194_v5 = vpop.f32.mrb[43].mxu1 }
 0x133   :  { %v1017_v34 = vpack.c.bf16 %v721_v31, %v720_v30  ;;  %v616_v35 = vadd.f32 %v615_v57, %v496_v32  ;;  %v499_v36 = vadd.f32 %v1115_v33, %v1473_v62  ;;  %v686_v31 = vunpack.c.l.bf16 %v665_v23 }
 0x135   :  { %1048 = vst [vmem:[%s1566_s4 + $0x30] sm:$0xff] %v1017_v34   ;;  %v701_v40 = vadd.f32 %v974_v28, %v616_v35  ;;  %v619_v41 = vadd.f32 %v618_v0, %v499_v36  ;;  %v1116_v42 = vpop.f32.mrb[32].mxu0 }
 0x136   :  { %v1117_v45 = vpop.f32.mrb[33].mxu0 }
 0x137   :  { %v702_v47 = vadd.f32 %v975_v37, %v619_v41  ;;  %v1118_v48 = vadd.f32 %v1117_v45, %v1116_v42  ;;  %v1119_v49 = vpop.f32.mrb[34].mxu0  ;;  %v722_v52 = vmax.f32 %v701_v40, 0.0 }
 0x138   :  { %v1120_v51 = vpop.f32.mrb[35].mxu0 }
 0x139   :  { %v723_v53 = vmax.f32 %v702_v47, 0.0  ;;  %v504_v54 = vadd.f32 %v1118_v48, %v1473_v62  ;;  %v1121_v55 = vadd.f32 %v1120_v51, %v1119_v49 }
 0x13b   :  { %v1022_v56 = vpack.c.bf16 %v723_v53, %v722_v52  ;;  %v624_v57 = vadd.f32 %v623_v16, %v504_v54  ;;  %v507_v58 = vadd.f32 %v1121_v55, %v1473_v62 }
 0x13d   :  { %1049 = vst [vmem:[%s1566_s4 + $0x38] sm:$0xff] %v1022_v56   ;;  %v703_v63 = vadd.f32 %v978_v50, %v624_v57  ;;  %v627_v0 = vadd.f32 %v626_v22, %v507_v58  ;;  %v1122_v1 = vpop.f32.mrb[36].mxu0 }
 0x13e   :  { %v1123_v4 = vpop.f32.mrb[37].mxu0 }
 0x13f   :  { %v704_v6 = vadd.f32 %v979_v59, %v627_v0  ;;  %v1124_v7 = vadd.f32 %v1123_v4, %v1122_v1  ;;  %v1125_v8 = vpop.f32.mrb[38].mxu0  ;;  %v724_v11 = vmax.f32 %v703_v63, 0.0 }
 0x140   :  { %v1126_v10 = vpop.f32.mrb[39].mxu0 }
 0x141   :  { %v725_v12 = vmax.f32 %v704_v6, 0.0  ;;  %v512_v13 = vadd.f32 %v1124_v7, %v1473_v62  ;;  %v1127_v14 = vadd.f32 %v1126_v10, %v1125_v8 }
 0x143   :  { %v1027_v15 = vpack.c.bf16 %v725_v12, %v724_v11  ;;  %v632_v16 = vadd.f32 %v631_v38, %v512_v13  ;;  %v515_v17 = vadd.f32 %v1127_v14, %v1473_v62 }
 0x145   :  { %1050 = vst [vmem:[%s1566_s4 + $0x40] sm:$0xff] %v1027_v15   ;;  %v705_v19 = vadd.f32 %v982_v9, %v632_v16  ;;  %v635_v20 = vadd.f32 %v634_v44, %v515_v17  ;;  %v1128_v21 = vpop.f32.mrb[40].mxu0 }
 0x146   :  { %v1129_v22 = vpop.f32.mrb[41].mxu0 }
 0x147   :  { %v706_v24 = vadd.f32 %v983_v18, %v635_v20  ;;  %v1130_v25 = vadd.f32 %v1129_v22, %v1128_v21  ;;  %v1131_v26 = vpop.f32.mrb[42].mxu0  ;;  %v726_v28 = vmax.f32 %v705_v19, 0.0 }
 0x148   :  { %v1132_v27 = vpop.f32.mrb[43].mxu0 }
 0x149   :  { %v727_v29 = vmax.f32 %v706_v24, 0.0  ;;  %v520_v30 = vadd.f32 %v1130_v25, %v1473_v62 }
 0x14b   :  { %v1032_v32 = vpack.c.bf16 %v727_v29, %v726_v28  ;;  %v640_v33 = vadd.f32 %v639_v60, %v520_v30 }
 0x14d   :  { %1051 = vst [vmem:[%s1566_s4 + $0x48] sm:$0xff] %v1032_v32   ;;  %v707_v34 = vadd.f32 %v686_v31, %v640_v33 }
 0x14f   :  { %v728_v35 = vmax.f32 %v707_v34, 0.0 }
 0x151   :  { %v943_v36 = vpack.c.bf16 %v728_v35, %v728_v35 }
 0x153   :  { %834 = vst [vmem:[%s1566_s4 + $0x50] sm:$0x1] %v943_v36 }

// kernel: resnet_forward.16
= control target key start
LH: loop header
LB: loop body
LE: loop exit
PB: predicated region body
PF: predicated region fallthrough
CT: control target
= control target key end

     0   :  { %vm235_vm0 = vcmask 261120   ;;  %s722_s1 = inlined_call_operand.vmem [shape: bf16[288,128], index: 1, kind: input, shape index: {}]   ;;  %s723_s0 = inlined_call_operand.vmem [shape: bf16[50,288], index: 0, kind: input, shape index: {}]   ;;  %s724_s2 = inlined_call_operand.vmem [shape: f32[1,128], index: 2, kind: input, shape index: {}]   ;;  %s725_s3 = inlined_call_operand.vmem [shape: bf16[50,128], index: 3, kind: output, shape index: {}]  }
   0x1   :  { %v563_v0 = vld [vmem:[%s722_s1 + $0x40] sm:$0xff]   ;;  %v565_v2 = vld [vmem:[%s722_s1 + $0x48] sm:$0xff]   ;;  %v567_v4 = vld [vmem:[%s722_s1 + $0x50] sm:$0xff]  }
   0x2   :  { %v564_v1 = vld [vmem:[%s722_s1] sm:$0xff]   ;;  %489 = vmatprep.subr.bf16.mxu0 %v563_v0  ;;  %547 = vmatprep.subr.bf16.mxu1 %v563_v0  ;;  %v566_v3 = vld [vmem:[%s722_s1 + $0x8] sm:$0xff]   ;;  %v568_v5 = vld [vmem:[%s722_s1 + $0x10] sm:$0xff]  }
   0x3   :  { %490 = vmatpush3.bf16.msra.mxu0 %v564_v1  ;;  %555 = vmatpush3.bf16.msra.mxu1 %v564_v1  ;;  %v569_v6 = vld [vmem:[%s722_s1 + $0x58] sm:$0xff]   ;;  %v571_v8 = vld [vmem:[%s722_s1 + $0x60] sm:$0xff]   ;;  %v573_v10 = vld [vmem:[%s722_s1 + $0x68] sm:$0xff]  }
   0x4   :  { %491 = vmatprep.subr.bf16.mxu0 %v565_v2  ;;  %548 = vmatprep.subr.bf16.mxu1 %v565_v2  ;;  %v570_v7 = vld [vmem:[%s722_s1 + $0x18] sm:$0xff]   ;;  %v572_v9 = vld [vmem:[%s722_s1 + $0x20] sm:$0xff]   ;;  %v27_v12 = vld [vmem:[%s723_s0 + $0x48] sm:$0x11] }
   0x5   :  { %v581_v11 = vld [vmem:[%s723_s0 + $0x4] ss:$12 sps:$4 sm:$0xff]   ;;  %v434_v13 = vcombine.high %v27_v12, %v27_v12  ;;  %v574_v14 = vld [vmem:[%s722_s1 + $0x28] sm:$0xff]   ;;  %v577_v17 = vld [vmem:[%s722_s1 + $0x78] sm:$0xff]   ;;  %v433_v21 = vcombine.low %v27_v12, %v27_v12 }
   0x6   :  { %v575_v15 = vld [vmem:[%s722_s1 + $0x70] sm:$0xff]   ;;  %280 = vmatprep.mubr.bf16.mxu0 %v581_v11  ;;  %v578_v18 = vld [vmem:[%s722_s1 + $0x38] sm:$0xff]   ;;  %v584_v19 = vld [vmem:[%s722_s1 + $0x80] sm:$0xff]  }
   0x7   :  { %492 = vmatpush3.bf16.msra.mxu0 %v566_v3  ;;  %556 = vmatpush3.bf16.msra.mxu1 %v566_v3  ;;  %v576_v16 = vld [vmem:[%s722_s1 + $0x30] sm:$0xff]   ;;  %v579_v20 = vld [vmem:[%s723_s0] ss:$12 sps:$4 sm:$0xff]   ;;  %v586_v22 = vld [vmem:[%s723_s0 + $0x1c] ss:$12 sps:$4 sm:$0xff]  }
   0x8   :  { %493 = vmatprep.subr.bf16.mxu0 %v567_v4  ;;  %549 = vmatprep.subr.bf16.mxu1 %v567_v4  ;;  %v585_v23 = vld [vmem:[%s722_s1 + $0x88] sm:$0xff]   ;;  %v589_v25 = vld [vmem:[%s723_s0 + $0x18] ss:$12 sps:$4 sm:$0xff]   ;;  %v591_v27 = vld [vmem:[%s723_s0 + $0x34] ss:$12 sps:$4 sm:$0xff]  }
   0x9   :  { %304 = vmatprep.mubr.bf16.mxu1 %v434_v13  ;;  %v588_v24 = vld [vmem:[%s723_s0 + $0x8] ss:$12 sps:$4 sm:$0xff]   ;;  %v590_v26 = vld [vmem:[%s723_s0 + $0x20] ss:$12 sps:$4 sm:$0xff]   ;;  %v593_v28 = vld [vmem:[%s723_s0 + $0x38] ss:$12 sps:$4 sm:$0xff]  }
   0xa   :  { %v594_v29 = vld [vmem:[%s723_s0 + $0x30] ss:$12 sps:$4 sm:$0xff]   ;;  %v423_v42 = vld [vmem:[%s724_s2] ss:$0 sm:$0xff] }
   0xb   :  { %494 = vmatpush3.bf16.msra.mxu0 %v568_v5  ;;  %557 = vmatpush3.bf16.msra.mxu1 %v568_v5  ;;  %v595_v30 = vld [vmem:[%s723_s0 + $0x50] ss:$0 sps:$4 sm:$0x11]  }
   0xc   :  { %495 = vmatprep.subr.bf16.mxu0 %v569_v6  ;;  %550 = vmatprep.subr.bf16.mxu1 %v569_v6 }
   0xf   :  { %496 = vmatpush3.bf16.msra.mxu0 %v570_v7  ;;  %558 = vmatpush3.bf16.msra.mxu1 %v570_v7 }
  0x10   :  { %497 = vmatprep.subr.bf16.mxu0 %v571_v8  ;;  %551 = vmatprep.subr.bf16.mxu1 %v571_v8 }
  0x13   :  { %498 = vmatpush3.bf16.msra.mxu0 %v572_v9  ;;  %559 = vmatpush3.bf16.msra.mxu1 %v572_v9 }
  0x14   :  { %499 = vmatprep.subr.bf16.mxu0 %v573_v10  ;;  %552 = vmatprep.subr.bf16.mxu1 %v573_v10 }
  0x17   :  { %500 = vmatpush3.bf16.msra.mxu0 %v574_v14  ;;  %560 = vmatpush3.bf16.msra.mxu1 %v574_v14 }
  0x18   :  { %501 = vmatprep.subr.bf16.mxu0 %v575_v15  ;;  %553 = vmatprep.subr.bf16.mxu1 %v575_v15 }
  0x1b   :  { %502 = vmatpush3.bf16.msra.mxu0 %v576_v16  ;;  %561 = vmatpush3.bf16.msra.mxu1 %v576_v16 }
  0x1c   :  { %503 = vmatprep.subr.bf16.mxu0 %v577_v17  ;;  %554 = vmatprep.subr.bf16.mxu1 %v577_v17 }
  0x1f   :  { %504 = vmatpush3.bf16.msra.mxu0 %v578_v18  ;;  %562 = vmatpush3.bf16.msra.mxu1 %v578_v18 }
  0x20   :  { %535 = vmatprep.subr.bf16.mxu1 %v584_v19 }
  0x22   :  { %281 = vmatmul.mubr.bf16.vlgmr.msra.gmra.mrb[0].mxu0 %v579_v20  ;;  %305 = vmatmul.mubr.bf16.vlgmr.msra.gmra.mrb[0].mxu1 %v433_v21 }
  0x23   :  { %536 = vmatpush3.bf16.msra.mxu1 %v584_v19  ;;  %288 = vmatprep.mubr.bf16.mxu0 %v586_v22 }
  0x24   :  { %537 = vmatprep.subr.bf16.mxu1 %v585_v23  ;;  %539 = vmatprep.mubr.msk.bf16.mxu1 %vm235_vm0, %v588_v24 }
  0x27   :  { %538 = vmatpush3.bf16.msra.mxu1 %v585_v23 }
  0x2a   :  { %289 = vmatmul.mubr.bf16.gmra.mrb[4].mxu0 %v589_v25  ;;  %540 = vmatmul.mubr.msk.bf16.vlgmr.msra.gmra.mrb[4].mxu1 %vm235_vm0, %v590_v26 }
  0x2b   :  { %296 = vmatprep.mubr.bf16.mxu0 %v591_v27  ;;  %543 = vmatprep.mubr.msk.bf16.mxu1 %vm235_vm0, %v593_v28 }
  0x32   :  { %297 = vmatmul.mubr.bf16.gmra.mrb[8].mxu0 %v594_v29  ;;  %544 = vmatmul.mubr.msk.bf16.gmra.mrb[8].mxu1 %vm235_vm0, %v595_v30 }
  0xf5   :  { %v505_v31 = vpop.f32.mrb[0].mxu0  ;;  %v523_v32 = vpop.f32.mrb[0].mxu1 }
  0xf6   :  { %v506_v33 = vpop.f32.mrb[1].mxu0  ;;  %v524_v34 = vpop.f32.mrb[1].mxu1 }
  0xf7   :  { %v507_v35 = vadd.f32 %v506_v33, %v505_v31  ;;  %v508_v36 = vpop.f32.mrb[2].mxu0  ;;  %v525_v37 = vadd.f32 %v524_v34, %v523_v32  ;;  %v526_v38 = vpop.f32.mrb[2].mxu1 }
  0xf8   :  { %v509_v39 = vpop.f32.mrb[3].mxu0  ;;  %v527_v40 = vpop.f32.mrb[3].mxu1 }
  0xf9   :  { %v510_v41 = vadd.f32 %v509_v39, %v508_v36  ;;  %v283_v45 = vadd.f32 %v507_v35, %v423_v42  ;;  %v307_v62 = vadd.f32 %v525_v37, %v423_v42 }
  0xfb   :  { %v286_v52 = vadd.f32 %v510_v41, %v423_v42 }
  0xfd   :  { %v511_v43 = vpop.f32.mrb[4].mxu0  ;;  %v541_v44 = vpop.f32.mrb[4].mxu1 }
  0xfe   :  { %v512_v46 = vpop.f32.mrb[5].mxu0  ;;  %v346_v47 = vpop.f32.mrb[5].mxu1 }
  0xff   :  { %v513_v48 = vadd.f32 %v512_v46, %v511_v43  ;;  %v347_v49 = vadd.f32 %v346_v47, %v283_v45  ;;  %v514_v50 = vpop.f32.mrb[6].mxu0  ;;  %v542_v51 = vpop.f32.mrb[6].mxu1 }
 0x100   :  { %v515_v53 = vpop.f32.mrb[7].mxu0  ;;  %v349_v54 = vpop.f32.mrb[7].mxu1 }
 0x101   :  { %v291_v55 = vadd.f32 %v513_v48, %v423_v42  ;;  %v516_v56 = vadd.f32 %v515_v53, %v514_v50  ;;  %v350_v57 = vadd.f32 %v349_v54, %v286_v52  ;;  %v376_v59 = vmax.f32 %v347_v49, 0.0 }
 0x103   :  { %v355_v58 = vadd.f32 %v541_v44, %v291_v55  ;;  %v294_v60 = vadd.f32 %v516_v56, %v423_v42  ;;  %v377_v61 = vmax.f32 %v350_v57, 0.0 }
 0x105   :  { %v358_v63 = vadd.f32 %v542_v51, %v294_v60  ;;  %v475_v0 = vpack.c.bf16 %v377_v61, %v376_v59  ;;  %v517_v1 = vpop.f32.mrb[8].mxu0  ;;  %v545_v2 = vpop.f32.mrb[8].mxu1  ;;  %v378_v6 = vmax.f32 %v355_v58, 0.0 }
 0x106   :  { %v371_v3 = vadd.f32 %v545_v2, %v307_v62  ;;  %v518_v4 = vpop.f32.mrb[9].mxu0  ;;  %v362_v5 = vpop.f32.mrb[9].mxu1 }
 0x107   :  { %v379_v7 = vmax.f32 %v358_v63, 0.0  ;;  %476 = vst [vmem:[%s725_s3] sm:$0xff] %v475_v0   ;;  %v519_v8 = vadd.f32 %v518_v4, %v517_v1  ;;  %v520_v9 = vpop.f32.mrb[10].mxu0  ;;  %v546_v10 = vpop.f32.mrb[10].mxu1 }
 0x108   :  { %v382_v11 = vmax.f32 %v371_v3, 0.0  ;;  %v521_v12 = vpop.f32.mrb[11].mxu0  ;;  %v365_v13 = vpop.f32.mrb[11].mxu1 }
 0x109   :  { %v480_v14 = vpack.c.bf16 %v379_v7, %v378_v6  ;;  %v299_v15 = vadd.f32 %v519_v8, %v423_v42  ;;  %v522_v16 = vadd.f32 %v521_v12, %v520_v9 }
 0x10a   :  { %v471_v17 = vpack.c.bf16 %v382_v11, %v382_v11 }
 0x10b   :  { %487 = vst [vmem:[%s725_s3 + $0x8] sm:$0xff] %v480_v14   ;;  %v363_v18 = vadd.f32 %v362_v5, %v299_v15  ;;  %v302_v19 = vadd.f32 %v522_v16, %v423_v42 }
 0x10c   :  { %418 = vst [vmem:[%s725_s3 + $0x18] sm:$0x1] %v471_v17 }
 0x10d   :  { %v366_v20 = vadd.f32 %v365_v13, %v302_v19  ;;  %v380_v21 = vmax.f32 %v363_v18, 0.0 }
 0x10f   :  { %v381_v22 = vmax.f32 %v366_v20, 0.0 }
 0x111   :  { %v485_v23 = vpack.c.bf16 %v381_v22, %v380_v21 }
 0x113   :  { %488 = vst [vmem:[%s725_s3 + $0x10] sm:$0xff] %v485_v23  }

// kernel: resnet_forward.19
= control target key start
LH: loop header
LB: loop body
LE: loop exit
PB: predicated region body
PF: predicated region fallthrough
CT: control target
= control target key end

     0   :  { %v274_v1 = vmov 0.0   ;;  %vm275_vm0 = vmmov 0   ;;  %vm34_vm1 = vcmask 1040384   ;;  %s353_s0 = inlined_call_operand.vmem [shape: bf16[2,25,128], index: 0, kind: input, shape index: {}]   ;;  %s354_s1 = inlined_call_operand.vmem [shape: bf16[128,128], index: 1, kind: input, shape index: {}]   ;;  %s355_s2 = inlined_call_operand.vmem [shape: f32[1,128], index: 2, kind: input, shape index: {}]   ;;  %s356_s3 = inlined_call_operand.hbm [shape: f32[2,128], index: 3, kind: output, shape index: {}]  }
   0x1   :  { %v242_v0 = vld [vmem:[%s354_s1] sm:$0xff]   ;;  %219 = vmatprep.subr.bf16.mxu0 %v274_v1  ;;  %v243_v2 = vld [vmem:[%s354_s1 + $0x8] sm:$0xff]   ;;  %235 = vmatprep.mubr.msk.bf16.mxu0 %vm275_vm0, %v274_v1  ;;  %v244_v3 = vld [vmem:[%s354_s1 + $0x10] sm:$0xff]  }
   0x2   :  { %220 = vmatpush3.bf16.msra.mxu0 %v242_v0  ;;  %v202_v4 = vld [vmem:[%s353_s0] sm:$0xff]   ;;  %v18_v5 = vld [vmem:[%s353_s0 + $0x8] ss:$16 sps:$4 sm:$0xff]   ;;  %v19_v6 = vld [vmem:[%s353_s0 + $0xc] sm:$0x1] }
   0x3   :  { %221 = vmatprep.subr.bf16.mxu0 %v274_v1  ;;  %v203_v7 = vunpack.c.l.bf16 %v202_v4  ;;  %v204_v8 = vunpack.c.h.bf16 %v202_v4  ;;  %v209_v9 = vld [vmem:[%s353_s0 + $0x10] sm:$0xff]   ;;  %v23_v10 = vld [vmem:[%s353_s0 + $0x1c] sm:$0x1]  ;;  %v26_v11 = vunpack.c.l.bf16 %v18_v5  ;;  %v27_v12 = vunpack.c.l.bf16 %v19_v6 }
   0x4   :  { %v245_v13 = vld [vmem:[%s354_s1 + $0x18] sm:$0xff]   ;;  %v207_v14 = vunpack.c.l.bf16 %v209_v9  ;;  %v208_v15 = vunpack.c.h.bf16 %v209_v9  ;;  %v30_v16 = vunpack.c.h.bf16 %v18_v5  ;;  %v31_v17 = vunpack.c.l.bf16 %v23_v10 }
   0x6   :  { %222 = vmatpush3.bf16.msra.mxu0 %v243_v2 }
   0x7   :  { %223 = vmatprep.subr.bf16.mxu0 %v274_v1 }
   0xa   :  { %224 = vmatpush3.bf16.msra.mxu0 %v244_v3 }
   0xb   :  { %8 = vsyncpa [#allocation3], 0  ;;  %225 = vmatprep.subr.bf16.mxu0 %v274_v1  ;;  %v32_v18 = vadd.f32 %v204_v8, %v203_v7  ;;  %v35_v19 = vsel %vm34_vm1, %v27_v12, 0.0  ;;  %v43_v20 = vadd.f32 %v208_v15, %v207_v14  ;;  %v45_v22 = vsel %vm34_vm1, %v31_v17, 0.0  ;;  %v246_v23 = vld [vmem:[%s354_s1 + $0x20] sm:$0xff]   ;;  %v247_v28 = vld [vmem:[%s354_s1 + $0x28] sm:$0xff]  }
   0xc   :  { %v248_v33 = vld [vmem:[%s354_s1 + $0x30] sm:$0xff]   ;;  %v249_v38 = vld [vmem:[%s354_s1 + $0x38] sm:$0xff]   ;;  %vm85_vm2 = vcmask 1041409   ;;  %v192_v50 = vld [vmem:[%s355_s2] ss:$0 sm:$0xff]  ;;  %s276_s1 = smov [#allocation2]  }
   0xd   :  { %v33_v21 = vadd.f32 %v32_v18, %v26_v11  ;;  %v44_v24 = vadd.f32 %v43_v20, %v30_v16  ;;  %s184_s12 = sshll.u32 %s276_s1, 4  ;;  %s185_s12 = int_to_ptr.vmem [resolvable:$true] %s184_s12 }
   0xe   :  { %226 = vmatpush3.bf16.msra.mxu0 %v245_v13  ;;  %s250_s13 = scalar_lea.vmem %s185_s12, 32  ;;  %p255_p1 = scmp.lt.s32.totalorder %s185_s12, %s185_s12 }
   0xf   :  { %227 = vmatprep.subr.bf16.mxu0 %v274_v1  ;;  %v36_v25 = vadd.f32 %v35_v19, %v33_v21  ;;  %v46_v26 = vadd.f32 %v45_v22, %v44_v24  ;;  %p251_p0 = scmp.ne.s32.totalorder %s185_s12, %s250_s13  ;;  %p256_p2 = scmp.lt.s32.totalorder %s250_s13, %s250_s13 }
  0x11   :  { %v37_v27 = vrot.slane %v36_v25, 4  ;;  %v47_v29 = vrot.slane %v46_v26, 4  ;;  %p257_p3 = por %p256_p2, %p255_p1 }
  0x12   :  { %228 = vmatpush3.bf16.msra.mxu0 %v246_v23 }
  0x13   :  { %229 = vmatprep.subr.bf16.mxu0 %v274_v1  ;;  %v38_v30 = vadd.f32 %v37_v27, %v36_v25  ;;  %v48_v31 = vadd.f32 %v47_v29, %v46_v26  ;;  %p258_p4 = pnand %p257_p3, %p251_p0 }
  0x15   :  { %v39_v32 = vrot.slane %v38_v30, 2  ;;  %v49_v34 = vrot.slane %v48_v31, 2 }
  0x16   :  { %230 = vmatpush3.bf16.msra.mxu0 %v247_v28 }
  0x17   :  { %231 = vmatprep.subr.bf16.mxu0 %v274_v1  ;;  %v40_v35 = vadd.f32 %v39_v32, %v38_v30  ;;  %v50_v36 = vadd.f32 %v49_v34, %v48_v31 }
  0x19   :  { %v41_v37 = vrot.slane %v40_v35, 1  ;;  %v51_v39 = vrot.slane %v50_v36, 1 }
  0x1a   :  { %232 = vmatpush3.bf16.msra.mxu0 %v248_v33 }
  0x1b   :  { %233 = vmatprep.subr.bf16.mxu0 %v274_v1  ;;  %v42_v40 = vadd.f32 %v41_v37, %v40_v35  ;;  %v52_v41 = vadd.f32 %v51_v39, %v50_v36 }
  0x1d   :  { %v54_v42 = vmul.f32 0.04, %v42_v40  ;;  %v55_v43 = vmul.f32 0.04, %v52_v41 }
  0x1e   :  { %234 = vmatpush3.bf16.msra.mxu0 %v249_v38 }
  0x1f   :  { %v56_v44 = vpack.c.bf16 %v54_v42, %v54_v42  ;;  %v57_v45 = vpack.c.bf16 %v55_v43, %v55_v43 }
  0x21   :  { %v83_v46 = vunpack.c.l.b16 %v56_v44  ;;  %v84_v47 = vunpack.c.l.b16 %v57_v45 }
  0x23   :  { %v86_v48 = vsel %vm85_vm2, %v84_v47, %v83_v46 }
  0x24   :  { %v87_v49 = vpack.c.b16 %v86_v48, %v86_v48 }
  0x26   :  { %236 = vmatmul.mubr.bf16.vlgmr.msra.gmra.mrb[0].mxu0 %v87_v49 }
  0xf9   :  { %v171_v51 = vpop.f32.mrb[0].mxu0 }
  0xfa   :  { %v172_v52 = vadd.f32 %v192_v50, %v171_v51  ;;  %v237_v53 = vpop.f32.mrb[1].mxu0 }
  0xfb   :  { %v174_v54 = vpop.f32.mrb[2].mxu0 }
  0xfc   :  { %177 = vst [vmem:[#allocation2] sm:$0x3] %v172_v52  ;;  %v238_v55 = vpop.f32.mrb[3].mxu0 }
  0xfd   :  { %261 = shalt.err (!%p258_p4)
}
  0xfe   :  { %s262_s2 = scalar_lea.hbm %s356_s3, 32 }
  0xff   :  { %p263_p5 = scmp.ne.s32.totalorder %s356_s3, %s262_s2  ;;  %p266_p6 = scmp.lt.u32.totalorder %s262_s2, %s356_s3 }
 0x101   :  { %p268_p7 = pnand %p266_p6, %p263_p5 }
 0x103   :  { %271 = shalt.err (!%p268_p7)
}
 0x104   :  { %187 = dma.vmem_to_hbm [thread:$0]  %s185_s12, 32, %s356_s3, [#allocation3]  }
 0x105   :  { %272 = dma.done.wait [#allocation3], 32  }
 0x106   :  { %273 = vsyncadd [#allocation3], 4294967264 }
 0x107   :  { %191 = vsyncpa [#allocation3], 1 }

// kernel: resnet_forward.18
= control target key start
LH: loop header
LB: loop body
LE: loop exit
PB: predicated region body
PF: predicated region fallthrough
CT: control target
= control target key end

     0   :  { %vm426_vm0 = vcmask 523264   ;;  %s1196_s1 = inlined_call_operand.vmem [shape: bf16[576,128], index: 1, kind: input, shape index: {}]   ;;  %s1197_s0 = inlined_call_operand.vmem [shape: bf16[50,576], index: 0, kind: input, shape index: {}]   ;;  %s1198_s2 = inlined_call_operand.vmem [shape: f32[1,128], index: 2, kind: input, shape index: {}]   ;;  %s1199_s3 = inlined_call_operand.vmem [shape: bf16[50,128], index: 3, kind: input, shape index: {}]   ;;  %s1200_s4 = inlined_call_operand.vmem [shape: bf16[50,128], index: 4, kind: output, shape index: {}]  }
   0x1   :  { %v917_v0 = vld [vmem:[%s1196_s1 + $0x40] sm:$0xff]   ;;  %v921_v4 = vld [vmem:[%s1196_s1 + $0x48] sm:$0xff]   ;;  %v925_v8 = vld [vmem:[%s1196_s1 + $0x50] sm:$0xff]  }
   0x2   :  { %v918_v1 = vld [vmem:[%s1196_s1 + $0xc0] sm:$0xff]   ;;  %805 = vmatprep.subr.bf16.mxu0 %v917_v0  ;;  %v922_v5 = vld [vmem:[%s1196_s1 + $0xc8] sm:$0xff]   ;;  %v926_v9 = vld [vmem:[%s1196_s1 + $0xd0] sm:$0xff]  }
   0x3   :  { %v919_v2 = vld [vmem:[%s1196_s1] sm:$0xff]   ;;  %845 = vmatprep.subr.bf16.mxu1 %v918_v1  ;;  %v923_v6 = vld [vmem:[%s1196_s1 + $0x8] sm:$0xff]   ;;  %v927_v10 = vld [vmem:[%s1196_s1 + $0x10] sm:$0xff]  }
   0x4   :  { %v920_v3 = vld [vmem:[%s1196_s1 + $0x80] sm:$0xff]   ;;  %806 = vmatpush3.bf16.msra.mxu0 %v919_v2  ;;  %v924_v7 = vld [vmem:[%s1196_s1 + $0x88] sm:$0xff]   ;;  %v928_v11 = vld [vmem:[%s1196_s1 + $0x90] sm:$0xff]  }
   0x5   :  { %846 = vmatpush3.bf16.msra.mxu1 %v920_v3  ;;  %807 = vmatprep.subr.bf16.mxu0 %v921_v4  ;;  %v929_v12 = vld [vmem:[%s1196_s1 + $0x58] sm:$0xff]   ;;  %v933_v16 = vld [vmem:[%s1196_s1 + $0x60] sm:$0xff]   ;;  %v937_v20 = vld [vmem:[%s1196_s1 + $0x68] sm:$0xff]  }
   0x6   :  { %847 = vmatprep.subr.bf16.mxu1 %v922_v5  ;;  %v930_v13 = vld [vmem:[%s1196_s1 + $0xd8] sm:$0xff]   ;;  %v934_v17 = vld [vmem:[%s1196_s1 + $0xe0] sm:$0xff]   ;;  %v938_v21 = vld [vmem:[%s1196_s1 + $0xe8] sm:$0xff]  }
   0x7   :  { %v931_v14 = vld [vmem:[%s1196_s1 + $0x18] sm:$0xff]   ;;  %v935_v18 = vld [vmem:[%s1196_s1 + $0x20] sm:$0xff]   ;;  %v939_v22 = vld [vmem:[%s1196_s1 + $0x28] sm:$0xff]  }
   0x8   :  { %808 = vmatpush3.bf16.msra.mxu0 %v923_v6  ;;  %v932_v15 = vld [vmem:[%s1196_s1 + $0x98] sm:$0xff]   ;;  %v936_v19 = vld [vmem:[%s1196_s1 + $0xa0] sm:$0xff]   ;;  %v940_v23 = vld [vmem:[%s1196_s1 + $0xa8] sm:$0xff]  }
   0x9   :  { %848 = vmatpush3.bf16.msra.mxu1 %v924_v7  ;;  %809 = vmatprep.subr.bf16.mxu0 %v925_v8  ;;  %v941_v24 = vld [vmem:[%s1196_s1 + $0x70] sm:$0xff]   ;;  %v945_v28 = vld [vmem:[%s1196_s1 + $0x78] sm:$0xff]   ;;  %v954_v35 = vld [vmem:[%s1197_s0 + $0xc] ss:$20 sps:$4 sm:$0xff]  }
   0xa   :  { %849 = vmatprep.subr.bf16.mxu1 %v926_v9  ;;  %v942_v25 = vld [vmem:[%s1196_s1 + $0xf0] sm:$0xff]   ;;  %v946_v29 = vld [vmem:[%s1196_s1 + $0xf8] sm:$0xff]   ;;  %v955_v36 = vld [vmem:[%s1196_s1 + $0x100] sm:$0xff]   ;;  %535 = vmatprep.mubr.bf16.mxu1 %v954_v35 }
   0xb   :  { %v943_v26 = vld [vmem:[%s1196_s1 + $0x30] sm:$0xff]   ;;  %v947_v30 = vld [vmem:[%s1196_s1 + $0x38] sm:$0xff]   ;;  %v956_v37 = vld [vmem:[%s1197_s0 + $0x2c] ss:$20 sps:$4 sm:$0xff]  }
   0xc   :  { %810 = vmatpush3.bf16.msra.mxu0 %v927_v10  ;;  %v944_v27 = vld [vmem:[%s1196_s1 + $0xb0] sm:$0xff]   ;;  %v948_v31 = vld [vmem:[%s1196_s1 + $0xb8] sm:$0xff]   ;;  %v962_v39 = vld [vmem:[%s1196_s1 + $0x108] sm:$0xff]  }
   0xd   :  { %850 = vmatpush3.bf16.msra.mxu1 %v928_v11  ;;  %811 = vmatprep.subr.bf16.mxu0 %v929_v12  ;;  %v949_v32 = vld [vmem:[%s1197_s0] ss:$20 sps:$4 sm:$0xff]   ;;  %v951_v33 = vld [vmem:[%s1197_s0 + $0x4] ss:$20 sps:$4 sm:$0xff]   ;;  %v952_v34 = vld [vmem:[%s1197_s0 + $0x8] ss:$20 sps:$4 sm:$0xff]  }
   0xe   :  { %851 = vmatprep.subr.bf16.mxu1 %v930_v13  ;;  %471 = vmatprep.mubr.bf16.mxu0 %v951_v33  ;;  %v958_v38 = vld [vmem:[%s1197_s0 + $0x34] ss:$20 sps:$4 sm:$0xff]   ;;  %v961_v41 = vld [vmem:[%s1197_s0 + $0x30] ss:$20 sps:$4 sm:$0xff]   ;;  %v974_v45 = vld [vmem:[%s1196_s1 + $0x118] sm:$0xff]  }
   0xf   :  { %v960_v40 = vld [vmem:[%s1197_s0 + $0x28] ss:$20 sps:$4 sm:$0xff]   ;;  %v969_v44 = vld [vmem:[%s1196_s1 + $0x110] sm:$0xff]   ;;  %v37_v47 = vld [vmem:[%s1197_s0 + $0x80] sm:$0x11] }
  0x10   :  { %812 = vmatpush3.bf16.msra.mxu0 %v931_v14  ;;  %v963_v42 = vld [vmem:[%s1197_s0 + $0x54] ss:$20 sps:$4 sm:$0xff]   ;;  %v965_v43 = vld [vmem:[%s1197_s0 + $0x5c] ss:$20 sps:$4 sm:$0xff]   ;;  %v968_v49 = vld [vmem:[%s1197_s0 + $0x58] ss:$20 sps:$4 sm:$0xff]   ;;  %v718_v51 = vcombine.high %v37_v47, %v37_v47  ;;  %v717_v53 = vcombine.low %v37_v47, %v37_v47 }
  0x11   :  { %852 = vmatpush3.bf16.msra.mxu1 %v932_v15  ;;  %813 = vmatprep.subr.bf16.mxu0 %v933_v16  ;;  %v36_v46 = vld [vmem:[%s1197_s0 + $0x78] sm:$0x11]  ;;  %v967_v48 = vld [vmem:[%s1197_s0 + $0x50] ss:$20 sps:$4 sm:$0xff]   ;;  %v976_v55 = vld [vmem:[%s1197_s0 + $0x60] ss:$20 sps:$4 sm:$0xff]  }
  0x12   :  { %853 = vmatprep.subr.bf16.mxu1 %v934_v17  ;;  %v716_v50 = vcombine.high %v36_v46, %v36_v46  ;;  %v715_v52 = vcombine.low %v36_v46, %v36_v46  ;;  %v975_v54 = vld [vmem:[%s1197_s0 + $0x10] ss:$20 sps:$4 sm:$0xff]   ;;  %v977_v56 = vld [vmem:[%s1197_s0 + $0x38] ss:$20 sps:$4 sm:$0xff]   ;;  %v699_v60 = vld [vmem:[%s1198_s2] ss:$0 sm:$0xff] }
  0x13   :  { %v978_v57 = vld [vmem:[%s1197_s0 + $0x88] ss:$0 sps:$4 sm:$0x11]  }
  0x14   :  { %814 = vmatpush3.bf16.msra.mxu0 %v935_v18 }
  0x15   :  { %854 = vmatpush3.bf16.msra.mxu1 %v936_v19  ;;  %815 = vmatprep.subr.bf16.mxu0 %v937_v20 }
  0x16   :  { %855 = vmatprep.subr.bf16.mxu1 %v938_v21 }
  0x18   :  { %816 = vmatpush3.bf16.msra.mxu0 %v939_v22 }
  0x19   :  { %856 = vmatpush3.bf16.msra.mxu1 %v940_v23  ;;  %817 = vmatprep.subr.bf16.mxu0 %v941_v24 }
  0x1a   :  { %857 = vmatprep.subr.bf16.mxu1 %v942_v25 }
  0x1c   :  { %818 = vmatpush3.bf16.msra.mxu0 %v943_v26 }
  0x1d   :  { %858 = vmatpush3.bf16.msra.mxu1 %v944_v27  ;;  %819 = vmatprep.subr.bf16.mxu0 %v945_v28 }
  0x1e   :  { %859 = vmatprep.subr.bf16.mxu1 %v946_v29 }
  0x20   :  { %820 = vmatpush3.bf16.msra.mxu0 %v947_v30 }
  0x21   :  { %860 = vmatpush3.bf16.msra.mxu1 %v948_v31  ;;  %893 = vmatprep.subr.bf16.mxu0 %v955_v36 }
  0x22   :  { %909 = vmatprep.subr.bf16.mxu1 %v955_v36 }
  0x23   :  { %472 = vmatmul.mubr.bf16.vlgmr.msra.gmra.mrb[0].mxu0 %v949_v32 }
  0x24   :  { %536 = vmatmul.mubr.bf16.vlgmr.msra.gmra.mrb[0].mxu1 %v952_v34  ;;  %894 = vmatpush3.bf16.msra.mxu0 %v955_v36 }
  0x25   :  { %913 = vmatpush3.bf16.msra.mxu1 %v955_v36  ;;  %479 = vmatprep.mubr.bf16.mxu0 %v956_v37 }
  0x26   :  { %543 = vmatprep.mubr.bf16.mxu1 %v958_v38  ;;  %895 = vmatprep.subr.bf16.mxu0 %v962_v39 }
  0x27   :  { %910 = vmatprep.subr.bf16.mxu1 %v962_v39 }
  0x28   :  { %896 = vmatpush3.bf16.msra.mxu0 %v962_v39 }
  0x29   :  { %914 = vmatpush3.bf16.msra.mxu1 %v962_v39  ;;  %897 = vmatprep.subr.bf16.mxu0 %v969_v44 }
  0x2a   :  { %911 = vmatprep.subr.bf16.mxu1 %v969_v44 }
  0x2b   :  { %480 = vmatmul.mubr.bf16.gmra.mrb[4].mxu0 %v960_v40 }
  0x2c   :  { %544 = vmatmul.mubr.bf16.gmra.mrb[4].mxu1 %v961_v41  ;;  %487 = vmatprep.mubr.bf16.mxu0 %v963_v42 }
  0x2d   :  { %551 = vmatprep.mubr.bf16.mxu1 %v965_v43  ;;  %898 = vmatpush3.bf16.msra.mxu0 %v969_v44 }
  0x2e   :  { %915 = vmatpush3.bf16.msra.mxu1 %v969_v44  ;;  %899 = vmatprep.subr.bf16.mxu0 %v974_v45 }
  0x2f   :  { %912 = vmatprep.subr.bf16.mxu1 %v974_v45 }
  0x31   :  { %900 = vmatpush3.bf16.msra.mxu0 %v974_v45 }
  0x32   :  { %916 = vmatpush3.bf16.msra.mxu1 %v974_v45 }
  0x33   :  { %488 = vmatmul.mubr.bf16.gmra.mrb[8].mxu0 %v967_v48 }
  0x34   :  { %552 = vmatmul.mubr.bf16.gmra.mrb[8].mxu1 %v968_v49  ;;  %495 = vmatprep.mubr.bf16.mxu0 %v716_v50 }
  0x35   :  { %559 = vmatprep.mubr.bf16.mxu1 %v718_v51 }
  0x3b   :  { %496 = vmatmul.mubr.bf16.gmra.mrb[12].mxu0 %v715_v52 }
  0x3c   :  { %560 = vmatmul.mubr.bf16.gmra.mrb[12].mxu1 %v717_v53  ;;  %901 = vmatprep.mubr.msk.bf16.mxu0 %vm426_vm0, %v975_v54  ;;  %v801_v54 = vld [vmem:[%s1199_s3 + $0x8] sm:$0xff]  }
  0x3d   :  { %905 = vmatprep.mubr.msk.bf16.mxu1 %vm426_vm0, %v976_v55  ;;  %v637_v55 = vld [vmem:[%s1199_s3 + $0x18] sm:$0x1] }
  0x43   :  { %902 = vmatmul.mubr.msk.bf16.vlgmr.msra.gmra.mrb[16].mxu0 %vm426_vm0, %v977_v56  ;;  %v775_v56 = vld [vmem:[%s1199_s3] sm:$0xff]  }
  0x44   :  { %906 = vmatmul.mubr.msk.bf16.vlgmr.msra.gmra.mrb[16].mxu1 %vm426_vm0, %v978_v57 }
  0xf6   :  { %v821_v58 = vpop.f32.mrb[0].mxu0 }
  0xf7   :  { %v861_v59 = vpop.f32.mrb[0].mxu1  ;;  %v822_v61 = vpop.f32.mrb[1].mxu0 }
  0xf8   :  { %v823_v62 = vadd.f32 %v822_v61, %v821_v58  ;;  %v862_v63 = vpop.f32.mrb[1].mxu1  ;;  %v824_v0 = vpop.f32.mrb[2].mxu0  ;;  %v802_v58 = vld [vmem:[%s1199_s3 + $0x10] sm:$0xff]   ;;  %v644_v61 = vunpack.c.l.bf16 %v637_v55 }
  0xf9   :  { %v863_v1 = vadd.f32 %v862_v63, %v861_v59  ;;  %v864_v2 = vpop.f32.mrb[2].mxu1  ;;  %v825_v3 = vpop.f32.mrb[3].mxu0  ;;  %v780_v59 = vunpack.c.l.bf16 %v801_v54 }
  0xfa   :  { %v474_v4 = vadd.f32 %v823_v62, %v699_v60  ;;  %v826_v5 = vadd.f32 %v825_v3, %v824_v0  ;;  %v865_v6 = vpop.f32.mrb[3].mxu1  ;;  %v776_v62 = vunpack.c.l.bf16 %v775_v56  ;;  %v781_v3 = vunpack.c.h.bf16 %v801_v54 }
  0xfb   :  { %v866_v7 = vadd.f32 %v865_v6, %v864_v2  ;;  %v784_v2 = vunpack.c.l.bf16 %v802_v58 }
  0xfc   :  { %v477_v8 = vadd.f32 %v826_v5, %v699_v60  ;;  %v538_v9 = vadd.f32 %v863_v1, %v474_v4 }
  0xfe   :  { %v827_v10 = vpop.f32.mrb[4].mxu0  ;;  %v1169_v11 = vadd.f32 %v866_v7, %v477_v8  ;;  %v777_v8 = vunpack.c.h.bf16 %v775_v56 }
  0xff   :  { %v867_v12 = vpop.f32.mrb[4].mxu1  ;;  %v828_v13 = vpop.f32.mrb[5].mxu0 }
 0x100   :  { %v829_v14 = vadd.f32 %v828_v13, %v827_v10  ;;  %v868_v15 = vpop.f32.mrb[5].mxu1  ;;  %v830_v16 = vpop.f32.mrb[6].mxu0 }
 0x101   :  { %v869_v17 = vadd.f32 %v868_v15, %v867_v12  ;;  %v870_v18 = vpop.f32.mrb[6].mxu1  ;;  %v831_v19 = vpop.f32.mrb[7].mxu0 }
 0x102   :  { %v482_v20 = vadd.f32 %v829_v14, %v699_v60  ;;  %v832_v21 = vadd.f32 %v831_v19, %v830_v16  ;;  %v871_v22 = vpop.f32.mrb[7].mxu1  ;;  %v785_v16 = vunpack.c.h.bf16 %v802_v58 }
 0x103   :  { %v872_v23 = vadd.f32 %v871_v22, %v870_v18 }
 0x104   :  { %v485_v24 = vadd.f32 %v832_v21, %v699_v60  ;;  %v546_v25 = vadd.f32 %v869_v17, %v482_v20 }
 0x106   :  { %v833_v26 = vpop.f32.mrb[8].mxu0  ;;  %v549_v27 = vadd.f32 %v872_v23, %v485_v24 }
 0x107   :  { %v873_v28 = vpop.f32.mrb[8].mxu1  ;;  %v834_v29 = vpop.f32.mrb[9].mxu0 }
 0x108   :  { %v835_v30 = vadd.f32 %v834_v29, %v833_v26  ;;  %v874_v31 = vpop.f32.mrb[9].mxu1  ;;  %v836_v32 = vpop.f32.mrb[10].mxu0 }
 0x109   :  { %v875_v33 = vadd.f32 %v874_v31, %v873_v28  ;;  %v876_v34 = vpop.f32.mrb[10].mxu1  ;;  %v837_v35 = vpop.f32.mrb[11].mxu0 }
 0x10a   :  { %v490_v36 = vadd.f32 %v835_v30, %v699_v60  ;;  %v838_v37 = vadd.f32 %v837_v35, %v836_v32  ;;  %v877_v38 = vpop.f32.mrb[11].mxu1 }
 0x10b   :  { %v878_v39 = vadd.f32 %v877_v38, %v876_v34 }
 0x10c   :  { %v493_v40 = vadd.f32 %v838_v37, %v699_v60  ;;  %v554_v41 = vadd.f32 %v875_v33, %v490_v36 }
 0x10e   :  { %v839_v42 = vpop.f32.mrb[12].mxu0  ;;  %v557_v43 = vadd.f32 %v878_v39, %v493_v40 }
 0x10f   :  { %v879_v44 = vpop.f32.mrb[12].mxu1  ;;  %v840_v45 = vpop.f32.mrb[13].mxu0 }
 0x110   :  { %v841_v46 = vadd.f32 %v840_v45, %v839_v42  ;;  %v880_v47 = vpop.f32.mrb[13].mxu1  ;;  %v842_v48 = vpop.f32.mrb[14].mxu0 }
 0x111   :  { %v881_v49 = vadd.f32 %v880_v47, %v879_v44  ;;  %v882_v50 = vpop.f32.mrb[14].mxu1  ;;  %v843_v51 = vpop.f32.mrb[15].mxu0 }
 0x112   :  { %v498_v52 = vadd.f32 %v841_v46, %v699_v60  ;;  %v883_v53 = vpop.f32.mrb[15].mxu1 }
 0x114   :  { %v562_v57 = vadd.f32 %v881_v49, %v498_v52 }
 0x116   :  { %v903_v60 = vpop.f32.mrb[16].mxu0 }
 0x117   :  { %v610_v63 = vadd.f32 %v903_v60, %v546_v25  ;;  %v907_v0 = vpop.f32.mrb[16].mxu1  ;;  %v601_v1 = vpop.f32.mrb[17].mxu0 }
 0x118   :  { %v626_v4 = vadd.f32 %v907_v0, %v562_v57  ;;  %v602_v5 = vadd.f32 %v601_v1, %v538_v9  ;;  %v617_v6 = vpop.f32.mrb[17].mxu1  ;;  %v904_v7 = vpop.f32.mrb[18].mxu0 }
 0x119   :  { %v647_v10 = vadd.f32 %v780_v59, %v610_v63  ;;  %v618_v12 = vadd.f32 %v617_v6, %v554_v41  ;;  %v613_v13 = vadd.f32 %v904_v7, %v549_v27  ;;  %v908_v14 = vpop.f32.mrb[18].mxu1  ;;  %v604_v15 = vpop.f32.mrb[19].mxu0 }
 0x11a   :  { %v651_v17 = vadd.f32 %v644_v61, %v626_v4  ;;  %v645_v18 = vadd.f32 %v776_v62, %v602_v5  ;;  %v605_v19 = vadd.f32 %v604_v15, %v1169_v11  ;;  %v620_v20 = vpop.f32.mrb[19].mxu1 }
 0x11b   :  { %v649_v21 = vadd.f32 %v784_v2, %v618_v12  ;;  %v648_v22 = vadd.f32 %v781_v3, %v613_v13  ;;  %v621_v23 = vadd.f32 %v620_v20, %v557_v43  ;;  %v654_v9 = vmax.f32 %v647_v10, 0.0 }
 0x11c   :  { %v658_v24 = vmax.f32 %v651_v17, 0.0  ;;  %v646_v25 = vadd.f32 %v777_v8, %v605_v19  ;;  %v652_v30 = vmax.f32 %v645_v18, 0.0 }
 0x11d   :  { %v655_v26 = vmax.f32 %v648_v22, 0.0  ;;  %v650_v28 = vadd.f32 %v785_v16, %v621_v23  ;;  %v656_v27 = vmax.f32 %v649_v21, 0.0 }
 0x11e   :  { %v773_v29 = vpack.c.bf16 %v658_v24, %v658_v24  ;;  %v653_v31 = vmax.f32 %v646_v25, 0.0 }
 0x11f   :  { %v794_v32 = vpack.c.bf16 %v655_v26, %v654_v9  ;;  %v657_v33 = vmax.f32 %v650_v28, 0.0 }
 0x120   :  { %694 = vst [vmem:[%s1200_s4 + $0x18] sm:$0x1] %v773_v29  ;;  %v789_v11 = vpack.c.bf16 %v653_v31, %v652_v30 }
 0x121   :  { %803 = vst [vmem:[%s1200_s4 + $0x8] sm:$0xff] %v794_v32   ;;  %v799_v34 = vpack.c.bf16 %v657_v33, %v656_v27 }
 0x122   :  { %790 = vst [vmem:[%s1200_s4] sm:$0xff] %v789_v11  }
 0x123   :  { %804 = vst [vmem:[%s1200_s4 + $0x10] sm:$0xff] %v799_v34  }

</bundles_post_ra>
